<compile_context>
chip_gen: v7x
topology: tpu7x:2x2x1
jax: 0.10.0
libtpu: 0.0.40
codegen_flags: <defaults>
</compile_context>

<pallas_src>
import functools

import numpy as np
import jax
import jax.numpy as jnp
from jax import lax
from jax.experimental import pallas as pl
from jax.experimental.pallas import tpu as pltpu

LANE = 128
VMEM_LIMIT = 32 * 1024 * 1024

# PyTorch LSTM gate order is (i, f, g, o); kernel layout is (i, f, o, g) so one
# sigmoid covers a contiguous 3*Hp slice and one tanh covers the last Hp.
GATE_ORDER = (0, 1, 3, 2)


def _round_up(n, m):
    return ((n + m - 1) // m) * m


# ----------------------------------------------------------------------------
# Kernel 1: bi-LSTM "last valid token" name encoder, input projection fused in.
#   x_fwd: (T, Nn, Din)  time-major name embeddings (rows padded to a multiple of 8)
#   x_last:(Nn, Din)     embedding of the last valid token per name
#   lens:  (Nn, 1) int32
#   Output (Nn, 2*Hp) = [fwd hidden at t=len-1 | bwd hidden at t=len-1].
# Packed-sequence semantics: the reverse direction's output at t=len-1 is its first
# step (h0 = c0 = 0), so the backward pass is a single cell (whh_b never used).
# ----------------------------------------------------------------------------
def _bilstm_kernel(xf_ref, xl_ref, len_ref, wf_ref, bf_ref, wb_ref, bb_ref,
                   whh_ref, o_ref):
    T = xf_ref.shape[0]
    Nn = xf_ref.shape[1]
    Hp = whh_ref.shape[0]
    lens = len_ref[...]                                   # (Nn, 1) int32

    def cell(gates, c_prev):
        sg = jax.nn.sigmoid(gates[:, :3 * Hp])            # one wide sigmoid (i,f,o)
        i = sg[:, 0:Hp]
        f = sg[:, Hp:2 * Hp]
        o = sg[:, 2 * Hp:3 * Hp]
        g = jnp.tanh(gates[:, 3 * Hp:4 * Hp])
        c = f * c_prev + i * g
        h = o * jnp.tanh(c)
        return h, c

    zeros = jnp.zeros((Nn, Hp), jnp.float32)
    wf = wf_ref[...]
    bf = bf_ref[...]
    whh = whh_ref[...]

    def step(t, carry):
        h, c, last = carry
        gates = (jnp.dot(xf_ref[t], wf, preferred_element_type=jnp.float32) + bf
                 + jnp.dot(h, whh, preferred_element_type=jnp.float32))
        h, c = cell(gates, c)
        last = jnp.where(lens == t + 1, h, last)          # keep state at last valid token
        return h, c, last

    _, _, last_f = lax.fori_loop(0, T, step, (zeros, zeros, zeros), unroll=True)

    gates_b = (jnp.dot(xl_ref[...], wb_ref[...], preferred_element_type=jnp.float32)
               + bb_ref[...])
    h_b, _ = cell(gates_b, zeros)                         # backward: single cell, h0=c0=0

    o_ref[:, 0:Hp] = last_f
    o_ref[:, Hp:2 * Hp] = h_b


def bilstm_encode(x_fwd, x_last, lens_i32, wf, bf, wb, bb, whh):
    T, Nn_pad, Din = x_fwd.shape
    Hp = whh.shape[0]
    tile = Nn_pad if Nn_pad <= 128 else 128
    assert Nn_pad % tile == 0
    G = Nn_pad // tile
    return pl.pallas_call(
        _bilstm_kernel,
        out_shape=jax.ShapeDtypeStruct((Nn_pad, 2 * Hp), jnp.float32),
        grid_spec=pltpu.PrefetchScalarGridSpec(
            num_scalar_prefetch=0,
            grid=(G,),
            in_specs=[
                pl.BlockSpec((T, tile, Din), lambda i: (0, i, 0)),
                pl.BlockSpec((tile, Din), lambda i: (i, 0)),
                pl.BlockSpec((tile, 1), lambda i: (i, 0)),
                pl.BlockSpec((Din, 4 * Hp), lambda i: (0, 0)),
                pl.BlockSpec((1, 4 * Hp), lambda i: (0, 0)),
                pl.BlockSpec((Din, 4 * Hp), lambda i: (0, 0)),
                pl.BlockSpec((1, 4 * Hp), lambda i: (0, 0)),
                pl.BlockSpec((Hp, 4 * Hp), lambda i: (0, 0)),
            ],
            out_specs=pl.BlockSpec((tile, 2 * Hp), lambda i: (i, 0)),
        ),
        compiler_params=pltpu.CompilerParams(
            dimension_semantics=("parallel",),
            vmem_limit_bytes=VMEM_LIMIT),
    )(x_fwd, x_last, lens_i32, wf, bf, wb, bb, whh)


# ----------------------------------------------------------------------------
# Kernel 2: fused graph path (single launch, single grid step):
#   h0 = relu(orig @ W_lower + b_lower)
#   for l in 0..2:   hw = h @ [W_{l,0}|...|W_{l,5}]      (one 768-lane matmul)
#                    h  = relu( sum_r A_r @ hw_r + b_l )
#   out = relu(h @ W_upper + b_up) + relu(orig @ W_skip + b_sk)
# Node features stay VMEM-resident across all three layers. Adjacency is bf16
# (exact 0/1 counts), upcast in-kernel for exact f32 arithmetic.
# ----------------------------------------------------------------------------
def _graph_kernel(orig_ref, a_ref, wl_ref, bl_ref, wg_ref, bg_ref,
                  wu_ref, bu_ref, ws_ref, bs_ref, o_ref):
    R = a_ref.shape[0]
    Lp = wl_ref.shape[1]
    nlayers = wg_ref.shape[0]

    orig = orig_ref[...]
    h = jnp.maximum(
        jnp.dot(orig, wl_ref[...], preferred_element_type=jnp.float32) + bl_ref[...],
        0.0)

    for l in range(nlayers):                       # 3 NGCN layers, statically unrolled
        hw = jnp.dot(h, wg_ref[l], preferred_element_type=jnp.float32)   # (Np, R*Lp)
        acc = jnp.zeros_like(h)
        for r in range(R):                         # 6 relations, statically unrolled
            acc = acc + jnp.dot(a_ref[r].astype(jnp.float32),
                                hw[:, r * Lp:(r + 1) * Lp],
                                preferred_element_type=jnp.float32)
        h = jnp.maximum(acc + bg_ref[l], 0.0)

    up = jnp.maximum(
        jnp.dot(h, wu_ref[...], preferred_element_type=jnp.float32) + bu_ref[...], 0.0)
    sk = jnp.maximum(
        jnp.dot(orig, ws_ref[...], preferred_element_type=jnp.float32) + bs_ref[...], 0.0)
    o_ref[...] = up + sk


def graph_forward(orig_nodes, adj_bf16, kp):
    # TODO(synk): add node-row tiling for very large schemas (v7x 64 MiB VMEM);
    # whole-array VMEM mapping is fine for typical schema graph sizes.
    Np = orig_nodes.shape[0]
    Lp = kp["w_lower_pad"].shape[1]
    Dp = kp["w_upper_pad"].shape[1]
    return pl.pallas_call(
        _graph_kernel,
        out_shape=jax.ShapeDtypeStruct((Np, Dp), jnp.float32),
        in_specs=[pl.BlockSpec(memory_space=pltpu.MemorySpace.VMEM)] * 10,
        out_specs=pl.BlockSpec(memory_space=pltpu.MemorySpace.VMEM),
        compiler_params=pltpu.CompilerParams(vmem_limit_bytes=VMEM_LIMIT),
    )(orig_nodes, adj_bf16,
      kp["w_lower_pad"], kp["b_lower_pad"].reshape(1, Lp),
      kp["w_gcn_cat_pad"], kp["b_gcn_pad"],
      kp["w_upper_pad"], kp["b_upper_pad"].reshape(1, Dp),
      kp["w_skip_pad"], kp["b_skip_pad"].reshape(1, Dp))


# ----------------------------------------------------------------------------
# Host-side: dense per-relation adjacency for the batched DGL graph (bf16, exact 0/1),
# node count padded to a multiple of 16.
# ----------------------------------------------------------------------------
def build_batched_graph(batch_par_tab_nums, batch_foreign_keys):
    num_rels = 6
    offsets = [max(p) + 1 for p in batch_par_tab_nums]
    ncols = [len(p) for p in batch_par_tab_nums]
    sizes = [o + n for o, n in zip(offsets, ncols)]
    bases = np.concatenate([[0], np.cumsum(sizes)[:-1]]).astype(int)
    N = int(sum(sizes))
    Np = _round_up(max(N, 1), 16)
    A = np.zeros((num_rels, Np, Np), np.float32)
    for b, par in enumerate(batch_par_tab_nums):
        base, off = int(bases[b]), offsets[b]
        for i in range(off):                      # rel 0: table self loops
            A[0, base + i, base + i] += 1.0
        for i in range(ncols[b]):                 # rel 1: raw-id self loops (as in reference)
            A[1, base + i, base + i] += 1.0
        for idx, p in enumerate(par):
            if p != -1:
                tnode, cnode = base + p, base + off + idx
                A[2, cnode, tnode] += 1.0         # table -> child column
                A[3, tnode, cnode] += 1.0         # column -> parent table
        for (s, d) in batch_foreign_keys[b]:
            A[4, base + off + d, base + off + s] += 1.0
            A[5, base + off + s, base + off + d] += 1.0
    return jnp.asarray(A, jnp.bfloat16), bases, offsets, ncols, N, Np


# ----------------------------------------------------------------------------
# Parameter init (natural shapes) + padded / stacked kernel-ready forms.
# ----------------------------------------------------------------------------
def init_params(key, hidden_dim, lower_dim):
    H = hidden_dim // 2
    ks = jax.random.split(key, 12)

    def xavier(k, shape, gain=1.0):
        fan_in, fan_out = shape[-2], shape[-1]
        a = gain * np.sqrt(6.0 / (fan_in + fan_out))
        return jax.random.uniform(k, shape, jnp.float32, -a, a)

    p = {}
    # bidirectional LSTM weights, stored transposed: (in, 4H) / (H, 4H); b_ih+b_hh folded.
    p["wih_f"] = xavier(ks[0], (hidden_dim, 4 * H))
    p["whh_f"] = xavier(ks[1], (H, 4 * H))
    p["b_f"] = jnp.zeros((4 * H,), jnp.float32)
    p["wih_b"] = xavier(ks[2], (hidden_dim, 4 * H))
    p["whh_b"] = xavier(ks[3], (H, 4 * H))   # unused in fwd pass (bwd h0=0 under packing)
    p["b_b"] = jnp.zeros((4 * H,), jnp.float32)
    # lower / upper / skipper (stored as (in, out))
    p["w_lower"] = xavier(ks[4], (hidden_dim, lower_dim))
    p["b_lower"] = jnp.zeros((lower_dim,), jnp.float32)
    p["w_upper"] = xavier(ks[5], (lower_dim, hidden_dim))
    p["b_upper"] = jnp.zeros((hidden_dim,), jnp.float32)
    p["w_skip"] = xavier(ks[6], (hidden_dim, hidden_dim))
    p["b_skip"] = jnp.zeros((hidden_dim,), jnp.float32)
    # three NGCN layers: (num_rels=6, lower, lower), xavier with relu gain; bias zeros
    gain = np.sqrt(2.0)
    for li, k in zip((1, 2, 3), ks[7:10]):
        p[f"w_gcn{li}"] = xavier(k, (6, lower_dim, lower_dim), gain)
        p[f"b_gcn{li}"] = jnp.zeros((lower_dim,), jnp.float32)
    return p


def _pad2(w, rows, cols):
    return jnp.zeros((rows, cols), jnp.float32).at[:w.shape[0], :w.shape[1]].set(w)


def _pad1(b, n):
    return jnp.zeros((n,), jnp.float32).at[:b.shape[0]].set(b)


def _pad_gates(w, H, Hp):
    """(..., 4H) PyTorch (i,f,g,o) -> (..., 4Hp) kernel layout (i,f,o,g), each gate
    zero-padded to Hp lanes."""
    out = jnp.zeros(w.shape[:-1] + (4 * Hp,), jnp.float32)
    for slot, src in enumerate(GATE_ORDER):
        out = out.at[..., slot * Hp:slot * Hp + H].set(w[..., src * H:(src + 1) * H])
    return out


def prepare_params(p, hidden_dim, lower_dim):
    """Zero-pad feature dims to 128 lanes (lane-dense stores, aligned gate slices).
    Pads provably stay zero through the LSTM gates, relu's and GCN layers."""
    H = hidden_dim // 2
    Hp = _round_up(H, LANE)
    Lp = _round_up(lower_dim, LANE)
    Dp = _round_up(hidden_dim, LANE)

    wih_f_pad = _pad_gates(p["wih_f"], H, Hp)                     # (hidden, 4Hp)
    wih_b_pad = _pad_gates(p["wih_b"], H, Hp)
    b_f_pad = _pad_gates(p["b_f"][None, :], H, Hp)                # (1, 4Hp)
    b_b_pad = _pad_gates(p["b_b"][None, :], H, Hp)
    whh_f_pad = jnp.zeros((Hp, 4 * Hp), jnp.float32).at[:H].set(
        _pad_gates(p["whh_f"], H, Hp))

    # relation-folded GCN weights: W_cat[l] = [W_{l,0} | ... | W_{l,5}]  (Lp, 6*Lp)
    w_gcn = jnp.stack([p[f"w_gcn{i}"] for i in (1, 2, 3)])        # (3, 6, L, L)
    w_gcn_pad = jnp.zeros((3, 6, Lp, Lp), jnp.float32).at[
        :, :, :lower_dim, :lower_dim].set(w_gcn)
    w_gcn_cat = jnp.transpose(w_gcn_pad, (0, 2, 1, 3)).reshape(3, Lp, 6 * Lp)
    b_gcn_pad = jnp.stack([_pad1(p[f"b_gcn{i}"], Lp).reshape(1, Lp) for i in (1, 2, 3)])

    return {
        "wih_f_pad": wih_f_pad, "b_f_pad": b_f_pad,
        "wih_b_pad": wih_b_pad, "b_b_pad": b_b_pad,
        "whh_f_pad": whh_f_pad,
        "w_lower_pad": _pad2(p["w_lower"], hidden_dim, Lp),
        "b_lower_pad": _pad1(p["b_lower"], Lp),
        "w_upper_pad": _pad2(p["w_upper"], Lp, Dp),
        "b_upper_pad": _pad1(p["b_upper"], Dp),
        "w_skip_pad": _pad2(p["w_skip"], hidden_dim, Dp),
        "b_skip_pad": _pad1(p["b_skip"], Dp),
        "w_gcn_cat_pad": w_gcn_cat,                                # (3, Lp, 6*Lp)
        "b_gcn_pad": b_gcn_pad,                                    # (3, 1, Lp)
    }


# ----------------------------------------------------------------------------
# Jitted device-side forward (two pallas_calls + cheap gathers).
# ----------------------------------------------------------------------------
@functools.partial(jax.jit, static_argnames=("nn_pad",))
def _forward_core(kp, emb_all, last_idx, lens_pad, adj, node_idx, node_mask,
                  tab_idx, tab_mask, col_idx, col_mask, *, nn_pad):
    Nall, T, Din = emb_all.shape
    hidden = kp["w_skip_pad"].shape[0]
    H = hidden // 2
    Hp = kp["whh_f_pad"].shape[0]

    # time-major, row-padded inputs for the fused projection+recurrence LSTM kernel
    x_fwd = jnp.zeros((T, nn_pad, Din), jnp.float32).at[:, :Nall, :].set(
        jnp.transpose(emb_all, (1, 0, 2)))
    x_last = jnp.zeros((nn_pad, Din), jnp.float32).at[:Nall, :].set(
        emb_all[jnp.arange(Nall), last_idx])

    # --- launch 1: bi-LSTM name encoder (columns + tables batched together) ---
    name_pad = bilstm_encode(x_fwd, x_last, lens_pad,
                             kp["wih_f_pad"], kp["b_f_pad"],
                             kp["wih_b_pad"], kp["b_b_pad"],
                             kp["whh_f_pad"])                       # (nn_pad, 2*Hp)
    name_out = jnp.concatenate([name_pad[:, :H], name_pad[:, Hp:Hp + H]], axis=1)

    # node-ordered origin features (tables first, then columns, per example)
    orig_nodes = name_out[node_idx] * node_mask                     # (Np, hidden)

    # --- launch 2: fused lower -> 3x relational GCN -> upper + skip ---
    out_nodes = graph_forward(orig_nodes, adj, kp)                  # (Np, Dp)
    out_h = out_nodes[:, :hidden]

    # un-batch into per-example padded tensors; padded rows reproduce PyTorch's
    # upper(0) + skipper(0) = relu(b_upper) + relu(b_skip)
    pad_vec = (jnp.maximum(kp["b_upper_pad"][:hidden], 0.0)
               + jnp.maximum(kp["b_skip_pad"][:hidden], 0.0))
    tab_out = out_h[tab_idx] * tab_mask + (1.0 - tab_mask) * pad_vec
    col_out = out_h[col_idx] * col_mask + (1.0 - col_mask) * pad_vec
    return tab_out, col_out, out_h


# ----------------------------------------------------------------------------
# SchemaEncoder.forward (host glue: numpy index/adjacency prep, then one jit call)
# ----------------------------------------------------------------------------
def schema_encoder_forward(kp, batch_par_tab_nums, batch_foreign_keys,
                           col_emb_var, col_name_len, col_len,
                           table_emb_var, table_name_len, table_len):
    # NOTE: dropout=0.3 on the LSTM is a no-op with num_layers=1 (as in PyTorch).
    B = len(col_len)
    max_col_len, max_tab_len = max(col_len), max(table_len)
    n_col_rows = col_emb_var.shape[0]
    T = col_emb_var.shape[1]

    lens_np = np.concatenate([np.asarray(col_name_len, np.int32),
                              np.asarray(table_name_len, np.int32)])
    Nall = int(lens_np.shape[0])
    nn_pad = _round_up(Nall, 8) if Nall <= 128 else _round_up(Nall, 128)
    lens_pad = np.zeros((nn_pad, 1), np.int32)
    lens_pad[:Nall, 0] = lens_np
    last_idx = np.maximum(lens_np - 1, 0).astype(np.int32)

    adj, bases, offsets, ncols, N, Np = build_batched_graph(
        batch_par_tab_nums, batch_foreign_keys)

    # gather indices: per-example [tables | columns] node ordering out of the
    # batched name encodings, plus padded un-batching indices/masks
    col_start = np.concatenate([[0], np.cumsum(col_len)[:-1]]).astype(np.int32)
    tab_start = n_col_rows + np.concatenate([[0], np.cumsum(table_len)[:-1]]).astype(np.int32)
    node_idx = np.zeros((Np,), np.int32)
    node_mask = np.zeros((Np, 1), np.float32)
    tab_idx = np.zeros((B, max_tab_len), np.int32)
    tab_mask = np.zeros((B, max_tab_len, 1), np.float32)
    col_idx = np.zeros((B, max_col_len), np.int32)
    col_mask = np.zeros((B, max_col_len, 1), np.float32)
    pos = 0
    for b in range(B):
        base, off, nc = int(bases[b]), offsets[b], ncols[b]
        for i in range(off):
            node_idx[pos] = tab_start[b] + i
            node_mask[pos, 0] = 1.0
            pos += 1
        for i in range(nc):
            node_idx[pos] = col_start[b] + i
            node_mask[pos, 0] = 1.0
            pos += 1
        tab_idx[b, :off] = base + np.arange(off)
        tab_mask[b, :off, 0] = 1.0
        col_idx[b, :nc] = base + off + np.arange(nc)
        col_mask[b, :nc, 0] = 1.0

    emb_all = jnp.concatenate([col_emb_var, table_emb_var], axis=0)   # (Nall, T, hidden)

    tab_out, col_out, out_h = _forward_core(
        kp, emb_all,
        jnp.asarray(last_idx), jnp.asarray(lens_pad),
        adj, jnp.asarray(node_idx), jnp.asarray(node_mask),
        jnp.asarray(tab_idx), jnp.asarray(tab_mask),
        jnp.asarray(col_idx), jnp.asarray(col_mask),
        nn_pad=nn_pad)

    # TODO(synk): a DGLGraph object cannot be produced from JAX; the batched graph is
    # returned as its final node-feature array (bg.ndata['h']).
    return tab_out, col_out, out_h[:N]


if __name__ == "__main__":
    hidden_dim, lower_dim, T = 32, 16, 4

    # Schema: example 0 has 2 tables / 5 columns (+1 foreign key), example 1 has 1 table / 3 columns.
    batch_par_tab_nums = [[-1, 0, 0, 1, 1], [-1, 0, 0]]
    batch_foreign_keys = [[(2, 4)], []]
    col_len = [5, 3]
    table_len = [2, 1]
    col_name_len = np.array([2, 3, 1, 4, 2, 3, 1, 2], np.int32)
    table_name_len = np.array([2, 1, 3], np.int32)

    key = jax.random.PRNGKey(0)
    k_col, k_tab, k_par = jax.random.split(key, 3)
    col_emb_var = jax.random.normal(k_col, (int(sum(col_len)), T, hidden_dim), jnp.float32)
    table_emb_var = jax.random.normal(k_tab, (int(sum(table_len)), T, hidden_dim), jnp.float32)

    params = init_params(k_par, hidden_dim, lower_dim)
    kernel_params = prepare_params(params, hidden_dim, lower_dim)

    table_tensors, col_tensors, bg_ndata = schema_encoder_forward(
        kernel_params, batch_par_tab_nums, batch_foreign_keys,
        col_emb_var, col_name_len, col_len,
        table_emb_var, table_name_len, table_len)

    jax.block_until_ready((table_tensors, col_tensors, bg_ndata))
    assert table_tensors.shape == (2, 2, hidden_dim)
    assert col_tensors.shape == (2, 5, hidden_dim)
    assert bg_ndata.shape == (7 + 4, hidden_dim)
    assert bool(jnp.all(jnp.isfinite(table_tensors)))
    assert bool(jnp.all(jnp.isfinite(col_tensors)))
    assert bool(jnp.all(jnp.isfinite(bg_ndata)))
    print("KERNEL_OK")
</pallas_src>

<mosaic_0001>
module attributes {stable_mosaic.version = 11 : i64} {
  func.func @_bilstm_kernel(%arg0: i32, %arg1: memref<4x16x32xf32, #tpu.memory_space<vmem>>, %arg2: memref<16x32xf32, #tpu.memory_space<vmem>>, %arg3: memref<16x1xi32, #tpu.memory_space<vmem>>, %arg4: memref<32x512xf32, #tpu.memory_space<vmem>>, %arg5: memref<1x512xf32, #tpu.memory_space<vmem>>, %arg6: memref<32x512xf32, #tpu.memory_space<vmem>>, %arg7: memref<1x512xf32, #tpu.memory_space<vmem>>, %arg8: memref<128x512xf32, #tpu.memory_space<vmem>>, %arg9: memref<16x256xf32, #tpu.memory_space<vmem>>) attributes {dimension_semantics = [#tpu.dimension_semantics<parallel>], iteration_bounds = array<i64: 1>, scalar_prefetch = 0 : i64, scratch_operands = 0 : i64, tpu.core_type = #tpu.core_type<tc>, window_params = [{transform_indices = @transform_0, window_bounds = array<i64: 4, 16, 32>}, {transform_indices = @transform_1, window_bounds = array<i64: 16, 32>}, {transform_indices = @transform_2, window_bounds = array<i64: 16, 1>}, {pipeline_mode = #tpu.pipeline_mode<synchronous>, transform_indices = @transform_3, window_bounds = array<i64: 32, 512>}, {pipeline_mode = #tpu.pipeline_mode<synchronous>, transform_indices = @transform_4, window_bounds = array<i64: 1, 512>}, {pipeline_mode = #tpu.pipeline_mode<synchronous>, transform_indices = @transform_5, window_bounds = array<i64: 32, 512>}, {pipeline_mode = #tpu.pipeline_mode<synchronous>, transform_indices = @transform_6, window_bounds = array<i64: 1, 512>}, {pipeline_mode = #tpu.pipeline_mode<synchronous>, transform_indices = @transform_7, window_bounds = array<i64: 128, 512>}, {transform_indices = @transform_8, window_bounds = array<i64: 16, 256>}]} {
    %c0 = arith.constant 0 : index
    %c0_0 = arith.constant 0 : index
    %0 = vector.load %arg3[%c0, %c0_0] : memref<16x1xi32, #tpu.memory_space<vmem>>, vector<16x1xi32>
    %cst = arith.constant 0.000000e+00 : f32
    %1 = vector.broadcast %cst : f32 to vector<16x128xf32>
    %c0_1 = arith.constant 0 : index
    %c0_2 = arith.constant 0 : index
    %2 = vector.load %arg4[%c0_1, %c0_2] : memref<32x512xf32, #tpu.memory_space<vmem>>, vector<32x512xf32>
    %c0_3 = arith.constant 0 : index
    %c0_4 = arith.constant 0 : index
    %3 = vector.load %arg5[%c0_3, %c0_4] : memref<1x512xf32, #tpu.memory_space<vmem>>, vector<1x512xf32>
    %c0_5 = arith.constant 0 : index
    %c0_6 = arith.constant 0 : index
    %4 = vector.load %arg8[%c0_5, %c0_6] : memref<128x512xf32, #tpu.memory_space<vmem>>, vector<128x512xf32>
    %c0_i32 = arith.constant 0 : i32
    %5 = arith.index_cast %c0_i32 : i32 to index
    %c0_7 = arith.constant 0 : index
    %c0_8 = arith.constant 0 : index
    %6 = vector.load %arg1[%5, %c0_7, %c0_8] : memref<4x16x32xf32, #tpu.memory_space<vmem>>, vector<1x16x32xf32>
    %7 = vector.shape_cast %6 : vector<1x16x32xf32> to vector<16x32xf32>
    %cst_9 = arith.constant dense<0.000000e+00> : vector<16x512xf32>
    %8 = tpu.matmul %7, %2, %cst_9 {dimension_numbers = #tpu.dot_dimension_numbers<[1], [0], [0], [1], [0, 0, 1, 1], [], []>} : vector<16x32xf32>, vector<32x512xf32>, vector<16x512xf32> -> vector<16x512xf32>
    %9 = vector.broadcast %3 : vector<1x512xf32> to vector<16x512xf32>
    %10 = arith.addf %8, %9 : vector<16x512xf32>
    %cst_10 = arith.constant dense<0.000000e+00> : vector<16x512xf32>
    %11 = tpu.matmul %1, %4, %cst_10 {dimension_numbers = #tpu.dot_dimension_numbers<[1], [0], [0], [1], [0, 0, 1, 1], [], []>} : vector<16x128xf32>, vector<128x512xf32>, vector<16x512xf32> -> vector<16x512xf32>
    %12 = arith.addf %10, %11 : vector<16x512xf32>
    %13 = vector.extract_strided_slice %12 {offsets = [0, 0], sizes = [16, 384], strides = [1, 1]} : vector<16x512xf32> to vector<16x384xf32>
    %14 = arith.negf %13 : vector<16x384xf32>
    %15 = math.exp %14 : vector<16x384xf32>
    %cst_11 = arith.constant 1.000000e+00 : f32
    %16 = vector.broadcast %cst_11 : f32 to vector<16x384xf32>
    %17 = arith.addf %16, %15 : vector<16x384xf32>
    %18 = arith.divf %16, %17 : vector<16x384xf32>
    %19 = vector.extract_strided_slice %18 {offsets = [0, 0], sizes = [16, 128], strides = [1, 1]} : vector<16x384xf32> to vector<16x128xf32>
    %20 = vector.extract_strided_slice %18 {offsets = [0, 128], sizes = [16, 128], strides = [1, 1]} : vector<16x384xf32> to vector<16x128xf32>
    %21 = vector.extract_strided_slice %18 {offsets = [0, 256], sizes = [16, 128], strides = [1, 1]} : vector<16x384xf32> to vector<16x128xf32>
    %22 = vector.extract_strided_slice %12 {offsets = [0, 384], sizes = [16, 128], strides = [1, 1]} : vector<16x512xf32> to vector<16x128xf32>
    %23 = math.tanh %22 : vector<16x128xf32>
    %24 = arith.mulf %20, %1 : vector<16x128xf32>
    %25 = arith.mulf %19, %23 : vector<16x128xf32>
    %26 = arith.addf %24, %25 : vector<16x128xf32>
    %27 = math.tanh %26 : vector<16x128xf32>
    %28 = arith.mulf %21, %27 : vector<16x128xf32>
    %c1_i32 = arith.constant 1 : i32
    %29 = arith.addi %c0_i32, %c1_i32 : i32
    %30 = vector.broadcast %29 : i32 to vector<16x1xi32>
    %31 = arith.cmpi eq, %0, %30 : vector<16x1xi32>
    %32 = vector.shape_cast %31 : vector<16x1xi1> to vector<16x1xi1>
    %33 = vector.broadcast %32 : vector<16x1xi1> to vector<16x128xi1>
    %34 = arith.select %33, %28, %1 : vector<16x128xi1>, vector<16x128xf32>
    %c1_i32_12 = arith.constant 1 : i32
    %35 = arith.index_cast %c1_i32_12 : i32 to index
    %c0_13 = arith.constant 0 : index
    %c0_14 = arith.constant 0 : index
    %36 = vector.load %arg1[%35, %c0_13, %c0_14] : memref<4x16x32xf32, #tpu.memory_space<vmem>>, vector<1x16x32xf32>
    %37 = vector.shape_cast %36 : vector<1x16x32xf32> to vector<16x32xf32>
    %cst_15 = arith.constant dense<0.000000e+00> : vector<16x512xf32>
    %38 = tpu.matmul %37, %2, %cst_15 {dimension_numbers = #tpu.dot_dimension_numbers<[1], [0], [0], [1], [0, 0, 1, 1], [], []>} : vector<16x32xf32>, vector<32x512xf32>, vector<16x512xf32> -> vector<16x512xf32>
    %39 = vector.broadcast %3 : vector<1x512xf32> to vector<16x512xf32>
    %40 = arith.addf %38, %39 : vector<16x512xf32>
    %cst_16 = arith.constant dense<0.000000e+00> : vector<16x512xf32>
    %41 = tpu.matmul %28, %4, %cst_16 {dimension_numbers = #tpu.dot_dimension_numbers<[1], [0], [0], [1], [0, 0, 1, 1], [], []>} : vector<16x128xf32>, vector<128x512xf32>, vector<16x512xf32> -> vector<16x512xf32>
    %42 = arith.addf %40, %41 : vector<16x512xf32>
    %43 = vector.extract_strided_slice %42 {offsets = [0, 0], sizes = [16, 384], strides = [1, 1]} : vector<16x512xf32> to vector<16x384xf32>
    %44 = arith.negf %43 : vector<16x384xf32>
    %45 = math.exp %44 : vector<16x384xf32>
    %cst_17 = arith.constant 1.000000e+00 : f32
    %46 = vector.broadcast %cst_17 : f32 to vector<16x384xf32>
    %47 = arith.addf %46, %45 : vector<16x384xf32>
    %48 = arith.divf %46, %47 : vector<16x384xf32>
    %49 = vector.extract_strided_slice %48 {offsets = [0, 0], sizes = [16, 128], strides = [1, 1]} : vector<16x384xf32> to vector<16x128xf32>
    %50 = vector.extract_strided_slice %48 {offsets = [0, 128], sizes = [16, 128], strides = [1, 1]} : vector<16x384xf32> to vector<16x128xf32>
    %51 = vector.extract_strided_slice %48 {offsets = [0, 256], sizes = [16, 128], strides = [1, 1]} : vector<16x384xf32> to vector<16x128xf32>
    %52 = vector.extract_strided_slice %42 {offsets = [0, 384], sizes = [16, 128], strides = [1, 1]} : vector<16x512xf32> to vector<16x128xf32>
    %53 = math.tanh %52 : vector<16x128xf32>
    %54 = arith.mulf %50, %26 : vector<16x128xf32>
    %55 = arith.mulf %49, %53 : vector<16x128xf32>
    %56 = arith.addf %54, %55 : vector<16x128xf32>
    %57 = math.tanh %56 : vector<16x128xf32>
    %58 = arith.mulf %51, %57 : vector<16x128xf32>
    %c1_i32_18 = arith.constant 1 : i32
    %59 = arith.addi %c1_i32_12, %c1_i32_18 : i32
    %60 = vector.broadcast %59 : i32 to vector<16x1xi32>
    %61 = arith.cmpi eq, %0, %60 : vector<16x1xi32>
    %62 = vector.shape_cast %61 : vector<16x1xi1> to vector<16x1xi1>
    %63 = vector.broadcast %62 : vector<16x1xi1> to vector<16x128xi1>
    %64 = arith.select %63, %58, %34 : vector<16x128xi1>, vector<16x128xf32>
    %c2_i32 = arith.constant 2 : i32
    %65 = arith.index_cast %c2_i32 : i32 to index
    %c0_19 = arith.constant 0 : index
    %c0_20 = arith.constant 0 : index
    %66 = vector.load %arg1[%65, %c0_19, %c0_20] : memref<4x16x32xf32, #tpu.memory_space<vmem>>, vector<1x16x32xf32>
    %67 = vector.shape_cast %66 : vector<1x16x32xf32> to vector<16x32xf32>
    %cst_21 = arith.constant dense<0.000000e+00> : vector<16x512xf32>
    %68 = tpu.matmul %67, %2, %cst_21 {dimension_numbers = #tpu.dot_dimension_numbers<[1], [0], [0], [1], [0, 0, 1, 1], [], []>} : vector<16x32xf32>, vector<32x512xf32>, vector<16x512xf32> -> vector<16x512xf32>
    %69 = vector.broadcast %3 : vector<1x512xf32> to vector<16x512xf32>
    %70 = arith.addf %68, %69 : vector<16x512xf32>
    %cst_22 = arith.constant dense<0.000000e+00> : vector<16x512xf32>
    %71 = tpu.matmul %58, %4, %cst_22 {dimension_numbers = #tpu.dot_dimension_numbers<[1], [0], [0], [1], [0, 0, 1, 1], [], []>} : vector<16x128xf32>, vector<128x512xf32>, vector<16x512xf32> -> vector<16x512xf32>
    %72 = arith.addf %70, %71 : vector<16x512xf32>
    %73 = vector.extract_strided_slice %72 {offsets = [0, 0], sizes = [16, 384], strides = [1, 1]} : vector<16x512xf32> to vector<16x384xf32>
    %74 = arith.negf %73 : vector<16x384xf32>
    %75 = math.exp %74 : vector<16x384xf32>
    %cst_23 = arith.constant 1.000000e+00 : f32
    %76 = vector.broadcast %cst_23 : f32 to vector<16x384xf32>
    %77 = arith.addf %76, %75 : vector<16x384xf32>
    %78 = arith.divf %76, %77 : vector<16x384xf32>
    %79 = vector.extract_strided_slice %78 {offsets = [0, 0], sizes = [16, 128], strides = [1, 1]} : vector<16x384xf32> to vector<16x128xf32>
    %80 = vector.extract_strided_slice %78 {offsets = [0, 128], sizes = [16, 128], strides = [1, 1]} : vector<16x384xf32> to vector<16x128xf32>
    %81 = vector.extract_strided_slice %78 {offsets = [0, 256], sizes = [16, 128], strides = [1, 1]} : vector<16x384xf32> to vector<16x128xf32>
    %82 = vector.extract_strided_slice %72 {offsets = [0, 384], sizes = [16, 128], strides = [1, 1]} : vector<16x512xf32> to vector<16x128xf32>
    %83 = math.tanh %82 : vector<16x128xf32>
    %84 = arith.mulf %80, %56 : vector<16x128xf32>
    %85 = arith.mulf %79, %83 : vector<16x128xf32>
    %86 = arith.addf %84, %85 : vector<16x128xf32>
    %87 = math.tanh %86 : vector<16x128xf32>
    %88 = arith.mulf %81, %87 : vector<16x128xf32>
    %c1_i32_24 = arith.constant 1 : i32
    %89 = arith.addi %c2_i32, %c1_i32_24 : i32
    %90 = vector.broadcast %89 : i32 to vector<16x1xi32>
    %91 = arith.cmpi eq, %0, %90 : vector<16x1xi32>
    %92 = vector.shape_cast %91 : vector<16x1xi1> to vector<16x1xi1>
    %93 = vector.broadcast %92 : vector<16x1xi1> to vector<16x128xi1>
    %94 = arith.select %93, %88, %64 : vector<16x128xi1>, vector<16x128xf32>
    %c3_i32 = arith.constant 3 : i32
    %95 = arith.index_cast %c3_i32 : i32 to index
    %c0_25 = arith.constant 0 : index
    %c0_26 = arith.constant 0 : index
    %96 = vector.load %arg1[%95, %c0_25, %c0_26] : memref<4x16x32xf32, #tpu.memory_space<vmem>>, vector<1x16x32xf32>
    %97 = vector.shape_cast %96 : vector<1x16x32xf32> to vector<16x32xf32>
    %cst_27 = arith.constant dense<0.000000e+00> : vector<16x512xf32>
    %98 = tpu.matmul %97, %2, %cst_27 {dimension_numbers = #tpu.dot_dimension_numbers<[1], [0], [0], [1], [0, 0, 1, 1], [], []>} : vector<16x32xf32>, vector<32x512xf32>, vector<16x512xf32> -> vector<16x512xf32>
    %99 = vector.broadcast %3 : vector<1x512xf32> to vector<16x512xf32>
    %100 = arith.addf %98, %99 : vector<16x512xf32>
    %cst_28 = arith.constant dense<0.000000e+00> : vector<16x512xf32>
    %101 = tpu.matmul %88, %4, %cst_28 {dimension_numbers = #tpu.dot_dimension_numbers<[1], [0], [0], [1], [0, 0, 1, 1], [], []>} : vector<16x128xf32>, vector<128x512xf32>, vector<16x512xf32> -> vector<16x512xf32>
    %102 = arith.addf %100, %101 : vector<16x512xf32>
    %103 = vector.extract_strided_slice %102 {offsets = [0, 0], sizes = [16, 384], strides = [1, 1]} : vector<16x512xf32> to vector<16x384xf32>
    %104 = arith.negf %103 : vector<16x384xf32>
    %105 = math.exp %104 : vector<16x384xf32>
    %cst_29 = arith.constant 1.000000e+00 : f32
    %106 = vector.broadcast %cst_29 : f32 to vector<16x384xf32>
    %107 = arith.addf %106, %105 : vector<16x384xf32>
    %108 = arith.divf %106, %107 : vector<16x384xf32>
    %109 = vector.extract_strided_slice %108 {offsets = [0, 0], sizes = [16, 128], strides = [1, 1]} : vector<16x384xf32> to vector<16x128xf32>
    %110 = vector.extract_strided_slice %108 {offsets = [0, 128], sizes = [16, 128], strides = [1, 1]} : vector<16x384xf32> to vector<16x128xf32>
    %111 = vector.extract_strided_slice %108 {offsets = [0, 256], sizes = [16, 128], strides = [1, 1]} : vector<16x384xf32> to vector<16x128xf32>
    %112 = vector.extract_strided_slice %102 {offsets = [0, 384], sizes = [16, 128], strides = [1, 1]} : vector<16x512xf32> to vector<16x128xf32>
    %113 = math.tanh %112 : vector<16x128xf32>
    %114 = arith.mulf %110, %86 : vector<16x128xf32>
    %115 = arith.mulf %109, %113 : vector<16x128xf32>
    %116 = arith.addf %114, %115 : vector<16x128xf32>
    %117 = math.tanh %116 : vector<16x128xf32>
    %118 = arith.mulf %111, %117 : vector<16x128xf32>
    %c1_i32_30 = arith.constant 1 : i32
    %119 = arith.addi %c3_i32, %c1_i32_30 : i32
    %120 = vector.broadcast %119 : i32 to vector<16x1xi32>
    %121 = arith.cmpi eq, %0, %120 : vector<16x1xi32>
    %122 = vector.shape_cast %121 : vector<16x1xi1> to vector<16x1xi1>
    %123 = vector.broadcast %122 : vector<16x1xi1> to vector<16x128xi1>
    %124 = arith.select %123, %118, %94 : vector<16x128xi1>, vector<16x128xf32>
    %c4_i32 = arith.constant 4 : i32
    %c0_31 = arith.constant 0 : index
    %c0_32 = arith.constant 0 : index
    %125 = vector.load %arg2[%c0_31, %c0_32] : memref<16x32xf32, #tpu.memory_space<vmem>>, vector<16x32xf32>
    %c0_33 = arith.constant 0 : index
    %c0_34 = arith.constant 0 : index
    %126 = vector.load %arg6[%c0_33, %c0_34] : memref<32x512xf32, #tpu.memory_space<vmem>>, vector<32x512xf32>
    %cst_35 = arith.constant dense<0.000000e+00> : vector<16x512xf32>
    %127 = tpu.matmul %125, %126, %cst_35 {dimension_numbers = #tpu.dot_dimension_numbers<[1], [0], [0], [1], [0, 0, 1, 1], [], []>} : vector<16x32xf32>, vector<32x512xf32>, vector<16x512xf32> -> vector<16x512xf32>
    %c0_36 = arith.constant 0 : index
    %c0_37 = arith.constant 0 : index
    %128 = vector.load %arg7[%c0_36, %c0_37] : memref<1x512xf32, #tpu.memory_space<vmem>>, vector<1x512xf32>
    %129 = vector.broadcast %128 : vector<1x512xf32> to vector<16x512xf32>
    %130 = arith.addf %127, %129 : vector<16x512xf32>
    %131 = vector.extract_strided_slice %130 {offsets = [0, 0], sizes = [16, 384], strides = [1, 1]} : vector<16x512xf32> to vector<16x384xf32>
    %132 = arith.negf %131 : vector<16x384xf32>
    %133 = math.exp %132 : vector<16x384xf32>
    %cst_38 = arith.constant 1.000000e+00 : f32
    %134 = vector.broadcast %cst_38 : f32 to vector<16x384xf32>
    %135 = arith.addf %134, %133 : vector<16x384xf32>
    %136 = arith.divf %134, %135 : vector<16x384xf32>
    %137 = vector.extract_strided_slice %136 {offsets = [0, 0], sizes = [16, 128], strides = [1, 1]} : vector<16x384xf32> to vector<16x128xf32>
    %138 = vector.extract_strided_slice %136 {offsets = [0, 128], sizes = [16, 128], strides = [1, 1]} : vector<16x384xf32> to vector<16x128xf32>
    %139 = vector.extract_strided_slice %136 {offsets = [0, 256], sizes = [16, 128], strides = [1, 1]} : vector<16x384xf32> to vector<16x128xf32>
    %140 = vector.extract_strided_slice %130 {offsets = [0, 384], sizes = [16, 128], strides = [1, 1]} : vector<16x512xf32> to vector<16x128xf32>
    %141 = math.tanh %140 : vector<16x128xf32>
    %142 = arith.mulf %138, %1 : vector<16x128xf32>
    %143 = arith.mulf %137, %141 : vector<16x128xf32>
    %144 = arith.addf %142, %143 : vector<16x128xf32>
    %145 = math.tanh %144 : vector<16x128xf32>
    %146 = arith.mulf %139, %145 : vector<16x128xf32>
    %c0_39 = arith.constant 0 : index
    %c0_40 = arith.constant 0 : index
    %147 = vector.load %arg9[%c0_39, %c0_40] : memref<16x256xf32, #tpu.memory_space<vmem>>, vector<16x128xf32>
    tpu.vector_store %arg9[%c0_39, %c0_40], %124 {strides = array<i32>} : memref<16x256xf32, #tpu.memory_space<vmem>>, vector<16x128xf32>,
    %c0_41 = arith.constant 0 : index
    %c128 = arith.constant 128 : index
    %148 = vector.load %arg9[%c0_41, %c128] : memref<16x256xf32, #tpu.memory_space<vmem>>, vector<16x128xf32>
    tpu.vector_store %arg9[%c0_41, %c128], %146 {strides = array<i32>} : memref<16x256xf32, #tpu.memory_space<vmem>>, vector<16x128xf32>,
    return
  }
  func.func @transform_0(%arg0: i32) -> (i32, i32, i32) {
    %c0_i32 = arith.constant 0 : i32
    %c0_i32_0 = arith.constant 0 : i32
    %c0_i32_1 = arith.constant 0 : i32
    return %c0_i32, %arg0, %c0_i32_0 : i32, i32, i32
  }
  func.func @transform_1(%arg0: i32) -> (i32, i32) {
    %c0_i32 = arith.constant 0 : i32
    %c0_i32_0 = arith.constant 0 : i32
    return %arg0, %c0_i32 : i32, i32
  }
  func.func @transform_2(%arg0: i32) -> (i32, i32) {
    %c0_i32 = arith.constant 0 : i32
    %c0_i32_0 = arith.constant 0 : i32
    return %arg0, %c0_i32 : i32, i32
  }
  func.func @transform_3(%arg0: i32) -> (i32, i32) {
    %c0_i32 = arith.constant 0 : i32
    %c0_i32_0 = arith.constant 0 : i32
    %c0_i32_1 = arith.constant 0 : i32
    return %c0_i32, %c0_i32_0 : i32, i32
  }
  func.func @transform_4(%arg0: i32) -> (i32, i32) {
    %c0_i32 = arith.constant 0 : i32
    %c0_i32_0 = arith.constant 0 : i32
    %c0_i32_1 = arith.constant 0 : i32
    return %c0_i32, %c0_i32_0 : i32, i32
  }
  func.func @transform_5(%arg0: i32) -> (i32, i32) {
    %c0_i32 = arith.constant 0 : i32
    %c0_i32_0 = arith.constant 0 : i32
    %c0_i32_1 = arith.constant 0 : i32
    return %c0_i32, %c0_i32_0 : i32, i32
  }
  func.func @transform_6(%arg0: i32) -> (i32, i32) {
    %c0_i32 = arith.constant 0 : i32
    %c0_i32_0 = arith.constant 0 : i32
    %c0_i32_1 = arith.constant 0 : i32
    return %c0_i32, %c0_i32_0 : i32, i32
  }
  func.func @transform_7(%arg0: i32) -> (i32, i32) {
    %c0_i32 = arith.constant 0 : i32
    %c0_i32_0 = arith.constant 0 : i32
    %c0_i32_1 = arith.constant 0 : i32
    return %c0_i32, %c0_i32_0 : i32, i32
  }
  func.func @transform_8(%arg0: i32) -> (i32, i32) {
    %c0_i32 = arith.constant 0 : i32
    %c0_i32_0 = arith.constant 0 : i32
    return %arg0, %c0_i32 : i32, i32
  }
}

module attributes {stable_mosaic.version = 11 : i64} {
  func.func @_graph_kernel(%arg0: memref<16x32xf32, #tpu.memory_space<vmem>>, %arg1: memref<6x16x16xbf16, #tpu.memory_space<vmem>>, %arg2: memref<32x128xf32, #tpu.memory_space<vmem>>, %arg3: memref<1x128xf32, #tpu.memory_space<vmem>>, %arg4: memref<3x128x768xf32, #tpu.memory_space<vmem>>, %arg5: memref<3x1x128xf32, #tpu.memory_space<vmem>>, %arg6: memref<128x128xf32, #tpu.memory_space<vmem>>, %arg7: memref<1x128xf32, #tpu.memory_space<vmem>>, %arg8: memref<32x128xf32, #tpu.memory_space<vmem>>, %arg9: memref<1x128xf32, #tpu.memory_space<vmem>>, %arg10: memref<16x128xf32, #tpu.memory_space<vmem>>) attributes {dimension_semantics = [], scalar_prefetch = 0 : i64, scratch_operands = 0 : i64, tpu.core_type = #tpu.core_type<tc>} {
    %c0 = arith.constant 0 : index
    %c0_0 = arith.constant 0 : index
    %0 = vector.load %arg0[%c0, %c0_0] : memref<16x32xf32, #tpu.memory_space<vmem>>, vector<16x32xf32>
    %c0_1 = arith.constant 0 : index
    %c0_2 = arith.constant 0 : index
    %1 = vector.load %arg2[%c0_1, %c0_2] : memref<32x128xf32, #tpu.memory_space<vmem>>, vector<32x128xf32>
    %cst = arith.constant dense<0.000000e+00> : vector<16x128xf32>
    %2 = tpu.matmul %0, %1, %cst {dimension_numbers = #tpu.dot_dimension_numbers<[1], [0], [0], [1], [0, 0, 1, 1], [], []>} : vector<16x32xf32>, vector<32x128xf32>, vector<16x128xf32> -> vector<16x128xf32>
    %c0_3 = arith.constant 0 : index
    %c0_4 = arith.constant 0 : index
    %3 = vector.load %arg3[%c0_3, %c0_4] : memref<1x128xf32, #tpu.memory_space<vmem>>, vector<1x128xf32>
    %4 = vector.broadcast %3 : vector<1x128xf32> to vector<16x128xf32>
    %5 = arith.addf %2, %4 : vector<16x128xf32>
    %cst_5 = arith.constant 0.000000e+00 : f32
    %6 = vector.broadcast %cst_5 : f32 to vector<16x128xf32>
    %7 = arith.maximumf %5, %6 : vector<16x128xf32>
    %c0_6 = arith.constant 0 : index
    %c0_7 = arith.constant 0 : index
    %c0_8 = arith.constant 0 : index
    %8 = vector.load %arg4[%c0_6, %c0_7, %c0_8] : memref<3x128x768xf32, #tpu.memory_space<vmem>>, vector<1x128x768xf32>
    %9 = vector.shape_cast %8 : vector<1x128x768xf32> to vector<128x768xf32>
    %cst_9 = arith.constant dense<0.000000e+00> : vector<16x768xf32>
    %10 = tpu.matmul %7, %9, %cst_9 {dimension_numbers = #tpu.dot_dimension_numbers<[1], [0], [0], [1], [0, 0, 1, 1], [], []>} : vector<16x128xf32>, vector<128x768xf32>, vector<16x768xf32> -> vector<16x768xf32>
    %cst_10 = arith.constant 0.000000e+00 : f32
    %11 = vector.broadcast %cst_10 : f32 to vector<16x128xf32>
    %c0_11 = arith.constant 0 : index
    %c0_12 = arith.constant 0 : index
    %c0_13 = arith.constant 0 : index
    %12 = vector.load %arg1[%c0_11, %c0_12, %c0_13] : memref<6x16x16xbf16, #tpu.memory_space<vmem>>, vector<1x16x16xbf16>
    %13 = vector.shape_cast %12 : vector<1x16x16xbf16> to vector<16x16xbf16>
    %14 = arith.extf %13 : vector<16x16xbf16> to vector<16x16xf32>
    %15 = vector.extract_strided_slice %10 {offsets = [0, 0], sizes = [16, 128], strides = [1, 1]} : vector<16x768xf32> to vector<16x128xf32>
    %cst_14 = arith.constant dense<0.000000e+00> : vector<16x128xf32>
    %16 = tpu.matmul %14, %15, %cst_14 {dimension_numbers = #tpu.dot_dimension_numbers<[1], [0], [0], [1], [0, 0, 1, 1], [], []>} : vector<16x16xf32>, vector<16x128xf32>, vector<16x128xf32> -> vector<16x128xf32>
    %17 = arith.addf %11, %16 : vector<16x128xf32>
    %c1 = arith.constant 1 : index
    %c0_15 = arith.constant 0 : index
    %c0_16 = arith.constant 0 : index
    %18 = vector.load %arg1[%c1, %c0_15, %c0_16] : memref<6x16x16xbf16, #tpu.memory_space<vmem>>, vector<1x16x16xbf16>
    %19 = vector.shape_cast %18 : vector<1x16x16xbf16> to vector<16x16xbf16>
    %20 = arith.extf %19 : vector<16x16xbf16> to vector<16x16xf32>
    %21 = vector.extract_strided_slice %10 {offsets = [0, 128], sizes = [16, 128], strides = [1, 1]} : vector<16x768xf32> to vector<16x128xf32>
    %cst_17 = arith.constant dense<0.000000e+00> : vector<16x128xf32>
    %22 = tpu.matmul %20, %21, %cst_17 {dimension_numbers = #tpu.dot_dimension_numbers<[1], [0], [0], [1], [0, 0, 1, 1], [], []>} : vector<16x16xf32>, vector<16x128xf32>, vector<16x128xf32> -> vector<16x128xf32>
    %23 = arith.addf %17, %22 : vector<16x128xf32>
    %c2 = arith.constant 2 : index
    %c0_18 = arith.constant 0 : index
    %c0_19 = arith.constant 0 : index
    %24 = vector.load %arg1[%c2, %c0_18, %c0_19] : memref<6x16x16xbf16, #tpu.memory_space<vmem>>, vector<1x16x16xbf16>
    %25 = vector.shape_cast %24 : vector<1x16x16xbf16> to vector<16x16xbf16>
    %26 = arith.extf %25 : vector<16x16xbf16> to vector<16x16xf32>
    %27 = vector.extract_strided_slice %10 {offsets = [0, 256], sizes = [16, 128], strides = [1, 1]} : vector<16x768xf32> to vector<16x128xf32>
    %cst_20 = arith.constant dense<0.000000e+00> : vector<16x128xf32>
    %28 = tpu.matmul %26, %27, %cst_20 {dimension_numbers = #tpu.dot_dimension_numbers<[1], [0], [0], [1], [0, 0, 1, 1], [], []>} : vector<16x16xf32>, vector<16x128xf32>, vector<16x128xf32> -> vector<16x128xf32>
    %29 = arith.addf %23, %28 : vector<16x128xf32>
    %c3 = arith.constant 3 : index
    %c0_21 = arith.constant 0 : index
    %c0_22 = arith.constant 0 : index
    %30 = vector.load %arg1[%c3, %c0_21, %c0_22] : memref<6x16x16xbf16, #tpu.memory_space<vmem>>, vector<1x16x16xbf16>
    %31 = vector.shape_cast %30 : vector<1x16x16xbf16> to vector<16x16xbf16>
    %32 = arith.extf %31 : vector<16x16xbf16> to vector<16x16xf32>
    %33 = vector.extract_strided_slice %10 {offsets = [0, 384], sizes = [16, 128], strides = [1, 1]} : vector<16x768xf32> to vector<16x128xf32>
    %cst_23 = arith.constant dense<0.000000e+00> : vector<16x128xf32>
    %34 = tpu.matmul %32, %33, %cst_23 {dimension_numbers = #tpu.dot_dimension_numbers<[1], [0], [0], [1], [0, 0, 1, 1], [], []>} : vector<16x16xf32>, vector<16x128xf32>, vector<16x128xf32> -> vector<16x128xf32>
    %35 = arith.addf %29, %34 : vector<16x128xf32>
    %c4 = arith.constant 4 : index
    %c0_24 = arith.constant 0 : index
    %c0_25 = arith.constant 0 : index
    %36 = vector.load %arg1[%c4, %c0_24, %c0_25] : memref<6x16x16xbf16, #tpu.memory_space<vmem>>, vector<1x16x16xbf16>
    %37 = vector.shape_cast %36 : vector<1x16x16xbf16> to vector<16x16xbf16>
    %38 = arith.extf %37 : vector<16x16xbf16> to vector<16x16xf32>
    %39 = vector.extract_strided_slice %10 {offsets = [0, 512], sizes = [16, 128], strides = [1, 1]} : vector<16x768xf32> to vector<16x128xf32>
    %cst_26 = arith.constant dense<0.000000e+00> : vector<16x128xf32>
    %40 = tpu.matmul %38, %39, %cst_26 {dimension_numbers = #tpu.dot_dimension_numbers<[1], [0], [0], [1], [0, 0, 1, 1], [], []>} : vector<16x16xf32>, vector<16x128xf32>, vector<16x128xf32> -> vector<16x128xf32>
    %41 = arith.addf %35, %40 : vector<16x128xf32>
    %c5 = arith.constant 5 : index
    %c0_27 = arith.constant 0 : index
    %c0_28 = arith.constant 0 : index
    %42 = vector.load %arg1[%c5, %c0_27, %c0_28] : memref<6x16x16xbf16, #tpu.memory_space<vmem>>, vector<1x16x16xbf16>
    %43 = vector.shape_cast %42 : vector<1x16x16xbf16> to vector<16x16xbf16>
    %44 = arith.extf %43 : vector<16x16xbf16> to vector<16x16xf32>
    %45 = vector.extract_strided_slice %10 {offsets = [0, 640], sizes = [16, 128], strides = [1, 1]} : vector<16x768xf32> to vector<16x128xf32>
    %cst_29 = arith.constant dense<0.000000e+00> : vector<16x128xf32>
    %46 = tpu.matmul %44, %45, %cst_29 {dimension_numbers = #tpu.dot_dimension_numbers<[1], [0], [0], [1], [0, 0, 1, 1], [], []>} : vector<16x16xf32>, vector<16x128xf32>, vector<16x128xf32> -> vector<16x128xf32>
    %47 = arith.addf %41, %46 : vector<16x128xf32>
    %c0_30 = arith.constant 0 : index
    %c0_31 = arith.constant 0 : index
    %c0_32 = arith.constant 0 : index
    %48 = vector.load %arg5[%c0_30, %c0_31, %c0_32] : memref<3x1x128xf32, #tpu.memory_space<vmem>>, vector<1x1x128xf32>
    %49 = vector.shape_cast %48 : vector<1x1x128xf32> to vector<1x128xf32>
    %50 = vector.broadcast %49 : vector<1x128xf32> to vector<16x128xf32>
    %51 = arith.addf %47, %50 : vector<16x128xf32>
    %cst_33 = arith.constant 0.000000e+00 : f32
    %52 = vector.broadcast %cst_33 : f32 to vector<16x128xf32>
    %53 = arith.maximumf %51, %52 : vector<16x128xf32>
    %c1_34 = arith.constant 1 : index
    %c0_35 = arith.constant 0 : index
    %c0_36 = arith.constant 0 : index
    %54 = vector.load %arg4[%c1_34, %c0_35, %c0_36] : memref<3x128x768xf32, #tpu.memory_space<vmem>>, vector<1x128x768xf32>
    %55 = vector.shape_cast %54 : vector<1x128x768xf32> to vector<128x768xf32>
    %cst_37 = arith.constant dense<0.000000e+00> : vector<16x768xf32>
    %56 = tpu.matmul %53, %55, %cst_37 {dimension_numbers = #tpu.dot_dimension_numbers<[1], [0], [0], [1], [0, 0, 1, 1], [], []>} : vector<16x128xf32>, vector<128x768xf32>, vector<16x768xf32> -> vector<16x768xf32>
    %cst_38 = arith.constant 0.000000e+00 : f32
    %57 = vector.broadcast %cst_38 : f32 to vector<16x128xf32>
    %c0_39 = arith.constant 0 : index
    %c0_40 = arith.constant 0 : index
    %c0_41 = arith.constant 0 : index
    %58 = vector.load %arg1[%c0_39, %c0_40, %c0_41] : memref<6x16x16xbf16, #tpu.memory_space<vmem>>, vector<1x16x16xbf16>
    %59 = vector.shape_cast %58 : vector<1x16x16xbf16> to vector<16x16xbf16>
    %60 = arith.extf %59 : vector<16x16xbf16> to vector<16x16xf32>
    %61 = vector.extract_strided_slice %56 {offsets = [0, 0], sizes = [16, 128], strides = [1, 1]} : vector<16x768xf32> to vector<16x128xf32>
    %cst_42 = arith.constant dense<0.000000e+00> : vector<16x128xf32>
    %62 = tpu.matmul %60, %61, %cst_42 {dimension_numbers = #tpu.dot_dimension_numbers<[1], [0], [0], [1], [0, 0, 1, 1], [], []>} : vector<16x16xf32>, vector<16x128xf32>, vector<16x128xf32> -> vector<16x128xf32>
    %63 = arith.addf %57, %62 : vector<16x128xf32>
    %c1_43 = arith.constant 1 : index
    %c0_44 = arith.constant 0 : index
    %c0_45 = arith.constant 0 : index
    %64 = vector.load %arg1[%c1_43, %c0_44, %c0_45] : memref<6x16x16xbf16, #tpu.memory_space<vmem>>, vector<1x16x16xbf16>
    %65 = vector.shape_cast %64 : vector<1x16x16xbf16> to vector<16x16xbf16>
    %66 = arith.extf %65 : vector<16x16xbf16> to vector<16x16xf32>
    %67 = vector.extract_strided_slice %56 {offsets = [0, 128], sizes = [16, 128], strides = [1, 1]} : vector<16x768xf32> to vector<16x128xf32>
    %cst_46 = arith.constant dense<0.000000e+00> : vector<16x128xf32>
    %68 = tpu.matmul %66, %67, %cst_46 {dimension_numbers = #tpu.dot_dimension_numbers<[1], [0], [0], [1], [0, 0, 1, 1], [], []>} : vector<16x16xf32>, vector<16x128xf32>, vector<16x128xf32> -> vector<16x128xf32>
    %69 = arith.addf %63, %68 : vector<16x128xf32>
    %c2_47 = arith.constant 2 : index
    %c0_48 = arith.constant 0 : index
    %c0_49 = arith.constant 0 : index
    %70 = vector.load %arg1[%c2_47, %c0_48, %c0_49] : memref<6x16x16xbf16, #tpu.memory_space<vmem>>, vector<1x16x16xbf16>
    %71 = vector.shape_cast %70 : vector<1x16x16xbf16> to vector<16x16xbf16>
    %72 = arith.extf %71 : vector<16x16xbf16> to vector<16x16xf32>
    %73 = vector.extract_strided_slice %56 {offsets = [0, 256], sizes = [16, 128], strides = [1, 1]} : vector<16x768xf32> to vector<16x128xf32>
    %cst_50 = arith.constant dense<0.000000e+00> : vector<16x128xf32>
    %74 = tpu.matmul %72, %73, %cst_50 {dimension_numbers = #tpu.dot_dimension_numbers<[1], [0], [0], [1], [0, 0, 1, 1], [], []>} : vector<16x16xf32>, vector<16x128xf32>, vector<16x128xf32> -> vector<16x128xf32>
    %75 = arith.addf %69, %74 : vector<16x128xf32>
    %c3_51 = arith.constant 3 : index
    %c0_52 = arith.constant 0 : index
    %c0_53 = arith.constant 0 : index
    %76 = vector.load %arg1[%c3_51, %c0_52, %c0_53] : memref<6x16x16xbf16, #tpu.memory_space<vmem>>, vector<1x16x16xbf16>
    %77 = vector.shape_cast %76 : vector<1x16x16xbf16> to vector<16x16xbf16>
    %78 = arith.extf %77 : vector<16x16xbf16> to vector<16x16xf32>
    %79 = vector.extract_strided_slice %56 {offsets = [0, 384], sizes = [16, 128], strides = [1, 1]} : vector<16x768xf32> to vector<16x128xf32>
    %cst_54 = arith.constant dense<0.000000e+00> : vector<16x128xf32>
    %80 = tpu.matmul %78, %79, %cst_54 {dimension_numbers = #tpu.dot_dimension_numbers<[1], [0], [0], [1], [0, 0, 1, 1], [], []>} : vector<16x16xf32>, vector<16x128xf32>, vector<16x128xf32> -> vector<16x128xf32>
    %81 = arith.addf %75, %80 : vector<16x128xf32>
    %c4_55 = arith.constant 4 : index
    %c0_56 = arith.constant 0 : index
    %c0_57 = arith.constant 0 : index
    %82 = vector.load %arg1[%c4_55, %c0_56, %c0_57] : memref<6x16x16xbf16, #tpu.memory_space<vmem>>, vector<1x16x16xbf16>
    %83 = vector.shape_cast %82 : vector<1x16x16xbf16> to vector<16x16xbf16>
    %84 = arith.extf %83 : vector<16x16xbf16> to vector<16x16xf32>
    %85 = vector.extract_strided_slice %56 {offsets = [0, 512], sizes = [16, 128], strides = [1, 1]} : vector<16x768xf32> to vector<16x128xf32>
    %cst_58 = arith.constant dense<0.000000e+00> : vector<16x128xf32>
    %86 = tpu.matmul %84, %85, %cst_58 {dimension_numbers = #tpu.dot_dimension_numbers<[1], [0], [0], [1], [0, 0, 1, 1], [], []>} : vector<16x16xf32>, vector<16x128xf32>, vector<16x128xf32> -> vector<16x128xf32>
    %87 = arith.addf %81, %86 : vector<16x128xf32>
    %c5_59 = arith.constant 5 : index
    %c0_60 = arith.constant 0 : index
    %c0_61 = arith.constant 0 : index
    %88 = vector.load %arg1[%c5_59, %c0_60, %c0_61] : memref<6x16x16xbf16, #tpu.memory_space<vmem>>, vector<1x16x16xbf16>
    %89 = vector.shape_cast %88 : vector<1x16x16xbf16> to vector<16x16xbf16>
    %90 = arith.extf %89 : vector<16x16xbf16> to vector<16x16xf32>
    %91 = vector.extract_strided_slice %56 {offsets = [0, 640], sizes = [16, 128], strides = [1, 1]} : vector<16x768xf32> to vector<16x128xf32>
    %cst_62 = arith.constant dense<0.000000e+00> : vector<16x128xf32>
    %92 = tpu.matmul %90, %91, %cst_62 {dimension_numbers = #tpu.dot_dimension_numbers<[1], [0], [0], [1], [0, 0, 1, 1], [], []>} : vector<16x16xf32>, vector<16x128xf32>, vector<16x128xf32> -> vector<16x128xf32>
    %93 = arith.addf %87, %92 : vector<16x128xf32>
    %c1_63 = arith.constant 1 : index
    %c0_64 = arith.constant 0 : index
    %c0_65 = arith.constant 0 : index
    %94 = vector.load %arg5[%c1_63, %c0_64, %c0_65] : memref<3x1x128xf32, #tpu.memory_space<vmem>>, vector<1x1x128xf32>
    %95 = vector.shape_cast %94 : vector<1x1x128xf32> to vector<1x128xf32>
    %96 = vector.broadcast %95 : vector<1x128xf32> to vector<16x128xf32>
    %97 = arith.addf %93, %96 : vector<16x128xf32>
    %cst_66 = arith.constant 0.000000e+00 : f32
    %98 = vector.broadcast %cst_66 : f32 to vector<16x128xf32>
    %99 = arith.maximumf %97, %98 : vector<16x128xf32>
    %c2_67 = arith.constant 2 : index
    %c0_68 = arith.constant 0 : index
    %c0_69 = arith.constant 0 : index
    %100 = vector.load %arg4[%c2_67, %c0_68, %c0_69] : memref<3x128x768xf32, #tpu.memory_space<vmem>>, vector<1x128x768xf32>
    %101 = vector.shape_cast %100 : vector<1x128x768xf32> to vector<128x768xf32>
    %cst_70 = arith.constant dense<0.000000e+00> : vector<16x768xf32>
    %102 = tpu.matmul %99, %101, %cst_70 {dimension_numbers = #tpu.dot_dimension_numbers<[1], [0], [0], [1], [0, 0, 1, 1], [], []>} : vector<16x128xf32>, vector<128x768xf32>, vector<16x768xf32> -> vector<16x768xf32>
    %cst_71 = arith.constant 0.000000e+00 : f32
    %103 = vector.broadcast %cst_71 : f32 to vector<16x128xf32>
    %c0_72 = arith.constant 0 : index
    %c0_73 = arith.constant 0 : index
    %c0_74 = arith.constant 0 : index
    %104 = vector.load %arg1[%c0_72, %c0_73, %c0_74] : memref<6x16x16xbf16, #tpu.memory_space<vmem>>, vector<1x16x16xbf16>
    %105 = vector.shape_cast %104 : vector<1x16x16xbf16> to vector<16x16xbf16>
    %106 = arith.extf %105 : vector<16x16xbf16> to vector<16x16xf32>
    %107 = vector.extract_strided_slice %102 {offsets = [0, 0], sizes = [16, 128], strides = [1, 1]} : vector<16x768xf32> to vector<16x128xf32>
    %cst_75 = arith.constant dense<0.000000e+00> : vector<16x128xf32>
    %108 = tpu.matmul %106, %107, %cst_75 {dimension_numbers = #tpu.dot_dimension_numbers<[1], [0], [0], [1], [0, 0, 1, 1], [], []>} : vector<16x16xf32>, vector<16x128xf32>, vector<16x128xf32> -> vector<16x128xf32>
    %109 = arith.addf %103, %108 : vector<16x128xf32>
    %c1_76 = arith.constant 1 : index
    %c0_77 = arith.constant 0 : index
    %c0_78 = arith.constant 0 : index
    %110 = vector.load %arg1[%c1_76, %c0_77, %c0_78] : memref<6x16x16xbf16, #tpu.memory_space<vmem>>, vector<1x16x16xbf16>
    %111 = vector.shape_cast %110 : vector<1x16x16xbf16> to vector<16x16xbf16>
    %112 = arith.extf %111 : vector<16x16xbf16> to vector<16x16xf32>
    %113 = vector.extract_strided_slice %102 {offsets = [0, 128], sizes = [16, 128], strides = [1, 1]} : vector<16x768xf32> to vector<16x128xf32>
    %cst_79 = arith.constant dense<0.000000e+00> : vector<16x128xf32>
    %114 = tpu.matmul %112, %113, %cst_79 {dimension_numbers = #tpu.dot_dimension_numbers<[1], [0], [0], [1], [0, 0, 1, 1], [], []>} : vector<16x16xf32>, vector<16x128xf32>, vector<16x128xf32> -> vector<16x128xf32>
    %115 = arith.addf %109, %114 : vector<16x128xf32>
    %c2_80 = arith.constant 2 : index
    %c0_81 = arith.constant 0 : index
    %c0_82 = arith.constant 0 : index
    %116 = vector.load %arg1[%c2_80, %c0_81, %c0_82] : memref<6x16x16xbf16, #tpu.memory_space<vmem>>, vector<1x16x16xbf16>
    %117 = vector.shape_cast %116 : vector<1x16x16xbf16> to vector<16x16xbf16>
    %118 = arith.extf %117 : vector<16x16xbf16> to vector<16x16xf32>
    %119 = vector.extract_strided_slice %102 {offsets = [0, 256], sizes = [16, 128], strides = [1, 1]} : vector<16x768xf32> to vector<16x128xf32>
    %cst_83 = arith.constant dense<0.000000e+00> : vector<16x128xf32>
    %120 = tpu.matmul %118, %119, %cst_83 {dimension_numbers = #tpu.dot_dimension_numbers<[1], [0], [0], [1], [0, 0, 1, 1], [], []>} : vector<16x16xf32>, vector<16x128xf32>, vector<16x128xf32> -> vector<16x128xf32>
    %121 = arith.addf %115, %120 : vector<16x128xf32>
    %c3_84 = arith.constant 3 : index
    %c0_85 = arith.constant 0 : index
    %c0_86 = arith.constant 0 : index
    %122 = vector.load %arg1[%c3_84, %c0_85, %c0_86] : memref<6x16x16xbf16, #tpu.memory_space<vmem>>, vector<1x16x16xbf16>
    %123 = vector.shape_cast %122 : vector<1x16x16xbf16> to vector<16x16xbf16>
    %124 = arith.extf %123 : vector<16x16xbf16> to vector<16x16xf32>
    %125 = vector.extract_strided_slice %102 {offsets = [0, 384], sizes = [16, 128], strides = [1, 1]} : vector<16x768xf32> to vector<16x128xf32>
    %cst_87 = arith.constant dense<0.000000e+00> : vector<16x128xf32>
    %126 = tpu.matmul %124, %125, %cst_87 {dimension_numbers = #tpu.dot_dimension_numbers<[1], [0], [0], [1], [0, 0, 1, 1], [], []>} : vector<16x16xf32>, vector<16x128xf32>, vector<16x128xf32> -> vector<16x128xf32>
    %127 = arith.addf %121, %126 : vector<16x128xf32>
    %c4_88 = arith.constant 4 : index
    %c0_89 = arith.constant 0 : index
    %c0_90 = arith.constant 0 : index
    %128 = vector.load %arg1[%c4_88, %c0_89, %c0_90] : memref<6x16x16xbf16, #tpu.memory_space<vmem>>, vector<1x16x16xbf16>
    %129 = vector.shape_cast %128 : vector<1x16x16xbf16> to vector<16x16xbf16>
    %130 = arith.extf %129 : vector<16x16xbf16> to vector<16x16xf32>
    %131 = vector.extract_strided_slice %102 {offsets = [0, 512], sizes = [16, 128], strides = [1, 1]} : vector<16x768xf32> to vector<16x128xf32>
    %cst_91 = arith.constant dense<0.000000e+00> : vector<16x128xf32>
    %132 = tpu.matmul %130, %131, %cst_91 {dimension_numbers = #tpu.dot_dimension_numbers<[1], [0], [0], [1], [0, 0, 1, 1], [], []>} : vector<16x16xf32>, vector<16x128xf32>, vector<16x128xf32> -> vector<16x128xf32>
    %133 = arith.addf %127, %132 : vector<16x128xf32>
    %c5_92 = arith.constant 5 : index
    %c0_93 = arith.constant 0 : index
    %c0_94 = arith.constant 0 : index
    %134 = vector.load %arg1[%c5_92, %c0_93, %c0_94] : memref<6x16x16xbf16, #tpu.memory_space<vmem>>, vector<1x16x16xbf16>
    %135 = vector.shape_cast %134 : vector<1x16x16xbf16> to vector<16x16xbf16>
    %136 = arith.extf %135 : vector<16x16xbf16> to vector<16x16xf32>
    %137 = vector.extract_strided_slice %102 {offsets = [0, 640], sizes = [16, 128], strides = [1, 1]} : vector<16x768xf32> to vector<16x128xf32>
    %cst_95 = arith.constant dense<0.000000e+00> : vector<16x128xf32>
    %138 = tpu.matmul %136, %137, %cst_95 {dimension_numbers = #tpu.dot_dimension_numbers<[1], [0], [0], [1], [0, 0, 1, 1], [], []>} : vector<16x16xf32>, vector<16x128xf32>, vector<16x128xf32> -> vector<16x128xf32>
    %139 = arith.addf %133, %138 : vector<16x128xf32>
    %c2_96 = arith.constant 2 : index
    %c0_97 = arith.constant 0 : index
    %c0_98 = arith.constant 0 : index
    %140 = vector.load %arg5[%c2_96, %c0_97, %c0_98] : memref<3x1x128xf32, #tpu.memory_space<vmem>>, vector<1x1x128xf32>
    %141 = vector.shape_cast %140 : vector<1x1x128xf32> to vector<1x128xf32>
    %142 = vector.broadcast %141 : vector<1x128xf32> to vector<16x128xf32>
    %143 = arith.addf %139, %142 : vector<16x128xf32>
    %cst_99 = arith.constant 0.000000e+00 : f32
    %144 = vector.broadcast %cst_99 : f32 to vector<16x128xf32>
    %145 = arith.maximumf %143, %144 : vector<16x128xf32>
    %c0_100 = arith.constant 0 : index
    %c0_101 = arith.constant 0 : index
    %146 = vector.load %arg6[%c0_100, %c0_101] : memref<128x128xf32, #tpu.memory_space<vmem>>, vector<128x128xf32>
    %cst_102 = arith.constant dense<0.000000e+00> : vector<16x128xf32>
    %147 = tpu.matmul %145, %146, %cst_102 {dimension_numbers = #tpu.dot_dimension_numbers<[1], [0], [0], [1], [0, 0, 1, 1], [], []>} : vector<16x128xf32>, vector<128x128xf32>, vector<16x128xf32> -> vector<16x128xf32>
    %c0_103 = arith.constant 0 : index
    %c0_104 = arith.constant 0 : index
    %148 = vector.load %arg7[%c0_103, %c0_104] : memref<1x128xf32, #tpu.memory_space<vmem>>, vector<1x128xf32>
    %149 = vector.broadcast %148 : vector<1x128xf32> to vector<16x128xf32>
    %150 = arith.addf %147, %149 : vector<16x128xf32>
    %cst_105 = arith.constant 0.000000e+00 : f32
    %151 = vector.broadcast %cst_105 : f32 to vector<16x128xf32>
    %152 = arith.maximumf %150, %151 : vector<16x128xf32>
    %c0_106 = arith.constant 0 : index
    %c0_107 = arith.constant 0 : index
    %153 = vector.load %arg8[%c0_106, %c0_107] : memref<32x128xf32, #tpu.memory_space<vmem>>, vector<32x128xf32>
    %cst_108 = arith.constant dense<0.000000e+00> : vector<16x128xf32>
    %154 = tpu.matmul %0, %153, %cst_108 {dimension_numbers = #tpu.dot_dimension_numbers<[1], [0], [0], [1], [0, 0, 1, 1], [], []>} : vector<16x32xf32>, vector<32x128xf32>, vector<16x128xf32> -> vector<16x128xf32>
    %c0_109 = arith.constant 0 : index
    %c0_110 = arith.constant 0 : index
    %155 = vector.load %arg9[%c0_109, %c0_110] : memref<1x128xf32, #tpu.memory_space<vmem>>, vector<1x128xf32>
    %156 = vector.broadcast %155 : vector<1x128xf32> to vector<16x128xf32>
    %157 = arith.addf %154, %156 : vector<16x128xf32>
    %cst_111 = arith.constant 0.000000e+00 : f32
    %158 = vector.broadcast %cst_111 : f32 to vector<16x128xf32>
    %159 = arith.maximumf %157, %158 : vector<16x128xf32>
    %160 = arith.addf %152, %159 : vector<16x128xf32>
    %c0_112 = arith.constant 0 : index
    %c0_113 = arith.constant 0 : index
    %161 = vector.load %arg10[%c0_112, %c0_113] : memref<16x128xf32, #tpu.memory_space<vmem>>, vector<16x128xf32>
    tpu.vector_store %arg10[%c0_112, %c0_113], %160 {strides = array<i32>} : memref<16x128xf32, #tpu.memory_space<vmem>>, vector<16x128xf32>,
    return
  }
}

</mosaic_0001>

<bundles_post_ra>
// kernel: _forward_core.2
= control target key start
LH: loop header
LB: loop body
LE: loop exit
PB: predicated region body
PF: predicated region fallthrough
CT: control target
= control target key end

     0   :  { %13 = vsyncpa [#allocation3], 0  ;;  %s3350_s0 = inlined_call_operand.vmem [shape: f32[4,16,32], index: 0, kind: input, shape index: {}]   ;;  %s3351_s1 = inlined_call_operand.vmem [shape: f32[16,32], index: 1, kind: input, shape index: {}]   ;;  %s3352_s2 = inlined_call_operand.vmem [shape: s32[16,1], index: 2, kind: input, shape index: {}]   ;;  %s3353_s3 = inlined_call_operand.hbm [shape: f32[32,512], index: 3, kind: input, shape index: {}]   ;;  %s3354_s4 = inlined_call_operand.hbm [shape: f32[1,512], index: 4, kind: input, shape index: {}]   ;;  %s3355_s5 = inlined_call_operand.hbm [shape: f32[32,512], index: 5, kind: input, shape index: {}]   ;;  %s3356_s6 = inlined_call_operand.hbm [shape: f32[1,512], index: 6, kind: input, shape index: {}]   ;;  %s3357_s7 = inlined_call_operand.hbm [shape: f32[128,512], index: 7, kind: input, shape index: {}]   ;;  %s3358_s8 = inlined_call_operand.vmem [shape: f32[16,256], index: 8, kind: output, shape index: {}]  }
   0x1   :  { %14 = vsyncpa [#allocation5], 0 }
   0x2   :  { %15 = vsyncpa [#allocation8], 0  ;;  %s2747_s27 = smov [#allocation4]   ;;  %s2748_s29 = smov [#allocation7]  }
   0x3   :  { %s40_s28 = sshll.u32 %s2747_s27, 4  ;;  %s62_s30 = sshll.u32 %s2748_s29, 4  ;;  %s41_s28 = int_to_ptr.vmem [resolvable:$true] %s40_s28  ;;  %s63_s30 = int_to_ptr.vmem [resolvable:$true] %s62_s30 }
   0x4   :  { %s2631_s11 = scalar_lea.hbm %s3354_s4, 64 }
   0x5   :  { %p2632_p0 = scmp.ne.s32.totalorder %s3354_s4, %s2631_s11  ;;  %p2635_p1 = scmp.lt.u32.totalorder %s2631_s11, %s3354_s4 }
   0x7   :  { %p2637_p2 = pnand %p2635_p1, %p2632_p0 }
   0x9   :  { %2640 = shalt.err (!%p2637_p2)
}
   0xa   :  { %s2641_s16 = scalar_lea.vmem %s41_s28, 64  ;;  %p2646_p4 = scmp.lt.s32.totalorder %s41_s28, %s41_s28 }
   0xb   :  { %p2642_p3 = scmp.ne.s32.totalorder %s41_s28, %s2641_s16  ;;  %p2647_p5 = scmp.lt.s32.totalorder %s2641_s16, %s2641_s16 }
   0xd   :  { %p2648_p6 = por %p2647_p5, %p2646_p4 }
   0xf   :  { %p2649_p7 = pnand %p2648_p6, %p2642_p3 }
  0x11   :  { %2652 = shalt.err (!%p2649_p7)
}
  0x12   :  { %43 = dma.hbm_to_vmem [thread:$0]  %s3354_s4, 64, %s41_s28, [#allocation5]  }
  0x13   :  { %s2653_s21 = scalar_lea.hbm %s3356_s6, 64 }
  0x14   :  { %p2654_p8 = scmp.ne.s32.totalorder %s3356_s6, %s2653_s21  ;;  %p2657_p9 = scmp.lt.u32.totalorder %s2653_s21, %s3356_s6 }
  0x16   :  { %p2659_p10 = pnand %p2657_p9, %p2654_p8 }
  0x18   :  { %2662 = shalt.err (!%p2659_p10)
}
  0x19   :  { %s2663_s26 = scalar_lea.vmem %s63_s30, 64  ;;  %p2668_p12 = scmp.lt.s32.totalorder %s63_s30, %s63_s30 }
  0x1a   :  { %p2664_p11 = scmp.ne.s32.totalorder %s63_s30, %s2663_s26  ;;  %p2669_p13 = scmp.lt.s32.totalorder %s2663_s26, %s2663_s26 }
  0x1c   :  { %p2670_p0 = por %p2669_p13, %p2668_p12 }
  0x1e   :  { %p2671_p1 = pnand %p2670_p0, %p2664_p11 }
  0x20   :  { %2674 = shalt.err (!%p2671_p1)
}
  0x21   :  { %65 = dma.hbm_to_vmem [thread:$0]  %s3356_s6, 64, %s63_s30, [#allocation8]  }
  0x22   :  { %s2749_s28 = smov [#allocation2]   ;;  %s2675_s11 = scalar_lea.hbm %s3353_s3, 2048 }
  0x23   :  { %s27_s29 = sshll.u32 %s2749_s28, 4  ;;  %p2676_p2 = scmp.ne.s32.totalorder %s3353_s3, %s2675_s11  ;;  %s28_s29 = int_to_ptr.vmem [resolvable:$true] %s27_s29 }
  0x24   :  { %p2679_p3 = scmp.lt.u32.totalorder %s2675_s11, %s3353_s3 }
  0x26   :  { %p2681_p4 = pnand %p2679_p3, %p2676_p2 }
  0x28   :  { %2684 = shalt.err (!%p2681_p4)
}
  0x29   :  { %s2685_s16 = scalar_lea.vmem %s28_s29, 2048  ;;  %p2690_p6 = scmp.lt.s32.totalorder %s28_s29, %s28_s29 }
  0x2a   :  { %p2686_p5 = scmp.ne.s32.totalorder %s28_s29, %s2685_s16  ;;  %p2691_p7 = scmp.lt.s32.totalorder %s2685_s16, %s2685_s16 }
  0x2c   :  { %p2692_p8 = por %p2691_p7, %p2690_p6 }
  0x2e   :  { %p2693_p9 = pnand %p2692_p8, %p2686_p5 }
  0x30   :  { %2696 = shalt.err (!%p2693_p9)
}
  0x31   :  { %s2750_s6 = smov 512   ;;  %s2751_s30 = smov 32  }
  0x32   :  { %33 = dma.hbm_to_vmem [thread:$0]  %s3353_s3, 2048, %s28_s29, [#allocation3], %s2750_s6, %s2750_s6, %s2751_s30  }
  0x33   :  { %s2752_s19 = smov [#allocation6]   ;;  %s2753_s21 = smov [#allocation9]  }
  0x34   :  { %s49_s20 = sshll.u32 %s2752_s19, 4  ;;  %s71_s22 = sshll.u32 %s2753_s21, 4  ;;  %s50_s20 = int_to_ptr.vmem [resolvable:$true] %s49_s20  ;;  %s72_s22 = int_to_ptr.vmem [resolvable:$true] %s71_s22 }
  0x35   :  { %s2697_s25 = scalar_lea.hbm %s3355_s5, 2048 }
  0x36   :  { %p2698_p10 = scmp.ne.s32.totalorder %s3355_s5, %s2697_s25  ;;  %p2701_p11 = scmp.lt.u32.totalorder %s2697_s25, %s3355_s5 }
  0x38   :  { %p2703_p12 = pnand %p2701_p11, %p2698_p10 }
  0x3a   :  { %2706 = shalt.err (!%p2703_p12)
}
  0x3b   :  { %s2707_s3 = scalar_lea.vmem %s50_s20, 2048  ;;  %p2712_p0 = scmp.lt.s32.totalorder %s50_s20, %s50_s20 }
  0x3c   :  { %p2708_p13 = scmp.ne.s32.totalorder %s50_s20, %s2707_s3  ;;  %p2713_p1 = scmp.lt.s32.totalorder %s2707_s3, %s2707_s3 }
  0x3e   :  { %p2714_p2 = por %p2713_p1, %p2712_p0 }
  0x40   :  { %p2715_p3 = pnand %p2714_p2, %p2708_p13 }
  0x42   :  { %2718 = shalt.err (!%p2715_p3)
}
  0x43   :  { %55 = dma.hbm_to_vmem [thread:$0]  %s3355_s5, 2048, %s50_s20, [#allocation5], %s2750_s6, %s2750_s6, %s2751_s30  }
  0x44   :  { %s2719_s12 = scalar_lea.hbm %s3357_s7, 8192 }
  0x45   :  { %p2720_p4 = scmp.ne.s32.totalorder %s3357_s7, %s2719_s12  ;;  %p2723_p5 = scmp.lt.u32.totalorder %s2719_s12, %s3357_s7 }
  0x47   :  { %p2725_p6 = pnand %p2723_p5, %p2720_p4 }
  0x49   :  { %2728 = shalt.err (!%p2725_p6)
}
  0x4a   :  { %s2729_s17 = scalar_lea.vmem %s72_s22, 8192  ;;  %p2734_p8 = scmp.lt.s32.totalorder %s72_s22, %s72_s22 }
  0x4b   :  { %p2730_p7 = scmp.ne.s32.totalorder %s72_s22, %s2729_s17  ;;  %p2735_p9 = scmp.lt.s32.totalorder %s2729_s17, %s2729_s17 }
  0x4d   :  { %p2736_p10 = por %p2735_p9, %p2734_p8 }
  0x4f   :  { %p2737_p11 = pnand %p2736_p10, %p2730_p7 }
  0x51   :  { %2740 = shalt.err (!%p2737_p11)
}
  0x52   :  { %77 = dma.hbm_to_vmem [thread:$0]  %s3357_s7, 8192, %s72_s22, [#allocation8], %s2750_s6, %s2750_s6, %s2751_s30  }
  0x53   :  { %2741 = dma.done.wait [#allocation3], 2048  }
  0x54   :  { %2742 = vsyncadd [#allocation3], 4294965248 }
  0x55   :  { %2743 = dma.done.wait [#allocation5], 2112  }
  0x56   :  { %2744 = vsyncadd [#allocation5], 4294965184 }
  0x57   :  { %2745 = dma.done.wait [#allocation8], 8256  }
  0x58   :  { %2746 = vsyncadd [#allocation8], 4294959040  ;;  %v3364_v0 = vmov 0.0   ;;  %v3361_v1 = vmov 0   ;;  %v96_v2 = vld [vmem:[#allocation2 + $0x8] sm:$0xff]  ;;  %v98_v4 = vld [vmem:[#allocation2 + $0x18] sm:$0xff] }
  0x59   :  { %270 = vmatprep.mubr.f32.mxu0 %v3364_v0  ;;  %347 = vmatprep.mubr.f32.mxu1 %v3364_v0  ;;  %v100_v3 = vld [vmem:[#allocation2 + $0x28] sm:$0xff]  ;;  %v102_v6 = vld [vmem:[#allocation2 + $0x38] sm:$0xff]  ;;  %v95_v7 = vld [vmem:[#allocation2] sm:$0xff]  ;;  %vm199_vm0 = vcmask 261120  }
  0x5a   :  { %2469 = vset.pattern.permute.xlu0 %v3361_v1  ;;  %2470 = vset.pattern.permute.xlu1 %v3361_v1  ;;  %v2874_v5 = vpack.c.bf16 %v100_v3, %v96_v2  ;;  %v99_v8 = vld [vmem:[#allocation2 + $0x20] sm:$0xff]  ;;  %v2876_v9 = vpack.c.bf16 %v102_v6, %v98_v4  ;;  %v97_v11 = vld [vmem:[#allocation2 + $0x10] sm:$0xff]  ;;  %v104_v13 = vld [vmem:[#allocation2 + $0x48] sm:$0xff] }
  0x5b   :  { %v2878_v10 = vpack.c.bf16 %v99_v8, %v95_v7  ;;  %v101_v12 = vld [vmem:[#allocation2 + $0x30] sm:$0xff]  ;;  %v108_v15 = vld [vmem:[#allocation2 + $0x68] sm:$0xff]  ;;  %v106_v16 = vld [vmem:[#allocation2 + $0x58] sm:$0xff] }
  0x5c   :  { %2061 = vmatprep.subr.bf16.mxu0 %v2874_v5  ;;  %v2881_v14 = vpack.c.bf16 %v101_v12, %v97_v11  ;;  %v110_v17 = vld [vmem:[#allocation2 + $0x78] sm:$0xff]  ;;  %2069 = vmatprep.subr.bf16.mxu1 %v2876_v9  ;;  %v2885_v18 = vpack.c.bf16 %v108_v15, %v104_v13  ;;  %v103_v20 = vld [vmem:[#allocation2 + $0x40] sm:$0xff]  ;;  %v105_v22 = vld [vmem:[#allocation2 + $0x50] sm:$0xff] }
  0x5d   :  { %2063 = vmatpush1.bf16.msra.mxu0 %v2878_v10  ;;  %v2887_v19 = vpack.c.bf16 %v110_v17, %v106_v16  ;;  %v107_v21 = vld [vmem:[#allocation2 + $0x60] sm:$0xff]  ;;  %v109_v24 = vld [vmem:[#allocation2 + $0x70] sm:$0xff]  ;;  %v112_v33 = vld [vmem:[#allocation9] sm:$0xff] }
  0x5e   :  { %2071 = vmatpush1.bf16.msra.mxu1 %v2881_v14  ;;  %v2890_v23 = vpack.c.bf16 %v107_v21, %v103_v20  ;;  %v113_v25 = vld [vmem:[#allocation9 + $0x8] sm:$0xff]  ;;  %2065 = vmatprep.subr.bf16.mxu0 %v2885_v18  ;;  %v2894_v27 = vpack.c.bf16 %v109_v24, %v105_v22  ;;  %v115_v29 = vld [vmem:[#allocation9 + $0x18] sm:$0xff]  ;;  %v116_v34 = vld [vmem:[#allocation9 + $0x20] sm:$0xff] }
  0x5f   :  { %v117_v26 = vld [vmem:[#allocation9 + $0x28] sm:$0xff]  ;;  %2073 = vmatprep.subr.bf16.mxu1 %v2887_v19  ;;  %v119_v30 = vld [vmem:[#allocation9 + $0x38] sm:$0xff]  ;;  %v114_v35 = vld [vmem:[#allocation9 + $0x10] sm:$0xff]  ;;  %v2904_v36 = vpack.c.bf16 %v116_v34, %v112_v33 }
  0x60   :  { %v2896_v28 = vpack.c.bf16 %v117_v26, %v113_v25  ;;  %v176_v31 = vld [vmem:[%s3350_s0] sm:$0xff]  ;;  %v2901_v32 = vpack.c.bf16 %v119_v30, %v115_v29  ;;  %v118_v37 = vld [vmem:[#allocation9 + $0x30] sm:$0xff]  ;;  %v121_v38 = vld [vmem:[#allocation9 + $0x48] sm:$0xff] }
  0x61   :  { %2067 = vmatpush1.bf16.msra.mxu0 %v2890_v23  ;;  %v125_v39 = vld [vmem:[#allocation9 + $0x68] sm:$0xff]  ;;  %v2908_v40 = vpack.c.bf16 %v118_v37, %v114_v35  ;;  %v123_v42 = vld [vmem:[#allocation9 + $0x58] sm:$0xff]  ;;  %v120_v44 = vld [vmem:[#allocation9 + $0x40] sm:$0xff] }
  0x62   :  { %2075 = vmatpush1.bf16.msra.mxu1 %v2894_v27  ;;  %2077 = vmatprep.subr.bf16.mxu0 %v2896_v28  ;;  %v2910_v41 = vpack.c.bf16 %v125_v39, %v121_v38  ;;  %v127_v43 = vld [vmem:[#allocation9 + $0x78] sm:$0xff]  ;;  %v124_v46 = vld [vmem:[#allocation9 + $0x60] sm:$0xff]  ;;  %v122_v47 = vld [vmem:[#allocation9 + $0x50] sm:$0xff] }
  0x63   :  { %2109 = vmatprep.subr.bf16.mxu1 %v2901_v32  ;;  %v2913_v45 = vpack.c.bf16 %v127_v43, %v123_v42  ;;  %v126_v48 = vld [vmem:[#allocation9 + $0x70] sm:$0xff]  ;;  %v129_v49 = vld [vmem:[#allocation9 + $0x88] sm:$0xff]  ;;  %v131_v51 = vld [vmem:[#allocation9 + $0x98] sm:$0xff]  ;;  %v2918_v52 = vpack.c.bf16 %v124_v46, %v120_v44 }
  0x64   :  { %2004 = vmatmul.mubr.msk.f32.vlgmr.msra.gmra.mrb[0].mxu0 %vm199_vm0, %v176_v31  ;;  %v133_v50 = vld [vmem:[#allocation9 + $0xa8] sm:$0xff]  ;;  %v135_v53 = vld [vmem:[#allocation9 + $0xb8] sm:$0xff]  ;;  %v2922_v54 = vpack.c.bf16 %v126_v48, %v122_v47  ;;  %v128_v56 = vld [vmem:[#allocation9 + $0x80] sm:$0xff] }
  0x65   :  { %2006 = vmatmul.mubr.msk.f32.vlgmr.msra.gmra.mrb[0].mxu1 %vm199_vm0, %v176_v31  ;;  %2079 = vmatpush1.bf16.msra.mxu0 %v2904_v36  ;;  %v2924_v55 = vpack.c.bf16 %v133_v50, %v129_v49  ;;  %v132_v57 = vld [vmem:[#allocation9 + $0xa0] sm:$0xff]  ;;  %v130_v58 = vld [vmem:[#allocation9 + $0x90] sm:$0xff]  ;;  %v2927_v59 = vpack.c.bf16 %v135_v53, %v131_v51  ;;  %v137_v61 = vld [vmem:[#allocation9 + $0xc8] sm:$0xff] }
  0x66   :  { %2111 = vmatpush1.bf16.msra.mxu1 %v2908_v40  ;;  %2081 = vmatprep.subr.bf16.mxu0 %v2910_v41  ;;  %v134_v60 = vld [vmem:[#allocation9 + $0xb0] sm:$0xff]  ;;  %v141_v62 = vld [vmem:[#allocation9 + $0xe8] sm:$0xff]  ;;  %v139_v63 = vld [vmem:[#allocation9 + $0xd8] sm:$0xff]  ;;  %v2932_v3 = vpack.c.bf16 %v132_v57, %v128_v56 }
  0x67   :  { %2113 = vmatprep.subr.bf16.mxu1 %v2913_v45  ;;  %276 = vmatprep.mubr.f32.mxu0 %v3364_v0  ;;  %v143_v2 = vld [vmem:[#allocation9 + $0xf8] sm:$0xff]  ;;  %v2936_v4 = vpack.c.bf16 %v134_v60, %v130_v58  ;;  %v2938_v6 = vpack.c.bf16 %v141_v62, %v137_v61  ;;  %v136_v7 = vld [vmem:[#allocation9 + $0xc0] sm:$0xff]  ;;  %v138_v11 = vld [vmem:[#allocation9 + $0xd0] sm:$0xff] }
  0x68   :  { %353 = vmatprep.mubr.f32.mxu1 %v3364_v0  ;;  %v140_v8 = vld [vmem:[#allocation9 + $0xe0] sm:$0xff]  ;;  %v2941_v12 = vpack.c.bf16 %v143_v2, %v139_v63  ;;  %v142_v13 = vld [vmem:[#allocation9 + $0xf0] sm:$0xff]  ;;  %v145_v15 = vld [vmem:[#allocation9 + $0x108] sm:$0xff] }
  0x69   :  { %2083 = vmatpush1.bf16.msra.mxu0 %v2918_v52  ;;  %v149_v16 = vld [vmem:[#allocation9 + $0x128] sm:$0xff]  ;;  %v147_v17 = vld [vmem:[#allocation9 + $0x118] sm:$0xff]  ;;  %v2944_v21 = vpack.c.bf16 %v140_v8, %v136_v7  ;;  %v2948_v22 = vpack.c.bf16 %v142_v13, %v138_v11  ;;  %v144_v25 = vld [vmem:[#allocation9 + $0x100] sm:$0xff] }
  0x6a   :  { %2115 = vmatpush1.bf16.msra.mxu1 %v2922_v54  ;;  %2085 = vmatprep.subr.bf16.mxu0 %v2924_v55  ;;  %v151_v20 = vld [vmem:[#allocation9 + $0x138] sm:$0xff]  ;;  %v2950_v24 = vpack.c.bf16 %v149_v16, %v145_v15  ;;  %v148_v26 = vld [vmem:[#allocation9 + $0x120] sm:$0xff]  ;;  %v146_v29 = vld [vmem:[#allocation9 + $0x110] sm:$0xff] }
  0x6b   :  { %2117 = vmatprep.subr.bf16.mxu1 %v2927_v59  ;;  %v2953_v30 = vpack.c.bf16 %v151_v20, %v147_v17  ;;  %v150_v31 = vld [vmem:[#allocation9 + $0x130] sm:$0xff]  ;;  %v153_v33 = vld [vmem:[#allocation9 + $0x148] sm:$0xff]  ;;  %v155_v35 = vld [vmem:[#allocation9 + $0x158] sm:$0xff]  ;;  %v2956_v38 = vpack.c.bf16 %v148_v26, %v144_v25 }
  0x6c   :  { %v157_v34 = vld [vmem:[#allocation9 + $0x168] sm:$0xff]  ;;  %v159_v37 = vld [vmem:[#allocation9 + $0x178] sm:$0xff]  ;;  %v152_v39 = vld [vmem:[#allocation9 + $0x140] sm:$0xff]  ;;  %v2963_v43 = vpack.c.bf16 %v150_v31, %v146_v29 }
  0x6d   :  { %2087 = vmatpush1.bf16.msra.mxu0 %v2932_v3  ;;  %v177_v42 = vld [vmem:[%s3350_s0 + $0x8] sm:$0xff]  ;;  %v2965_v44 = vpack.c.bf16 %v157_v34, %v153_v33  ;;  %v154_v47 = vld [vmem:[#allocation9 + $0x150] sm:$0xff]  ;;  %v2968_v49 = vpack.c.bf16 %v159_v37, %v155_v35  ;;  %v161_v50 = vld [vmem:[#allocation9 + $0x188] sm:$0xff] }
  0x6e   :  { %2119 = vmatpush1.bf16.msra.mxu1 %v2936_v4  ;;  %2089 = vmatprep.subr.bf16.mxu0 %v2938_v6  ;;  %v156_v46 = vld [vmem:[#allocation9 + $0x160] sm:$0xff]  ;;  %v158_v48 = vld [vmem:[#allocation9 + $0x170] sm:$0xff]  ;;  %v165_v51 = vld [vmem:[#allocation9 + $0x1a8] sm:$0xff] }
  0x6f   :  { %2121 = vmatprep.subr.bf16.mxu1 %v2941_v12  ;;  %v163_v53 = vld [vmem:[#allocation9 + $0x198] sm:$0xff]  ;;  %2005 = vmatmul.mubr.msk.f32.gmra.mrb[2].mxu0 %vm199_vm0, %v177_v42  ;;  %v2981_v58 = vld [vmem:[%s3352_s2 + $0x8] sm:$0xff]  ;;  %v2984_v60 = vpack.c.bf16 %v156_v46, %v152_v39  ;;  %v2991_v61 = vpack.c.bf16 %v158_v48, %v154_v47  ;;  %v2993_v62 = vpack.c.bf16 %v165_v51, %v161_v50  ;;  %v162_v7 = vld [vmem:[#allocation9 + $0x190] sm:$0xff] }
  0x70   :  { %v167_v56 = vld [vmem:[#allocation9 + $0x1b8] sm:$0xff]  ;;  %2007 = vmatmul.mubr.msk.f32.gmra.mrb[2].mxu1 %vm199_vm0, %v177_v42  ;;  %424 = vmatprep.mubr.f32.mxu0 %v3364_v0  ;;  %3376 = vst [vmem:[#allocation14_spill] sm:$0xff] %v2981_v58  ;;  %vm571_vm2 = vcmp.eq.s32.totalorder %v2981_v58, 1  ;;  %v160_v63 = vld [vmem:[#allocation9 + $0x180] sm:$0xff]  ;;  %v166_v13 = vld [vmem:[#allocation9 + $0x1b0] sm:$0xff]  ;;  %vm958_vm4 = vcmp.eq.s32.totalorder %v2981_v58, 2 }
  0x71   :  { %2091 = vmatpush1.bf16.msra.mxu0 %v2944_v21  ;;  %v2976_v57 = vld [vmem:[%s3352_s2] sm:$0xff]  ;;  %501 = vmatprep.mubr.f32.mxu1 %v3364_v0  ;;  %v164_v2 = vld [vmem:[#allocation9 + $0x1a0] sm:$0xff]  ;;  %v2997_v11 = vpack.c.bf16 %v167_v56, %v163_v53  ;;  %v169_v15 = vld [vmem:[#allocation9 + $0x1c8] sm:$0xff]  ;;  %v573_v25 = vsel %vm571_vm2, 1, %v3361_v1  ;;  %v3007_v29 = vpack.c.bf16 %v166_v13, %v162_v7  ;;  %v960_v51 = vsel %vm958_vm4, 1, %v3361_v1 }
  0x72   :  { %2123 = vmatpush1.bf16.msra.mxu1 %v2948_v22  ;;  %2093 = vmatprep.subr.bf16.mxu0 %v2950_v24  ;;  %3375 = vst [vmem:[#allocation13_spill] sm:$0xff] %v2976_v57  ;;  %vm570_vm1 = vcmp.eq.s32.totalorder %v2976_v57, 1  ;;  %v173_v16 = vld [vmem:[#allocation9 + $0x1e8] sm:$0xff]  ;;  %v171_v17 = vld [vmem:[#allocation9 + $0x1d8] sm:$0xff]  ;;  %v3003_v26 = vpack.c.bf16 %v164_v2, %v160_v63  ;;  %v168_v33 = vld [vmem:[#allocation9 + $0x1c0] sm:$0xff]  ;;  %vm957_vm3 = vcmp.eq.s32.totalorder %v2976_v57, 2  ;;  %v179_v53 = vlaneseq }
  0x73   :  { %2125 = vmatprep.subr.bf16.mxu1 %v2953_v30  ;;  %v572_v8 = vsel %vm570_vm1, 1, %v3361_v1  ;;  %v175_v20 = vld [vmem:[#allocation9 + $0x1f8] sm:$0xff]  ;;  %v3009_v31 = vpack.c.bf16 %v173_v16, %v169_v15  ;;  %v172_v34 = vld [vmem:[#allocation9 + $0x1e0] sm:$0xff]  ;;  %v170_v37 = vld [vmem:[#allocation9 + $0x1d0] sm:$0xff]  ;;  %v959_v50 = vsel %vm957_vm3, 1, %v3361_v1  ;;  %vm1344_vm5 = vcmp.eq.s32.totalorder %v2976_v57, 3 }
  0x74   :  { %575 = vperm.xlu0 %2469, %v572_v8   ;;  %v3012_v35 = vpack.c.bf16 %v175_v20, %v171_v17  ;;  %v174_v39 = vld [vmem:[#allocation9 + $0x1f0] sm:$0xff]  ;;  %v3015_v42 = vpack.c.bf16 %v172_v34, %v168_v33  ;;  %v2014_v47 = vld [vmem:[%s3350_s0 + $0x10] sm:$0xff]  ;;  %962 = vperm.xlu1 %2470, %v959_v50   ;;  %v3092_v56 = vshrl.u32 %v179_v53, 7  ;;  %v111_v2 = vld [vmem:[#allocation4] sm:$0xf]  ;;  %vm1345_vm6 = vcmp.eq.s32.totalorder %v2981_v58, 3 }
  0x75   :  { %2095 = vmatpush1.bf16.msra.mxu0 %v2956_v38  ;;  %v3019_v46 = vpack.c.bf16 %v174_v39, %v170_v37  ;;  %v2015_v48 = vld [vmem:[%s3350_s0 + $0x18] sm:$0xff] }
  0x76   :  { %2127 = vmatpush1.bf16.msra.mxu1 %v2963_v43  ;;  %2097 = vmatprep.subr.bf16.mxu0 %v2965_v44  ;;  %3377 = vst [vmem:[#allocation15_spill] sm:$0xff] %v3092_v56  ;;  %v3360_v63 = vsub.s32 0, %v3092_v56  ;;  %v3359_v7 = vsub.s32 1, %v3092_v56  ;;  %v3363_v16 = vsub.s32 2, %v3092_v56  ;;  %v3368_v50 = vsub.s32 3, %v3092_v56 }
  0x77   :  { %2129 = vmatprep.subr.bf16.mxu1 %v2968_v49 }
  0x78   :  { %578 = vperm.xlu0 %2469, %v573_v25   ;;  %965 = vperm.xlu1 %2470, %v960_v51   ;;  %v3098_v8 = vrot.slane %v111_v2, %v3360_v63  ;;  %v3102_v13 = vrot.slane %v111_v2, %v3359_v7  ;;  %v3109_v39 = vrot.slane %v111_v2, %v3363_v16 }
  0x79   :  { %2099 = vmatpush1.bf16.msra.mxu0 %v2984_v60  ;;  %v3117_v16 = vrot.slane %v111_v2, %v3368_v50 }
  0x7a   :  { %2131 = vmatpush1.bf16.msra.mxu1 %v2991_v61  ;;  %2101 = vmatprep.subr.bf16.mxu0 %v2993_v62  ;;  %3378 = vst [vmem:[#allocation16_spill] sm:$0xff] %v3098_v8 }
  0x7b   :  { %2133 = vmatprep.subr.bf16.mxu1 %v2997_v11 }
  0x7d   :  { %2103 = vmatpush1.bf16.msra.mxu0 %v3003_v26 }
  0x7e   :  { %2135 = vmatpush1.bf16.msra.mxu1 %v3007_v29  ;;  %2105 = vmatprep.subr.bf16.mxu0 %v3009_v31 }
  0x7f   :  { %2137 = vmatprep.subr.bf16.mxu1 %v3012_v35 }
  0x81   :  { %2107 = vmatpush1.bf16.msra.mxu0 %v3015_v42 }
  0x82   :  { %2139 = vmatpush1.bf16.msra.mxu1 %v3019_v46  ;;  %2141 = vmatprep.subr.bf16.mxu0 %v2874_v5 }
  0x83   :  { %2149 = vmatprep.subr.bf16.mxu1 %v2876_v9 }
  0x84   :  { %425 = vmatmul.mubr.f32.vlgmr.msra.gmra.mrb[0].mxu0 %v3364_v0 }
  0x85   :  { %502 = vmatmul.mubr.f32.vlgmr.msra.gmra.mrb[0].mxu1 %v3364_v0  ;;  %430 = vmatprep.mubr.f32.mxu0 %v3364_v0 }
  0x86   :  { %507 = vmatprep.mubr.f32.mxu1 %v3364_v0  ;;  %2143 = vmatpush1.bf16.msra.mxu0 %v2878_v10 }
  0x87   :  { %2151 = vmatpush1.bf16.msra.mxu1 %v2881_v14  ;;  %2145 = vmatprep.subr.bf16.mxu0 %v2885_v18 }
  0x88   :  { %431 = vmatmul.mubr.f32.gmra.mrb[2].mxu0 %v3364_v0  ;;  %2153 = vmatprep.subr.bf16.mxu1 %v2887_v19 }
  0x89   :  { %508 = vmatmul.mubr.f32.gmra.mrb[2].mxu1 %v3364_v0  ;;  %657 = vmatprep.mubr.f32.mxu0 %v3364_v0 }
  0x8a   :  { %2147 = vmatpush1.bf16.msra.mxu0 %v2890_v23  ;;  %734 = vmatprep.mubr.f32.mxu1 %v3364_v0 }
  0x8b   :  { %2155 = vmatpush1.bf16.msra.mxu1 %v2894_v27  ;;  %2157 = vmatprep.subr.bf16.mxu0 %v2896_v28 }
  0x8c   :  { %2189 = vmatprep.subr.bf16.mxu1 %v2901_v32 }
  0x8d   :  { %2016 = vmatmul.mubr.msk.f32.vlgmr.msra.gmra.mrb[4].mxu0 %vm199_vm0, %v2014_v47 }
  0x8e   :  { %2018 = vmatmul.mubr.msk.f32.vlgmr.msra.gmra.mrb[4].mxu1 %vm199_vm0, %v2014_v47  ;;  %2159 = vmatpush1.bf16.msra.mxu0 %v2904_v36 }
  0x8f   :  { %2191 = vmatpush1.bf16.msra.mxu1 %v2908_v40  ;;  %2161 = vmatprep.subr.bf16.mxu0 %v2910_v41 }
  0x90   :  { %2193 = vmatprep.subr.bf16.mxu1 %v2913_v45  ;;  %663 = vmatprep.mubr.f32.mxu0 %v3364_v0 }
  0x91   :  { %740 = vmatprep.mubr.f32.mxu1 %v3364_v0  ;;  %2017 = vmatmul.mubr.msk.f32.gmra.mrb[6].mxu0 %vm199_vm0, %v2015_v48 }
  0x92   :  { %2163 = vmatpush1.bf16.msra.mxu0 %v2918_v52  ;;  %2019 = vmatmul.mubr.msk.f32.gmra.mrb[6].mxu1 %vm199_vm0, %v2015_v48 }
  0x93   :  { %2195 = vmatpush1.bf16.msra.mxu1 %v2922_v54  ;;  %2165 = vmatprep.subr.bf16.mxu0 %v2924_v55 }
  0x94   :  { %2197 = vmatprep.subr.bf16.mxu1 %v2927_v59  ;;  %811 = vmatprep.mubr.f32.mxu0 %v3364_v0 }
  0x95   :  { %888 = vmatprep.mubr.f32.mxu1 %v3364_v0 }
  0x96   :  { %2167 = vmatpush1.bf16.msra.mxu0 %v2932_v3 }
  0x97   :  { %2199 = vmatpush1.bf16.msra.mxu1 %v2936_v4  ;;  %2169 = vmatprep.subr.bf16.mxu0 %v2938_v6 }
  0x98   :  { %2201 = vmatprep.subr.bf16.mxu1 %v2941_v12 }
  0x9a   :  { %2171 = vmatpush1.bf16.msra.mxu0 %v2944_v21 }
  0x9b   :  { %2203 = vmatpush1.bf16.msra.mxu1 %v2948_v22  ;;  %2173 = vmatprep.subr.bf16.mxu0 %v2950_v24 }
  0x9c   :  { %2205 = vmatprep.subr.bf16.mxu1 %v2953_v30 }
  0x9e   :  { %2175 = vmatpush1.bf16.msra.mxu0 %v2956_v38 }
  0x9f   :  { %2207 = vmatpush1.bf16.msra.mxu1 %v2963_v43  ;;  %2177 = vmatprep.subr.bf16.mxu0 %v2965_v44 }
  0xa0   :  { %2209 = vmatprep.subr.bf16.mxu1 %v2968_v49 }
  0xa2   :  { %2179 = vmatpush1.bf16.msra.mxu0 %v2984_v60 }
  0xa3   :  { %2211 = vmatpush1.bf16.msra.mxu1 %v2991_v61  ;;  %2181 = vmatprep.subr.bf16.mxu0 %v2993_v62 }
  0xa4   :  { %2213 = vmatprep.subr.bf16.mxu1 %v2997_v11 }
  0xa6   :  { %2183 = vmatpush1.bf16.msra.mxu0 %v3003_v26 }
  0xa7   :  { %2215 = vmatpush1.bf16.msra.mxu1 %v3007_v29  ;;  %2185 = vmatprep.subr.bf16.mxu0 %v3009_v31 }
  0xa8   :  { %2217 = vmatprep.subr.bf16.mxu1 %v3012_v35 }
  0xaa   :  { %2187 = vmatpush1.bf16.msra.mxu0 %v3015_v42 }
  0xab   :  { %2219 = vmatpush1.bf16.msra.mxu1 %v3019_v46  ;;  %2221 = vmatprep.subr.bf16.mxu0 %v2874_v5 }
  0xac   :  { %2229 = vmatprep.subr.bf16.mxu1 %v2876_v9 }
 0x157   :  { %v426_v15 = vpop.f32.mrb[0].mxu0 }
 0x158   :  { %v2396_v17 = vadd.f32 %v426_v15, %v3098_v8  ;;  %v503_v20 = vpop.f32.mrb[0].mxu1  ;;  %v428_v25 = vpop.f32.mrb[1].mxu0 }
 0x159   :  { %v2397_v33 = vadd.f32 %v428_v25, %v3102_v13  ;;  %v505_v34 = vpop.f32.mrb[1].mxu1 }
 0x15a   :  { %v2008_v37 = vmul.f32 -1.442695, %v2396_v17  ;;  %v2400_v17 = vadd.f32 %v503_v20, %v3109_v39 }
 0x15b   :  { %v2009_v47 = vmul.f32 -1.442695, %v2397_v33  ;;  %v432_v48 = vpop.f32.mrb[2].mxu0 }
 0x15c   :  { %2471 = vpow2.f32 %v2008_v37  ;;  %v2398_v51 = vadd.f32 %v432_v48, %v3098_v8  ;;  %v434_v53 = vpop.f32.mrb[3].mxu0  ;;  %v509_v7 = vpop.f32.mrb[2].mxu1  ;;  %v2010_v37 = vmul.f32 -1.442695, %v2400_v17  ;;  %v2401_v48 = vadd.f32 %v505_v34, %v3117_v16 }
 0x15d   :  { %v2399_v15 = vadd.f32 %v434_v53, %v3102_v13  ;;  %v511_v63 = vpop.f32.mrb[3].mxu1  ;;  %2473 = vpow2.f32 %v2009_v47  ;;  %v2402_v33 = vadd.f32 %v509_v7, %v3109_v39 }
 0x15e   :  { %v2011_v25 = vmul.f32 -1.442695, %v2398_v51  ;;  %v2403_v20 = vadd.f32 %v511_v63, %v3117_v16 }
 0x15f   :  { %v2012_v1 = vmul.f32 -1.442695, %v2399_v15  ;;  %v2013_v8 = vmul.f32 -1.442695, %v2402_v33 }
 0x160   :  { %2475 = vpow2.f32 %v2011_v25 }
 0x161   :  { %2477 = vpow2.f32 %v2012_v1 }
 0x162   :  { %2479 = vpow2.f32 %v2010_v37 }
 0x163   :  { %2481 = vtanh.f32 %v2401_v48 }
 0x166   :  { %v2472_v0 = vpop.eup %2471 }
 0x167   :  { %v540_v53 = vadd.f32 1.0, %v2472_v0  ;;  %v2474_v47 = vpop.eup %2473 }
 0x168   :  { %v541_v51 = vadd.f32 1.0, %v2474_v47 }
 0x169   :  { %2483 = vrcp.f32 %v540_v53 }
 0x16a   :  { %v2476_v15 = vpop.eup %2475  ;;  %2485 = vpow2.f32 %v2013_v8 }
 0x16b   :  { %v2478_v2 = vpop.eup %2477  ;;  %2487 = vrcp.f32 %v541_v51  ;;  %v543_v1 = vadd.f32 1.0, %v2476_v15 }
 0x16c   :  { %v544_v25 = vadd.f32 1.0, %v2478_v2  ;;  %2489 = vtanh.f32 %v2403_v20  ;;  %v2480_v7 = vpop.eup %2479 }
 0x16d   :  { %2491 = vrcp.f32 %v543_v1  ;;  %v2482_v34 = vpop.eup %2481  ;;  %v542_v48 = vadd.f32 1.0, %v2480_v7 }
 0x16e   :  { %2493 = vrcp.f32 %v544_v25 }
 0x16f   :  { %2495 = vrcp.f32 %v542_v48 }
 0x173   :  { %v2484_v17 = vpop.eup %2483 }
 0x174   :  { %v2486_v0 = vpop.eup %2485  ;;  %v562_v33 = vmul.f32 %v2484_v17, %v2482_v34  ;;  %v3379_v17 = vmov 0.0  }
 0x175   :  { %v2488_v37 = vpop.eup %2487  ;;  %v545_v8 = vadd.f32 1.0, %v2486_v0  ;;  %v2026_v0 = vld [vmem:[%s3350_s0 + $0x20] sm:$0xff] }
 0x176   :  { %v2490_v50 = vpop.eup %2489  ;;  %v560_v63 = vmul.f32 0.0, %v2488_v37  ;;  %v3380_v37 = vmov 0  }
 0x177   :  { %v2492_v53 = vpop.eup %2491  ;;  %v1346_v48 = vsel %vm1344_vm5, 1, %v3380_v37 }
 0x178   :  { %v2494_v47 = vpop.eup %2493  ;;  %v3122_v56 = vadd.f32 %v562_v33, %v560_v63  ;;  %v563_v51 = vmul.f32 %v2492_v53, %v2490_v50  ;;  %v2027_v33 = vld [vmem:[%s3350_s0 + $0x28] sm:$0xff]  ;;  %v1347_v63 = vsel %vm1345_vm6, 1, %v3380_v37  ;;  %1349 = vperm.xlu0 %2469, %v1346_v48  }
 0x179   :  { %v561_v15 = vmul.f32 0.0, %v2494_v47  ;;  %v2496_v2 = vpop.eup %2495  ;;  %1352 = vperm.xlu1 %2470, %v1347_v63  }
 0x17a   :  { %2497 = vtanh.f32 %v3122_v56 }
 0x17b   :  { %v3125_v20 = vadd.f32 %v563_v51, %v561_v15  ;;  %2499 = vrcp.f32 %v545_v8  ;;  %v3381_v8 = vld [vmem:[#allocation16_spill] sm:$0xff] }
 0x17d   :  { %2501 = vtanh.f32 %v3125_v20 }
 0x184   :  { %v2498_v1 = vpop.eup %2497 }
 0x185   :  { %v3128_v25 = vmul.f32 %v2498_v1, %v2496_v2  ;;  %v2500_v7 = vpop.eup %2499 }
 0x187   :  { %v2502_v34 = vpop.eup %2501  ;;  %812 = vmatmul.mubr.f32.vlgmr.msra.gmra.mrb[4].mxu0 %v3128_v25  ;;  %889 = vmatmul.mubr.f32.vlgmr.msra.gmra.mrb[4].mxu1 %v3128_v25 }
 0x188   :  { %v3132_v50 = vmul.f32 %v2502_v34, %v2500_v7  ;;  %817 = vmatprep.mubr.f32.mxu0 %v3379_v17  ;;  %894 = vmatprep.mubr.f32.mxu1 %v3379_v17 }
 0x189   :  { %2223 = vmatpush1.bf16.msra.mxu0 %v2878_v10  ;;  %2231 = vmatpush1.bf16.msra.mxu1 %v2881_v14 }
 0x18a   :  { %2225 = vmatprep.subr.bf16.mxu0 %v2885_v18  ;;  %2233 = vmatprep.subr.bf16.mxu1 %v2887_v19 }
 0x18b   :  { %818 = vmatmul.mubr.f32.gmra.mrb[6].mxu0 %v3132_v50  ;;  %895 = vmatmul.mubr.f32.gmra.mrb[6].mxu1 %v3132_v50 }
 0x18c   :  { %1044 = vmatprep.mubr.f32.mxu0 %v3379_v17  ;;  %1121 = vmatprep.mubr.f32.mxu1 %v3379_v17 }
 0x18d   :  { %2227 = vmatpush1.bf16.msra.mxu0 %v2890_v23  ;;  %2235 = vmatpush1.bf16.msra.mxu1 %v2894_v27 }
 0x18e   :  { %2237 = vmatprep.subr.bf16.mxu0 %v2896_v28  ;;  %2269 = vmatprep.subr.bf16.mxu1 %v2901_v32 }
 0x190   :  { %2028 = vmatmul.mubr.msk.f32.vlgmr.msra.gmra.mrb[8].mxu0 %vm199_vm0, %v2026_v0  ;;  %2030 = vmatmul.mubr.msk.f32.vlgmr.msra.gmra.mrb[8].mxu1 %vm199_vm0, %v2026_v0 }
 0x191   :  { %2239 = vmatpush1.bf16.msra.mxu0 %v2904_v36  ;;  %2271 = vmatpush1.bf16.msra.mxu1 %v2908_v40 }
 0x192   :  { %2241 = vmatprep.subr.bf16.mxu0 %v2910_v41  ;;  %2273 = vmatprep.subr.bf16.mxu1 %v2913_v45 }
 0x193   :  { %1050 = vmatprep.mubr.f32.mxu0 %v3379_v17  ;;  %1127 = vmatprep.mubr.f32.mxu1 %v3379_v17 }
 0x194   :  { %2029 = vmatmul.mubr.msk.f32.gmra.mrb[10].mxu0 %vm199_vm0, %v2027_v33  ;;  %2031 = vmatmul.mubr.msk.f32.gmra.mrb[10].mxu1 %vm199_vm0, %v2027_v33 }
 0x195   :  { %2243 = vmatpush1.bf16.msra.mxu0 %v2918_v52  ;;  %2275 = vmatpush1.bf16.msra.mxu1 %v2922_v54 }
 0x196   :  { %2245 = vmatprep.subr.bf16.mxu0 %v2924_v55  ;;  %2277 = vmatprep.subr.bf16.mxu1 %v2927_v59 }
 0x197   :  { %1198 = vmatprep.mubr.f32.mxu0 %v3379_v17  ;;  %1275 = vmatprep.mubr.f32.mxu1 %v3379_v17 }
 0x199   :  { %2247 = vmatpush1.bf16.msra.mxu0 %v2932_v3  ;;  %2279 = vmatpush1.bf16.msra.mxu1 %v2936_v4 }
 0x19a   :  { %2249 = vmatprep.subr.bf16.mxu0 %v2938_v6  ;;  %2281 = vmatprep.subr.bf16.mxu1 %v2941_v12 }
 0x19d   :  { %2251 = vmatpush1.bf16.msra.mxu0 %v2944_v21  ;;  %2283 = vmatpush1.bf16.msra.mxu1 %v2948_v22 }
 0x19e   :  { %2253 = vmatprep.subr.bf16.mxu0 %v2950_v24  ;;  %2285 = vmatprep.subr.bf16.mxu1 %v2953_v30 }
 0x1a1   :  { %2255 = vmatpush1.bf16.msra.mxu0 %v2956_v38  ;;  %2287 = vmatpush1.bf16.msra.mxu1 %v2963_v43 }
 0x1a2   :  { %2257 = vmatprep.subr.bf16.mxu0 %v2965_v44  ;;  %2289 = vmatprep.subr.bf16.mxu1 %v2968_v49 }
 0x1a5   :  { %2259 = vmatpush1.bf16.msra.mxu0 %v2984_v60  ;;  %2291 = vmatpush1.bf16.msra.mxu1 %v2991_v61 }
 0x1a6   :  { %2261 = vmatprep.subr.bf16.mxu0 %v2993_v62  ;;  %2293 = vmatprep.subr.bf16.mxu1 %v2997_v11 }
 0x1a9   :  { %2263 = vmatpush1.bf16.msra.mxu0 %v3003_v26  ;;  %2295 = vmatpush1.bf16.msra.mxu1 %v3007_v29 }
 0x1aa   :  { %2265 = vmatprep.subr.bf16.mxu0 %v3009_v31  ;;  %2297 = vmatprep.subr.bf16.mxu1 %v3012_v35 }
 0x1ad   :  { %2267 = vmatpush1.bf16.msra.mxu0 %v3015_v42  ;;  %2299 = vmatpush1.bf16.msra.mxu1 %v3019_v46 }
 0x1ae   :  { %2301 = vmatprep.subr.bf16.mxu0 %v2874_v5  ;;  %2309 = vmatprep.subr.bf16.mxu1 %v2876_v9 }
 0x25a   :  { %v813_v53 = vpop.f32.mrb[4].mxu0  ;;  %v890_v47 = vpop.f32.mrb[4].mxu1 }
 0x25b   :  { %v2404_v51 = vadd.f32 %v813_v53, %v3381_v8  ;;  %v815_v15 = vpop.f32.mrb[5].mxu0  ;;  %v892_v2 = vpop.f32.mrb[5].mxu1  ;;  %v2408_v53 = vadd.f32 %v890_v47, %v3109_v39 }
 0x25c   :  { %v2405_v5 = vadd.f32 %v815_v15, %v3102_v13  ;;  %v2409_v15 = vadd.f32 %v892_v2, %v3117_v16 }
 0x25d   :  { %v2020_v1 = vmul.f32 -1.442695, %v2404_v51  ;;  %v2022_v51 = vmul.f32 -1.442695, %v2408_v53 }
 0x25e   :  { %v2021_v9 = vmul.f32 -1.442695, %v2405_v5  ;;  %v819_v7 = vpop.f32.mrb[6].mxu0  ;;  %v896_v34 = vpop.f32.mrb[6].mxu1 }
 0x25f   :  { %2503 = vpow2.f32 %v2020_v1  ;;  %v2406_v0 = vadd.f32 %v819_v7, %v3381_v8  ;;  %v821_v33 = vpop.f32.mrb[7].mxu0  ;;  %v898_v57 = vpop.f32.mrb[7].mxu1  ;;  %v2410_v5 = vadd.f32 %v896_v34, %v3109_v39 }
 0x260   :  { %v2407_v48 = vadd.f32 %v821_v33, %v3102_v13  ;;  %2505 = vpow2.f32 %v2021_v9  ;;  %v2411_v1 = vadd.f32 %v898_v57, %v3117_v16 }
 0x261   :  { %v2023_v63 = vmul.f32 -1.442695, %v2406_v0  ;;  %v2025_v33 = vmul.f32 -1.442695, %v2410_v5 }
 0x262   :  { %v2024_v37 = vmul.f32 -1.442695, %v2407_v48 }
 0x263   :  { %2507 = vpow2.f32 %v2023_v63 }
 0x264   :  { %2509 = vpow2.f32 %v2024_v37 }
 0x265   :  { %2511 = vtanh.f32 %v2409_v15 }
 0x266   :  { %2513 = vpow2.f32 %v2022_v51 }
 0x269   :  { %v2504_v58 = vpop.eup %2503 }
 0x26a   :  { %v927_v7 = vadd.f32 1.0, %v2504_v58  ;;  %v2506_v8 = vpop.eup %2505 }
 0x26b   :  { %v928_v9 = vadd.f32 1.0, %v2506_v8 }
 0x26c   :  { %2515 = vrcp.f32 %v927_v7 }
 0x26d   :  { %v2508_v0 = vpop.eup %2507  ;;  %2517 = vtanh.f32 %v2411_v1 }
 0x26e   :  { %2519 = vrcp.f32 %v928_v9  ;;  %v930_v47 = vadd.f32 1.0, %v2508_v0  ;;  %v2510_v37 = vpop.eup %2509 }
 0x26f   :  { %2521 = vpow2.f32 %v2025_v33  ;;  %v931_v2 = vadd.f32 1.0, %v2510_v37  ;;  %v2512_v34 = vpop.eup %2511  ;;  %v576_v37 = vpop.permute.xlu0 %575 }
 0x270   :  { %2523 = vrcp.f32 %v930_v47  ;;  %v2514_v48 = vpop.eup %2513  ;;  %vm580_vm7 = vcmp.eq.s32.totalorder %v576_v37, 1 }
 0x271   :  { %2525 = vrcp.f32 %v931_v2  ;;  %v929_v15 = vadd.f32 1.0, %v2514_v48  ;;  %v963_v2 = vpop.permute.xlu1 %962 }
 0x272   :  { %vm967_vm8 = vcmp.eq.s32.totalorder %v963_v2, 1 }
 0x273   :  { %2527 = vrcp.f32 %v929_v15  ;;  %v579_v48 = vpop.permute.xlu0 %578 }
 0x274   :  { %vm581_vm9 = vcmp.eq.s32.totalorder %v579_v48, 1 }
 0x276   :  { %v2516_v63 = vpop.eup %2515 }
 0x277   :  { %v2518_v57 = vpop.eup %2517  ;;  %v949_v58 = vmul.f32 %v2516_v63, %v2512_v34 }
 0x278   :  { %v2520_v53 = vpop.eup %2519 }
 0x279   :  { %v2522_v51 = vpop.eup %2521  ;;  %v947_v5 = vmul.f32 %v2520_v53, %v3122_v56 }
 0x27a   :  { %v2524_v8 = vpop.eup %2523  ;;  %v932_v33 = vadd.f32 1.0, %v2522_v51 }
 0x27b   :  { %v3207_v7 = vadd.f32 %v949_v58, %v947_v5  ;;  %v950_v1 = vmul.f32 %v2524_v8, %v2518_v57  ;;  %v2526_v9 = vpop.eup %2525  ;;  %v966_v57 = vpop.permute.xlu1 %965  ;;  %v582_v58 = vsel %vm580_vm7, %v3128_v25, 0.0  ;;  %v583_v5 = vsel %vm581_vm9, %v3132_v50, 0.0 }
 0x27c   :  { %v948_v0 = vmul.f32 %v2526_v9, %v3125_v20  ;;  %vm968_vm10 = vcmp.eq.s32.totalorder %v966_v57, 1 }
 0x27d   :  { %2529 = vtanh.f32 %v3207_v7  ;;  %v2528_v34 = vpop.eup %2527 }
 0x27e   :  { %v3211_v47 = vadd.f32 %v950_v1, %v948_v0  ;;  %2531 = vrcp.f32 %v932_v33 }
 0x280   :  { %2533 = vtanh.f32 %v3211_v47 }
 0x287   :  { %v2530_v56 = vpop.eup %2529 }
 0x288   :  { %v955_v63 = vmul.f32 %v2530_v56, %v2528_v34  ;;  %v2532_v53 = vpop.eup %2531 }
 0x28a   :  { %v3215_v15 = vsel %vm967_vm8, %v955_v63, %v582_v58  ;;  %1199 = vmatmul.mubr.f32.vlgmr.msra.gmra.mrb[8].mxu0 %v955_v63  ;;  %1276 = vmatmul.mubr.f32.vlgmr.msra.gmra.mrb[8].mxu1 %v955_v63  ;;  %v2534_v20 = vpop.eup %2533 }
 0x28b   :  { %1204 = vmatprep.mubr.f32.mxu0 %v3379_v17  ;;  %1281 = vmatprep.mubr.f32.mxu1 %v3379_v17  ;;  %v956_v51 = vmul.f32 %v2534_v20, %v2532_v53 }
 0x28c   :  { %2303 = vmatpush1.bf16.msra.mxu0 %v2878_v10  ;;  %2311 = vmatpush1.bf16.msra.mxu1 %v2881_v14  ;;  %v2038_v10 = vld [vmem:[%s3350_s0 + $0x30] sm:$0xff]  ;;  %v2039_v14 = vld [vmem:[%s3350_s0 + $0x38] sm:$0xff] }
 0x28d   :  { %2305 = vmatprep.subr.bf16.mxu0 %v2885_v18  ;;  %2313 = vmatprep.subr.bf16.mxu1 %v2887_v19  ;;  %v3224_v25 = vsel %vm968_vm10, %v956_v51, %v583_v5  ;;  %v1748_v18 = vld [vmem:[#allocation6 + $0x8] sm:$0xff] }
 0x28e   :  { %1205 = vmatmul.mubr.f32.gmra.mrb[10].mxu0 %v956_v51  ;;  %1282 = vmatmul.mubr.f32.gmra.mrb[10].mxu1 %v956_v51  ;;  %v1752_v19 = vld [vmem:[#allocation6 + $0x28] sm:$0xff] }
 0x28f   :  { %1431 = vmatprep.mubr.f32.mxu0 %v3379_v17  ;;  %1508 = vmatprep.mubr.f32.mxu1 %v3379_v17 }
 0x290   :  { %2307 = vmatpush1.bf16.msra.mxu0 %v2890_v23  ;;  %2315 = vmatpush1.bf16.msra.mxu1 %v2894_v27  ;;  %v2380_v23 = vpack.c.bf16 %v1752_v19, %v1748_v18  ;;  %v1750_v27 = vld [vmem:[#allocation6 + $0x18] sm:$0xff] }
 0x291   :  { %2317 = vmatprep.subr.bf16.mxu0 %v2896_v28  ;;  %2349 = vmatprep.subr.bf16.mxu1 %v2901_v32  ;;  %v1754_v28 = vld [vmem:[#allocation6 + $0x38] sm:$0xff] }
 0x292   :  { %v2388_v32 = vpack.c.bf16 %v1754_v28, %v1750_v27  ;;  %v1747_v27 = vld [vmem:[#allocation6] sm:$0xff] }
 0x293   :  { %2040 = vmatmul.mubr.msk.f32.vlgmr.msra.gmra.mrb[12].mxu0 %vm199_vm0, %v2038_v10  ;;  %2042 = vmatmul.mubr.msk.f32.vlgmr.msra.gmra.mrb[12].mxu1 %vm199_vm0, %v2038_v10  ;;  %v1751_v28 = vld [vmem:[#allocation6 + $0x20] sm:$0xff] }
 0x294   :  { %2319 = vmatpush1.bf16.msra.mxu0 %v2904_v36  ;;  %2351 = vmatpush1.bf16.msra.mxu1 %v2908_v40  ;;  %v3382_v36 = vld [vmem:[#allocation14_spill] sm:$0xff]  ;;  %v3383_v40 = vld [vmem:[#allocation13_spill] sm:$0xff] }
 0x295   :  { %2321 = vmatprep.subr.bf16.mxu0 %v2910_v41  ;;  %2353 = vmatprep.subr.bf16.mxu1 %v2913_v45  ;;  %vm1732_vm11 = vcmp.eq.s32.totalorder %v3382_v36, 4  ;;  %vm1731_vm12 = vcmp.eq.s32.totalorder %v3383_v40, 4  ;;  %v3384_v41 = vmov 0   ;;  %v1749_v40 = vld [vmem:[#allocation6 + $0x10] sm:$0xff] }
 0x296   :  { %1437 = vmatprep.mubr.f32.mxu0 %v3379_v17  ;;  %1514 = vmatprep.mubr.f32.mxu1 %v3379_v17  ;;  %v1734_v45 = vsel %vm1732_vm11, 1, %v3384_v41 }
 0x297   :  { %2041 = vmatmul.mubr.msk.f32.gmra.mrb[14].mxu0 %vm199_vm0, %v2039_v14  ;;  %2043 = vmatmul.mubr.msk.f32.gmra.mrb[14].mxu1 %vm199_vm0, %v2039_v14 }
 0x298   :  { %2323 = vmatpush1.bf16.msra.mxu0 %v2918_v52  ;;  %2355 = vmatpush1.bf16.msra.mxu1 %v2922_v54  ;;  %v1733_v52 = vsel %vm1731_vm12, 1, %v3384_v41  ;;  %v1753_v41 = vld [vmem:[#allocation6 + $0x30] sm:$0xff] }
 0x299   :  { %2325 = vmatprep.subr.bf16.mxu0 %v2924_v55  ;;  %2357 = vmatprep.subr.bf16.mxu1 %v2927_v59  ;;  %v3385_v59 = vld [vmem:[#allocation16_spill] sm:$0xff] }
 0x29a   :  { %1585 = vmatprep.mubr.f32.mxu0 %v3379_v17  ;;  %1662 = vmatprep.mubr.f32.mxu1 %v3379_v17 }
 0x29b   :  { %1739 = vperm.xlu1 %2470, %v1734_v45   ;;  %1736 = vperm.xlu0 %2469, %v1733_v52   ;;  %v2382_v52 = vpack.c.bf16 %v1751_v28, %v1747_v27 }
 0x29c   :  { %2327 = vmatpush1.bf16.msra.mxu0 %v2932_v3  ;;  %2359 = vmatpush1.bf16.msra.mxu1 %v2936_v4 }
 0x29d   :  { %2329 = vmatprep.subr.bf16.mxu0 %v2938_v6  ;;  %2361 = vmatprep.subr.bf16.mxu1 %v2941_v12 }
 0x2a0   :  { %2331 = vmatpush1.bf16.msra.mxu0 %v2944_v21  ;;  %2363 = vmatpush1.bf16.msra.mxu1 %v2948_v22 }
 0x2a1   :  { %2333 = vmatprep.subr.bf16.mxu0 %v2950_v24  ;;  %2365 = vmatprep.subr.bf16.mxu1 %v2953_v30 }
 0x2a4   :  { %2335 = vmatpush1.bf16.msra.mxu0 %v2956_v38  ;;  %2367 = vmatpush1.bf16.msra.mxu1 %v2963_v43 }
 0x2a5   :  { %2337 = vmatprep.subr.bf16.mxu0 %v2965_v44  ;;  %2369 = vmatprep.subr.bf16.mxu1 %v2968_v49 }
 0x2a8   :  { %2339 = vmatpush1.bf16.msra.mxu0 %v2984_v60  ;;  %2371 = vmatpush1.bf16.msra.mxu1 %v2991_v61 }
 0x2a9   :  { %2341 = vmatprep.subr.bf16.mxu0 %v2993_v62  ;;  %2373 = vmatprep.subr.bf16.mxu1 %v2997_v11 }
 0x2ac   :  { %2343 = vmatpush1.bf16.msra.mxu0 %v3003_v26  ;;  %2375 = vmatpush1.bf16.msra.mxu1 %v3007_v29 }
 0x2ad   :  { %2345 = vmatprep.subr.bf16.mxu0 %v3009_v31  ;;  %2377 = vmatprep.subr.bf16.mxu1 %v3012_v35 }
 0x2b0   :  { %2347 = vmatpush1.bf16.msra.mxu0 %v3015_v42  ;;  %2379 = vmatpush1.bf16.msra.mxu1 %v3019_v46 }
 0x2b1   :  { %2381 = vmatprep.subr.bf16.mxu0 %v2380_v23  ;;  %2389 = vmatprep.subr.bf16.mxu1 %v2388_v32  ;;  %v1350_v23 = vpop.permute.xlu0 %1349  ;;  %v1760_v32 = vld [vmem:[#allocation6 + $0x68] sm:$0xff] }
 0x2b2   :  { %vm1354_vm13 = vcmp.eq.s32.totalorder %v1350_v23, 1 }
 0x35d   :  { %v1200_v54 = vpop.f32.mrb[8].mxu0  ;;  %v1277_v55 = vpop.f32.mrb[8].mxu1 }
 0x35e   :  { %v2412_v3 = vadd.f32 %v1200_v54, %v3385_v59  ;;  %v1202_v4 = vpop.f32.mrb[9].mxu0  ;;  %v1279_v6 = vpop.f32.mrb[9].mxu1  ;;  %v2416_v62 = vadd.f32 %v1277_v55, %v3109_v39 }
 0x35f   :  { %v2413_v12 = vadd.f32 %v1202_v4, %v3102_v13  ;;  %v2417_v11 = vadd.f32 %v1279_v6, %v3117_v16  ;;  %v1353_v55 = vpop.permute.xlu1 %1352  ;;  %v1759_v4 = vld [vmem:[#allocation6 + $0x60] sm:$0xff]  ;;  %v2390_v6 = vpack.c.bf16 %v1753_v41, %v1749_v40 }
 0x360   :  { %v2032_v21 = vmul.f32 -1.442695, %v2412_v3  ;;  %v2034_v26 = vmul.f32 -1.442695, %v2416_v62  ;;  %vm1355_vm14 = vcmp.eq.s32.totalorder %v1353_v55, 1  ;;  %v1745_v62 = vld [vmem:[%s3351_s1] sm:$0xff] }
 0x361   :  { %v2033_v22 = vmul.f32 -1.442695, %v2413_v12  ;;  %v1206_v24 = vpop.f32.mrb[10].mxu0  ;;  %v1283_v30 = vpop.f32.mrb[10].mxu1  ;;  %v1758_v12 = vld [vmem:[#allocation6 + $0x58] sm:$0xff] }
 0x362   :  { %2535 = vpow2.f32 %v2032_v21  ;;  %v2414_v38 = vadd.f32 %v1206_v24, %v3385_v59  ;;  %v1208_v43 = vpop.f32.mrb[11].mxu0  ;;  %v1285_v44 = vpop.f32.mrb[11].mxu1  ;;  %v2418_v29 = vadd.f32 %v1283_v30, %v3109_v39  ;;  %v1762_v21 = vld [vmem:[#allocation6 + $0x78] sm:$0xff]  ;;  %v1757_v30 = vld [vmem:[#allocation6 + $0x50] sm:$0xff] }
 0x363   :  { %v2415_v49 = vadd.f32 %v1208_v43, %v3102_v13  ;;  %2537 = vpow2.f32 %v2033_v22  ;;  %v2419_v35 = vadd.f32 %v1285_v44, %v3117_v16 }
 0x364   :  { %v2035_v60 = vmul.f32 -1.442695, %v2414_v38  ;;  %v2037_v50 = vmul.f32 -1.442695, %v2418_v29  ;;  %v1761_v38 = vld [vmem:[#allocation6 + $0x70] sm:$0xff] }
 0x365   :  { %v2036_v61 = vmul.f32 -1.442695, %v2415_v49 }
 0x366   :  { %2539 = vpow2.f32 %v2035_v60  ;;  %v2392_v60 = vpack.c.bf16 %v1762_v21, %v1758_v12 }
 0x367   :  { %2541 = vpow2.f32 %v2036_v61  ;;  %v2394_v61 = vpack.c.bf16 %v1761_v38, %v1757_v30 }
 0x368   :  { %2543 = vtanh.f32 %v2417_v11 }
 0x369   :  { %2545 = vpow2.f32 %v2034_v26 }
 0x36c   :  { %v2536_v31 = vpop.eup %2535 }
 0x36d   :  { %v1314_v42 = vadd.f32 1.0, %v2536_v31  ;;  %v2538_v46 = vpop.eup %2537 }
 0x36e   :  { %v1315_v8 = vadd.f32 1.0, %v2538_v46  ;;  %v1763_v46 = vld [vmem:[#allocation7] sm:$0xf] }
 0x36f   :  { %2547 = vrcp.f32 %v1314_v42 }
 0x370   :  { %v2540_v1 = vpop.eup %2539  ;;  %2549 = vtanh.f32 %v2419_v35 }
 0x371   :  { %2551 = vrcp.f32 %v1315_v8  ;;  %v1317_v9 = vadd.f32 1.0, %v2540_v1  ;;  %v2542_v33 = vpop.eup %2541 }
 0x372   :  { %2553 = vpow2.f32 %v2037_v50  ;;  %v1318_v0 = vadd.f32 1.0, %v2542_v33  ;;  %v2544_v37 = vpop.eup %2543 }
 0x373   :  { %2555 = vrcp.f32 %v1317_v9  ;;  %v2546_v2 = vpop.eup %2545 }
 0x374   :  { %2557 = vrcp.f32 %v1318_v0  ;;  %v1316_v57 = vadd.f32 1.0, %v2546_v2  ;;  %v3386_v2 = vld [vmem:[#allocation15_spill] sm:$0xff] }
 0x375   :  { %v3390_v12 = vsub.s32 3, %v3386_v2 }
 0x376   :  { %2559 = vrcp.f32 %v1316_v57  ;;  %v3388_v57 = vsub.s32 1, %v3386_v2 }
 0x379   :  { %v2548_v34 = vpop.eup %2547 }
 0x37a   :  { %v2550_v56 = vpop.eup %2549  ;;  %v1336_v48 = vmul.f32 %v2548_v34, %v2544_v37  ;;  %v3387_v34 = vsub.s32 0, %v3386_v2 }
 0x37b   :  { %v2552_v63 = vpop.eup %2551 }
 0x37c   :  { %v2554_v58 = vpop.eup %2553  ;;  %v1334_v53 = vmul.f32 %v2552_v63, %v3207_v7  ;;  %v1756_v7 = vld [vmem:[#allocation6 + $0x48] sm:$0xff] }
 0x37d   :  { %v2556_v20 = vpop.eup %2555  ;;  %v1319_v14 = vadd.f32 1.0, %v2554_v58  ;;  %v2384_v3 = vpack.c.bf16 %v1760_v32, %v1756_v7  ;;  %v1772_v58 = vrot.slane %v1763_v46, %v3388_v57 }
 0x37e   :  { %v3289_v51 = vadd.f32 %v1336_v48, %v1334_v53  ;;  %v1337_v5 = vmul.f32 %v2556_v20, %v2550_v56  ;;  %v2558_v10 = vpop.eup %2557  ;;  %v1768_v56 = vrot.slane %v1763_v46, %v3387_v34  ;;  %v3389_v20 = vsub.s32 2, %v3386_v2 }
 0x37f   :  { %v1335_v18 = vmul.f32 %v2558_v10, %v3211_v47  ;;  %v1755_v47 = vld [vmem:[#allocation6 + $0x40] sm:$0xff] }
 0x380   :  { %2561 = vtanh.f32 %v3289_v51  ;;  %v2560_v36 = vpop.eup %2559  ;;  %v2386_v44 = vpack.c.bf16 %v1759_v4, %v1755_v47 }
 0x381   :  { %v3293_v19 = vadd.f32 %v1337_v5, %v1335_v18  ;;  %2563 = vrcp.f32 %v1319_v14  ;;  %v1776_v5 = vrot.slane %v1763_v46, %v3389_v20 }
 0x383   :  { %2565 = vtanh.f32 %v3293_v19 }
 0x38a   :  { %v2562_v45 = vpop.eup %2561 }
 0x38b   :  { %v1342_v54 = vmul.f32 %v2562_v45, %v2560_v36  ;;  %v2564_v22 = vpop.eup %2563 }
 0x38d   :  { %v3297_v24 = vsel %vm1354_vm13, %v1342_v54, %v3215_v15  ;;  %1586 = vmatmul.mubr.f32.vlgmr.msra.gmra.mrb[12].mxu0 %v1342_v54  ;;  %1663 = vmatmul.mubr.f32.vlgmr.msra.gmra.mrb[12].mxu1 %v1342_v54  ;;  %v2566_v43 = vpop.eup %2565 }
 0x38e   :  { %2383 = vmatpush1.bf16.msra.mxu0 %v2382_v52  ;;  %1591 = vmatprep.mubr.f32.mxu0 %v3379_v17  ;;  %v1343_v49 = vmul.f32 %v2566_v43, %v2564_v22 }
 0x38f   :  { %1668 = vmatprep.mubr.f32.mxu1 %v3379_v17  ;;  %2385 = vmatprep.subr.bf16.mxu0 %v2384_v3 }
 0x390   :  { %2391 = vmatpush1.bf16.msra.mxu1 %v2390_v6  ;;  %v3302_v15 = vsel %vm1355_vm14, %v1343_v49, %v3224_v25  ;;  %v1746_v25 = vld [vmem:[%s3351_s1 + $0x8] sm:$0xff] }
 0x391   :  { %1592 = vmatmul.mubr.f32.gmra.mrb[14].mxu0 %v1343_v49  ;;  %1669 = vmatmul.mubr.f32.gmra.mrb[14].mxu1 %v1343_v49 }
 0x392   :  { %2387 = vmatpush1.bf16.msra.mxu0 %v2386_v44  ;;  %1855 = vmatprep.mubr.f32.mxu0 %v3379_v17 }
 0x393   :  { %2393 = vmatprep.subr.bf16.mxu1 %v2392_v60  ;;  %1932 = vmatprep.mubr.f32.mxu1 %v3379_v17 }
 0x394   :  { %2395 = vmatpush1.bf16.msra.mxu1 %v2394_v61 }
 0x395   :  { %2050 = vmatmul.mubr.msk.f32.vlgmr.msra.gmra.mrb[16].mxu0 %vm199_vm0, %v1745_v62 }
 0x396   :  { %1861 = vmatprep.mubr.f32.mxu0 %v3379_v17 }
 0x397   :  { %2052 = vmatmul.mubr.msk.f32.vlgmr.msra.gmra.mrb[16].mxu1 %vm199_vm0, %v1745_v62 }
 0x398   :  { %1938 = vmatprep.mubr.f32.mxu1 %v3379_v17 }
 0x399   :  { %2051 = vmatmul.mubr.msk.f32.gmra.mrb[18].mxu0 %vm199_vm0, %v1746_v25 }
 0x39b   :  { %2053 = vmatmul.mubr.msk.f32.gmra.mrb[18].mxu1 %vm199_vm0, %v1746_v25 }
 0x460   :  { %v1587_v11 = vpop.f32.mrb[12].mxu0  ;;  %v1664_v26 = vpop.f32.mrb[12].mxu1 }
 0x461   :  { %v2420_v29 = vadd.f32 %v1587_v11, %v3385_v59  ;;  %v1589_v31 = vpop.f32.mrb[13].mxu0  ;;  %v1666_v35 = vpop.f32.mrb[13].mxu1  ;;  %v2424_v8 = vadd.f32 %v1664_v26, %v3109_v39 }
 0x462   :  { %v2421_v42 = vadd.f32 %v1589_v31, %v3102_v13  ;;  %v2425_v48 = vadd.f32 %v1666_v35, %v3117_v16 }
 0x463   :  { %v2044_v50 = vmul.f32 -1.442695, %v2420_v29  ;;  %v2046_v10 = vmul.f32 -1.442695, %v2424_v8 }
 0x464   :  { %v2045_v1 = vmul.f32 -1.442695, %v2421_v42  ;;  %v1593_v9 = vpop.f32.mrb[14].mxu0  ;;  %v1670_v33 = vpop.f32.mrb[14].mxu1 }
 0x465   :  { %2567 = vpow2.f32 %v2044_v50  ;;  %v2422_v17 = vadd.f32 %v1593_v9, %v3385_v59  ;;  %v1595_v0 = vpop.f32.mrb[15].mxu0  ;;  %v1672_v37 = vpop.f32.mrb[15].mxu1  ;;  %v2426_v59 = vadd.f32 %v1670_v33, %v3109_v39 }
 0x466   :  { %v2423_v63 = vadd.f32 %v1595_v0, %v3102_v13  ;;  %2569 = vpow2.f32 %v2045_v1  ;;  %v2427_v13 = vadd.f32 %v1672_v37, %v3117_v16  ;;  %v1780_v16 = vrot.slane %v1763_v46, %v3390_v12 }
 0x467   :  { %v2047_v53 = vmul.f32 -1.442695, %v2422_v17  ;;  %v2049_v41 = vmul.f32 -1.442695, %v2426_v59 }
 0x468   :  { %v2048_v14 = vmul.f32 -1.442695, %v2423_v63  ;;  %v1857_v18 = vpop.f32.mrb[16].mxu0 }
 0x469   :  { %2571 = vpow2.f32 %v2047_v53  ;;  %v1858_v23 = vadd.f32 %v1857_v18, %v1768_v56  ;;  %v1859_v27 = vpop.f32.mrb[17].mxu0 }
 0x46a   :  { %2573 = vtanh.f32 %v2425_v48  ;;  %v1860_v28 = vadd.f32 %v1859_v27, %v1772_v58  ;;  %v1934_v7 = vpop.f32.mrb[16].mxu1 }
 0x46b   :  { %2575 = vpow2.f32 %v2048_v14  ;;  %v2054_v32 = vmul.f32 -1.442695, %v1858_v23  ;;  %v1935_v36 = vadd.f32 %v1934_v7, %v1776_v5  ;;  %v1936_v40 = vpop.f32.mrb[17].mxu1 }
 0x46c   :  { %2577 = vpow2.f32 %v2046_v10  ;;  %v2055_v45 = vmul.f32 -1.442695, %v1860_v28  ;;  %v1863_v52 = vpop.f32.mrb[18].mxu0  ;;  %v1937_v49 = vadd.f32 %v1936_v40, %v1780_v16 }
 0x46d   :  { %2579 = vpow2.f32 %v2054_v32  ;;  %v1864_v39 = vadd.f32 %v1863_v52, %v1768_v56  ;;  %v1865_v54 = vpop.f32.mrb[19].mxu0  ;;  %v2056_v6 = vmul.f32 -1.442695, %v1935_v36 }
 0x46e   :  { %2581 = vpow2.f32 %v2055_v45  ;;  %v1866_v55 = vadd.f32 %v1865_v54, %v1772_v58  ;;  %v1940_v3 = vpop.f32.mrb[18].mxu1 }
 0x46f   :  { %v2568_v47 = vpop.eup %2567  ;;  %2583 = vtanh.f32 %v2427_v13  ;;  %v2057_v4 = vmul.f32 -1.442695, %v1864_v39  ;;  %v1942_v21 = vpop.f32.mrb[19].mxu1  ;;  %v1941_v62 = vadd.f32 %v1940_v3, %v1776_v5 }
 0x470   :  { %v1701_v22 = vadd.f32 1.0, %v2568_v47  ;;  %2585 = vpow2.f32 %v2049_v41  ;;  %v2570_v30 = vpop.eup %2569  ;;  %v2058_v38 = vmul.f32 -1.442695, %v1866_v55  ;;  %v1943_v8 = vadd.f32 %v1942_v21, %v1780_v16  ;;  %v1737_v41 = vpop.permute.xlu0 %1736 }
 0x471   :  { %2587 = vpow2.f32 %v2057_v4  ;;  %v1702_v43 = vadd.f32 1.0, %v2570_v30  ;;  %v2059_v42 = vmul.f32 -1.442695, %v1941_v62  ;;  %vm1741_vm15 = vcmp.eq.s32.totalorder %v1737_v41, 1  ;;  %v1740_v4 = vpop.permute.xlu1 %1739 }
 0x472   :  { %2589 = vrcp.f32 %v1701_v22  ;;  %vm1742_vm0 = vcmp.eq.s32.totalorder %v1740_v4, 1 }
 0x473   :  { %v2572_v44 = vpop.eup %2571  ;;  %2591 = vpow2.f32 %v2056_v6 }
 0x474   :  { %v2574_v60 = vpop.eup %2573  ;;  %2593 = vrcp.f32 %v1702_v43  ;;  %v1704_v61 = vadd.f32 1.0, %v2572_v44 }
 0x475   :  { %v2576_v25 = vpop.eup %2575  ;;  %2595 = vpow2.f32 %v2058_v38 }
 0x476   :  { %v2578_v11 = vpop.eup %2577  ;;  %2597 = vrcp.f32 %v1704_v61  ;;  %v1705_v26 = vadd.f32 1.0, %v2576_v25 }
 0x477   :  { %v2580_v29 = vpop.eup %2579  ;;  %2599 = vtanh.f32 %v1937_v49  ;;  %v1703_v37 = vadd.f32 1.0, %v2578_v11 }
 0x478   :  { %v2582_v31 = vpop.eup %2581  ;;  %2601 = vrcp.f32 %v1705_v26  ;;  %v1963_v35 = vadd.f32 1.0, %v2580_v29 }
 0x479   :  { %v2584_v46 = vpop.eup %2583  ;;  %v1964_v50 = vadd.f32 1.0, %v2582_v31 }
 0x47a   :  { %v2586_v1 = vpop.eup %2585  ;;  %2603 = vrcp.f32 %v1963_v35 }
 0x47b   :  { %v2588_v9 = vpop.eup %2587  ;;  %2605 = vrcp.f32 %v1964_v50  ;;  %v1706_v10 = vadd.f32 1.0, %v2586_v1 }
 0x47c   :  { %v2590_v33 = vpop.eup %2589  ;;  %v1966_v17 = vadd.f32 1.0, %v2588_v9  ;;  %2607 = vpow2.f32 %v2059_v42 }
 0x47d   :  { %v2592_v0 = vpop.eup %2591  ;;  %v1723_v2 = vmul.f32 %v2590_v33, %v2574_v60  ;;  %2609 = vtanh.f32 %v1943_v8 }
 0x47e   :  { %v2594_v34 = vpop.eup %2593  ;;  %2611 = vrcp.f32 %v1966_v17  ;;  %v1965_v18 = vadd.f32 1.0, %v2592_v0 }
 0x47f   :  { %v2596_v56 = vpop.eup %2595  ;;  %v1721_v48 = vmul.f32 %v2594_v34, %v3289_v51  ;;  %2613 = vrcp.f32 %v1703_v37 }
 0x480   :  { %v2598_v63 = vpop.eup %2597  ;;  %v1967_v57 = vadd.f32 1.0, %v2596_v56 }
 0x481   :  { %v2600_v58 = vpop.eup %2599  ;;  %v1725_v53 = vadd.f32 %v1723_v2, %v1721_v48  ;;  %v1724_v20 = vmul.f32 %v2598_v63, %v2584_v46 }
 0x482   :  { %v2602_v5 = vpop.eup %2601  ;;  %2615 = vrcp.f32 %v1967_v57 }
 0x483   :  { %2617 = vtanh.f32 %v1725_v53  ;;  %v1722_v59 = vmul.f32 %v2602_v5, %v3293_v19 }
 0x484   :  { %v2604_v14 = vpop.eup %2603  ;;  %2619 = vrcp.f32 %v1706_v10 }
 0x485   :  { %v2606_v23 = vpop.eup %2605  ;;  %v1726_v27 = vadd.f32 %v1724_v20, %v1722_v59  ;;  %v1985_v28 = vmul.f32 %v2604_v14, %v2600_v58 }
 0x486   :  { %v2608_v7 = vpop.eup %2607  ;;  %v1983_v51 = vmul.f32 0.0, %v2606_v23 }
 0x487   :  { %v2610_v13 = vpop.eup %2609  ;;  %2621 = vtanh.f32 %v1726_v27  ;;  %v1968_v52 = vadd.f32 1.0, %v2608_v7 }
 0x488   :  { %v2612_v32 = vpop.eup %2611  ;;  %2623 = vrcp.f32 %v1965_v18  ;;  %v1987_v36 = vadd.f32 %v1985_v28, %v1983_v51 }
 0x489   :  { %v1986_v40 = vmul.f32 %v2612_v32, %v2610_v13  ;;  %v2614_v45 = vpop.eup %2613 }
 0x48a   :  { %2625 = vtanh.f32 %v1987_v36 }
 0x48b   :  { %2627 = vrcp.f32 %v1968_v52 }
 0x48c   :  { %v2616_v39 = vpop.eup %2615 }
 0x48d   :  { %v2618_v19 = vpop.eup %2617  ;;  %v1984_v54 = vmul.f32 0.0, %v2616_v39 }
 0x48e   :  { %v1729_v55 = vmul.f32 %v2618_v19, %v2614_v45  ;;  %v2620_v47 = vpop.eup %2619 }
 0x48f   :  { %v1988_v3 = vadd.f32 %v1986_v40, %v1984_v54 }
 0x490   :  { %v1743_v6 = vsel %vm1741_vm15, %v1729_v55, %v3297_v24 }
 0x491   :  { %v2622_v12 = vpop.eup %2621  ;;  %2629 = vtanh.f32 %v1988_v3  ;;  %1993 = vst [vmem:[%s3358_s8] sm:$0xff] %v1743_v6 }
 0x492   :  { %v2624_v16 = vpop.eup %2623  ;;  %v1730_v21 = vmul.f32 %v2622_v12, %v2620_v47 }
 0x494   :  { %v2626_v22 = vpop.eup %2625  ;;  %v1744_v30 = vsel %vm1742_vm0, %v1730_v21, %v3302_v15 }
 0x495   :  { %v1991_v38 = vmul.f32 %v2626_v22, %v2624_v16  ;;  %1994 = vst [vmem:[%s3358_s8 + $0x10] sm:$0xff] %v1744_v30  ;;  %v2628_v24 = vpop.eup %2627 }
 0x497   :  { %1995 = vst [vmem:[%s3358_s8 + $0x8] sm:$0xff] %v1991_v38 }
 0x49b   :  { %v2630_v43 = vpop.eup %2629 }
 0x49c   :  { %v1992_v44 = vmul.f32 %v2630_v43, %v2628_v24 }
 0x49e   :  { %1996 = vst [vmem:[%s3358_s8 + $0x18] sm:$0xff] %v1992_v44 }
 0x49f   :  { %2001 = vsyncpa [#allocation3], 1 }
 0x4a0   :  { %2002 = vsyncpa [#allocation5], 1 }
 0x4a1   :  { %2003 = vsyncpa [#allocation8], 1 }

// kernel: _forward_core.3
= control target key start
LH: loop header
LB: loop body
LE: loop exit
PB: predicated region body
PF: predicated region fallthrough
CT: control target
= control target key end

     0   :  { %15 = vsyncpa [#allocation3], 0  ;;  %s4280_s0 = inlined_call_operand.vmem [shape: f32[16,32], index: 0, kind: input, shape index: {}]   ;;  %s4281_s1 = inlined_call_operand.hbm [shape: bf16[6,16,16], index: 1, kind: input, shape index: {}]   ;;  %s4282_s2 = inlined_call_operand.hbm [shape: f32[32,128], index: 2, kind: input, shape index: {}]   ;;  %s4283_s3 = inlined_call_operand.hbm [shape: f32[1,128], index: 3, kind: input, shape index: {}]   ;;  %s4284_s4 = inlined_call_operand.hbm [shape: f32[3,128,768], index: 4, kind: input, shape index: {}]   ;;  %s4285_s5 = inlined_call_operand.hbm [shape: f32[3,1,128], index: 5, kind: input, shape index: {}]   ;;  %s4286_s6 = inlined_call_operand.hbm [shape: f32[128,128], index: 6, kind: input, shape index: {}]   ;;  %s4287_s7 = inlined_call_operand.hbm [shape: f32[1,128], index: 7, kind: input, shape index: {}]   ;;  %s4288_s8 = inlined_call_operand.hbm [shape: f32[32,128], index: 8, kind: input, shape index: {}]   ;;  %s4289_s9 = inlined_call_operand.hbm [shape: f32[1,128], index: 9, kind: input, shape index: {}]   ;;  %s4290_s10 = inlined_call_operand.vmem [shape: f32[16,128], index: 10, kind: output, shape index: {}]  }
   0x1   :  { %16 = vsyncpa [#allocation5], 0 }
   0x2   :  { %17 = vsyncpa [#allocation8], 0 }
   0x3   :  { %18 = vsyncpa [#allocation11], 0 }
   0x4   :  { %19 = vsyncpa [#allocation14], 0  ;;  %s3928_s13 = smov [#allocation4]   ;;  %s3720_s17 = scalar_lea.hbm %s4282_s2, 512 }
   0x5   :  { %s39_s14 = sshll.u32 %s3928_s13, 4  ;;  %p3721_p0 = scmp.ne.s32.totalorder %s4282_s2, %s3720_s17  ;;  %s40_s14 = int_to_ptr.vmem [resolvable:$true] %s39_s14 }
   0x6   :  { %p3724_p1 = scmp.lt.u32.totalorder %s3720_s17, %s4282_s2 }
   0x8   :  { %p3726_p2 = pnand %p3724_p1, %p3721_p0 }
   0xa   :  { %3729 = shalt.err (!%p3726_p2)
}
   0xb   :  { %s3730_s22 = scalar_lea.vmem %s40_s14, 512  ;;  %p3735_p4 = scmp.lt.s32.totalorder %s40_s14, %s40_s14 }
   0xc   :  { %p3731_p3 = scmp.ne.s32.totalorder %s40_s14, %s3730_s22  ;;  %p3736_p5 = scmp.lt.s32.totalorder %s3730_s22, %s3730_s22 }
   0xe   :  { %p3737_p6 = por %p3736_p5, %p3735_p4 }
  0x10   :  { %p3738_p7 = pnand %p3737_p6, %p3731_p3 }
  0x12   :  { %3741 = shalt.err (!%p3738_p7)
}
  0x13   :  { %s3929_s23 = smov 128   ;;  %s3930_s24 = smov 8  }
  0x14   :  { %45 = dma.hbm_to_vmem [thread:$0]  %s4282_s2, 512, %s40_s14, [#allocation5], %s3929_s23, %s3929_s23, %s3930_s24  }
  0x15   :  { %s3931_s27 = smov [#allocation7]   ;;  %s3742_s11 = scalar_lea.hbm %s4284_s4, 36864 }
  0x16   :  { %s61_s28 = sshll.u32 %s3931_s27, 4  ;;  %p3743_p8 = scmp.ne.s32.totalorder %s4284_s4, %s3742_s11  ;;  %s62_s28 = int_to_ptr.vmem [resolvable:$true] %s61_s28 }
  0x17   :  { %p3746_p9 = scmp.lt.u32.totalorder %s3742_s11, %s4284_s4 }
  0x19   :  { %p3748_p10 = pnand %p3746_p9, %p3743_p8 }
  0x1b   :  { %3751 = shalt.err (!%p3748_p10)
}
  0x1c   :  { %s3752_s17 = scalar_lea.vmem %s62_s28, 36864  ;;  %p3757_p12 = scmp.lt.s32.totalorder %s62_s28, %s62_s28 }
  0x1d   :  { %p3753_p11 = scmp.ne.s32.totalorder %s62_s28, %s3752_s17  ;;  %p3758_p13 = scmp.lt.s32.totalorder %s3752_s17, %s3752_s17 }
  0x1f   :  { %p3759_p0 = por %p3758_p13, %p3757_p12 }
  0x21   :  { %p3760_p1 = pnand %p3759_p0, %p3753_p11 }
  0x23   :  { %3763 = shalt.err (!%p3760_p1)
}
  0x24   :  { %s3932_s2 = smov 768   ;;  %s3933_s14 = smov 48  }
  0x25   :  { %67 = dma.hbm_to_vmem [thread:$0]  %s4284_s4, 36864, %s62_s28, [#allocation8], %s3932_s2, %s3932_s2, %s3933_s14  }
  0x26   :  { %s3934_s20 = smov [#allocation10]   ;;  %s3935_s22 = smov [#allocation13]  }
  0x27   :  { %s85_s21 = sshll.u32 %s3934_s20, 4  ;;  %s107_s25 = sshll.u32 %s3935_s22, 4  ;;  %s86_s21 = int_to_ptr.vmem [resolvable:$true] %s85_s21  ;;  %s4028_s25 = int_to_ptr.vmem [resolvable:$true] %s107_s25 }
  0x28   :  { %s3764_s29 = scalar_lea.hbm %s4286_s6, 2048 }
  0x29   :  { %p3765_p2 = scmp.ne.s32.totalorder %s4286_s6, %s3764_s29  ;;  %p3768_p3 = scmp.lt.u32.totalorder %s3764_s29, %s4286_s6 }
  0x2b   :  { %p3770_p4 = pnand %p3768_p3, %p3765_p2 }
  0x2d   :  { %3773 = shalt.err (!%p3770_p4)
}
  0x2e   :  { %s3774_s4 = scalar_lea.vmem %s86_s21, 2048  ;;  %p3779_p6 = scmp.lt.s32.totalorder %s86_s21, %s86_s21 }
  0x2f   :  { %p3775_p5 = scmp.ne.s32.totalorder %s86_s21, %s3774_s4  ;;  %p3780_p7 = scmp.lt.s32.totalorder %s3774_s4, %s3774_s4 }
  0x31   :  { %p3781_p8 = por %p3780_p7, %p3779_p6 }
  0x33   :  { %p3782_p9 = pnand %p3781_p8, %p3775_p5 }
  0x35   :  { %3785 = shalt.err (!%p3782_p9)
}
  0x36   :  { %91 = dma.hbm_to_vmem [thread:$0]  %s4286_s6, 2048, %s86_s21, [#allocation11], %s3929_s23, %s3929_s23, %s3930_s24  }
  0x37   :  { %s3786_s2 = scalar_lea.hbm %s4288_s8, 512 }
  0x38   :  { %p3787_p10 = scmp.ne.s32.totalorder %s4288_s8, %s3786_s2  ;;  %p3790_p11 = scmp.lt.u32.totalorder %s3786_s2, %s4288_s8 }
  0x3a   :  { %p3792_p12 = pnand %p3790_p11, %p3787_p10 }
  0x3c   :  { %3795 = shalt.err (!%p3792_p12)
}
  0x3d   :  { %s3796_s22 = scalar_lea.vmem %s4028_s25, 512  ;;  %p3801_p0 = scmp.lt.s32.totalorder %s4028_s25, %s4028_s25 }
  0x3e   :  { %p3797_p13 = scmp.ne.s32.totalorder %s4028_s25, %s3796_s22  ;;  %p3802_p1 = scmp.lt.s32.totalorder %s3796_s22, %s3796_s22 }
  0x40   :  { %p3803_p2 = por %p3802_p1, %p3801_p0 }
  0x42   :  { %p3804_p3 = pnand %p3803_p2, %p3797_p13 }
  0x44   :  { %3807 = shalt.err (!%p3804_p3)
}
  0x45   :  { %113 = dma.hbm_to_vmem [thread:$0]  %s4288_s8, 512, %s4028_s25, [#allocation14], %s3929_s23, %s3929_s23, %s3930_s24  }
  0x46   :  { %s3936_s26 = smov [#allocation2]   ;;  %s3808_s11 = scalar_lea.hbm %s4281_s1, 768 }
  0x47   :  { %s27_s27 = sshll.u32 %s3936_s26, 4  ;;  %p3809_p4 = scmp.ne.s32.totalorder %s4281_s1, %s3808_s11  ;;  %s28_s27 = int_to_ptr.vmem [resolvable:$true] %s27_s27 }
  0x48   :  { %p3812_p5 = scmp.lt.u32.totalorder %s3808_s11, %s4281_s1 }
  0x4a   :  { %p3814_p6 = pnand %p3812_p5, %p3809_p4 }
  0x4c   :  { %3817 = shalt.err (!%p3814_p6)
}
  0x4d   :  { %s3818_s15 = scalar_lea.vmem %s28_s27, 768  ;;  %p3823_p8 = scmp.lt.s32.totalorder %s28_s27, %s28_s27 }
  0x4e   :  { %p3819_p7 = scmp.ne.s32.totalorder %s28_s27, %s3818_s15  ;;  %p3824_p9 = scmp.lt.s32.totalorder %s3818_s15, %s3818_s15 }
  0x50   :  { %p3825_p10 = por %p3824_p9, %p3823_p8 }
  0x52   :  { %p3826_p11 = pnand %p3825_p10, %p3819_p7 }
  0x54   :  { %3829 = shalt.err (!%p3826_p11)
}
  0x55   :  { %s3937_s8 = smov 64   ;;  %s3938_s23 = smov 4  }
  0x56   :  { %33 = dma.hbm_to_vmem [thread:$0]  %s4281_s1, 768, %s28_s27, [#allocation3], %s3937_s8, %s3937_s8, %s3938_s23  }
  0x57   :  { %s3939_s16 = smov [#allocation6]   ;;  %s3940_s2 = smov [#allocation9]  }
  0x58   :  { %s52_s17 = sshll.u32 %s3939_s16, 4  ;;  %s73_s14 = sshll.u32 %s3940_s2, 4  ;;  %s53_s17 = int_to_ptr.vmem [resolvable:$true] %s52_s17  ;;  %s74_s14 = int_to_ptr.vmem [resolvable:$true] %s73_s14 }
  0x59   :  { %s3830_s20 = scalar_lea.hbm %s4283_s3, 16 }
  0x5a   :  { %p3831_p12 = scmp.ne.s32.totalorder %s4283_s3, %s3830_s20  ;;  %p3834_p13 = scmp.lt.u32.totalorder %s3830_s20, %s4283_s3 }
  0x5c   :  { %p3836_p0 = pnand %p3834_p13, %p3831_p12 }
  0x5e   :  { %3839 = shalt.err (!%p3836_p0)
}
  0x5f   :  { %s3840_s1 = scalar_lea.vmem %s53_s17, 16  ;;  %s3844_s27 = scalar_lea.vmem %s53_s17, 32 }
  0x60   :  { %p3841_p1 = scmp.ne.s32.totalorder %s53_s17, %s3840_s1  ;;  %p3845_p2 = scmp.lt.s32.totalorder %s53_s17, %s53_s17 }
  0x61   :  { %p3846_p3 = scmp.lt.s32.totalorder %s3844_s27, %s3840_s1 }
  0x63   :  { %p3847_p4 = por %p3846_p3, %p3845_p2 }
  0x65   :  { %p3848_p5 = pnand %p3847_p4, %p3841_p1 }
  0x67   :  { %3851 = shalt.err (!%p3848_p5)
}
  0x68   :  { %55 = dma.hbm_to_vmem [thread:$0]  %s4283_s3, 16, %s53_s17, [#allocation5]  }
  0x69   :  { %s3852_s13 = scalar_lea.hbm %s4285_s5, 48 }
  0x6a   :  { %p3853_p6 = scmp.ne.s32.totalorder %s4285_s5, %s3852_s13  ;;  %p3856_p7 = scmp.lt.u32.totalorder %s3852_s13, %s4285_s5 }
  0x6c   :  { %p3858_p8 = pnand %p3856_p7, %p3853_p6 }
  0x6e   :  { %3861 = shalt.err (!%p3858_p8)
}
  0x6f   :  { %s3862_s23 = scalar_lea.vmem %s74_s14, 48  ;;  %s3866_s24 = scalar_lea.vmem %s74_s14, 64 }
  0x70   :  { %p3863_p9 = scmp.ne.s32.totalorder %s74_s14, %s3862_s23  ;;  %p3867_p10 = scmp.lt.s32.totalorder %s74_s14, %s74_s14 }
  0x71   :  { %p3868_p11 = scmp.lt.s32.totalorder %s3866_s24, %s3862_s23 }
  0x73   :  { %p3869_p12 = por %p3868_p11, %p3867_p10 }
  0x75   :  { %p3870_p13 = pnand %p3869_p12, %p3863_p9 }
  0x77   :  { %3873 = shalt.err (!%p3870_p13)
}
  0x78   :  { %s3941_s3 = smov 16   ;;  %s3942_s25 = smov 1  }
  0x79   :  { %79 = dma.hbm_to_vmem [thread:$0]  %s4285_s5, 48, %s74_s14, [#allocation8], %s3941_s3, %s3941_s3, %s3942_s25  }
  0x7a   :  { %s3943_s2 = smov [#allocation12]   ;;  %s3944_s19 = smov [#allocation15]  }
  0x7b   :  { %s98_s18 = sshll.u32 %s3943_s2, 4  ;;  %s120_s20 = sshll.u32 %s3944_s19, 4  ;;  %s99_s18 = int_to_ptr.vmem [resolvable:$true] %s98_s18  ;;  %s121_s20 = int_to_ptr.vmem [resolvable:$true] %s120_s20 }
  0x7c   :  { %s3874_s21 = scalar_lea.hbm %s4287_s7, 16 }
  0x7d   :  { %p3875_p0 = scmp.ne.s32.totalorder %s4287_s7, %s3874_s21  ;;  %p3878_p1 = scmp.lt.u32.totalorder %s3874_s21, %s4287_s7 }
  0x7f   :  { %p3880_p2 = pnand %p3878_p1, %p3875_p0 }
  0x81   :  { %3883 = shalt.err (!%p3880_p2)
}
  0x82   :  { %s3884_s5 = scalar_lea.vmem %s99_s18, 16  ;;  %s3888_s14 = scalar_lea.vmem %s99_s18, 32 }
  0x83   :  { %p3885_p3 = scmp.ne.s32.totalorder %s99_s18, %s3884_s5  ;;  %p3889_p4 = scmp.lt.s32.totalorder %s99_s18, %s99_s18 }
  0x84   :  { %p3890_p5 = scmp.lt.s32.totalorder %s3888_s14, %s3884_s5 }
  0x86   :  { %p3891_p6 = por %p3890_p5, %p3889_p4 }
  0x88   :  { %p3892_p7 = pnand %p3891_p6, %p3885_p3 }
  0x8a   :  { %3895 = shalt.err (!%p3892_p7)
}
  0x8b   :  { %101 = dma.hbm_to_vmem [thread:$0]  %s4287_s7, 16, %s99_s18, [#allocation11]  }
  0x8c   :  { %s3896_s4 = scalar_lea.hbm %s4289_s9, 16 }
  0x8d   :  { %p3897_p8 = scmp.ne.s32.totalorder %s4289_s9, %s3896_s4  ;;  %p3900_p9 = scmp.lt.u32.totalorder %s3896_s4, %s4289_s9 }
  0x8f   :  { %p3902_p10 = pnand %p3900_p9, %p3897_p8 }
  0x91   :  { %3905 = shalt.err (!%p3902_p10)
}
  0x92   :  { %s3906_s24 = scalar_lea.vmem %s121_s20, 16  ;;  %s3910_s3 = scalar_lea.vmem %s121_s20, 32 }
  0x93   :  { %p3907_p11 = scmp.ne.s32.totalorder %s121_s20, %s3906_s24  ;;  %p3911_p12 = scmp.lt.s32.totalorder %s121_s20, %s121_s20 }
  0x94   :  { %p3912_p13 = scmp.lt.s32.totalorder %s3910_s3, %s3906_s24 }
  0x96   :  { %p3913_p0 = por %p3912_p13, %p3911_p12 }
  0x98   :  { %p3914_p1 = pnand %p3913_p0, %p3907_p11 }
  0x9a   :  { %3917 = shalt.err (!%p3914_p1)
}
  0x9b   :  { %123 = dma.hbm_to_vmem [thread:$0]  %s4289_s9, 16, %s121_s20, [#allocation14]  }
  0x9c   :  { %3918 = dma.done.wait [#allocation3], 768  }
  0x9d   :  { %3919 = vsyncadd [#allocation3], 4294966528 }
  0x9e   :  { %3920 = dma.done.wait [#allocation5], 528  }
  0x9f   :  { %3921 = vsyncadd [#allocation5], 4294966768 }
  0xa0   :  { %3922 = dma.done.wait [#allocation8], 36912  }
  0xa1   :  { %3923 = vsyncadd [#allocation8], 4294930384 }
  0xa2   :  { %3924 = dma.done.wait [#allocation11], 2064  }
  0xa3   :  { %3925 = vsyncadd [#allocation11], 4294965232 }
  0xa4   :  { %3926 = dma.done.wait [#allocation14], 528  }
  0xa5   :  { %3927 = vsyncadd [#allocation14], 4294966768  ;;  %vm164_vm0 = vcmask 261120   ;;  %v153_v0 = vld [vmem:[#allocation4] sm:$0xff]  ;;  %v154_v1 = vld [vmem:[#allocation4 + $0x8] sm:$0xff]  ;;  %vm584_vm1 = vcmask 130048  }
  0xa6   :  { %v155_v2 = vld [vmem:[#allocation4 + $0x10] sm:$0xff]  ;;  %v3262_v3 = vpack.c.bf16 %v154_v1, %v153_v0  ;;  %v156_v4 = vld [vmem:[#allocation4 + $0x18] sm:$0xff]  ;;  %v248_v9 = vld [vmem:[#allocation7] sm:$0xff] }
  0xa7   :  { %v151_v5 = vld [vmem:[%s4280_s0] sm:$0xff]  ;;  %v3266_v6 = vpack.c.bf16 %v156_v4, %v155_v2  ;;  %v255_v8 = vld [vmem:[#allocation7 + $0x38] sm:$0xff]  ;;  %v256_v16 = vld [vmem:[#allocation7 + $0x40] sm:$0xff] }
  0xa8   :  { %3087 = vmatprep.mubr.msk.f32.mxu0 %vm164_vm0, %v151_v5  ;;  %v249_v7 = vld [vmem:[#allocation7 + $0x8] sm:$0xff]  ;;  %3263 = vmatprep.subr.bf16.mxu0 %v3262_v3  ;;  %v254_v11 = vld [vmem:[#allocation7 + $0x30] sm:$0xff]  ;;  %v251_v12 = vld [vmem:[#allocation7 + $0x18] sm:$0xff] }
  0xa9   :  { %v3270_v10 = vpack.c.bf16 %v255_v8, %v249_v7  ;;  %v257_v13 = vld [vmem:[#allocation7 + $0x48] sm:$0xff]  ;;  %3265 = vmatpush3.bf16.msra.mxu0 %v3262_v3  ;;  %v3272_v14 = vpack.c.bf16 %v254_v11, %v248_v9  ;;  %v250_v15 = vld [vmem:[#allocation7 + $0x10] sm:$0xff]  ;;  %v267_v19 = vld [vmem:[#allocation7 + $0x98] sm:$0xff] }
  0xaa   :  { %v261_v17 = vld [vmem:[#allocation7 + $0x68] sm:$0xff]  ;;  %3267 = vmatprep.subr.bf16.mxu0 %v3266_v6  ;;  %v3302_v18 = vpack.c.bf16 %v257_v13, %v251_v12  ;;  %v260_v20 = vld [vmem:[#allocation7 + $0x60] sm:$0xff]  ;;  %v266_v21 = vld [vmem:[#allocation7 + $0x90] sm:$0xff]  ;;  %v3304_v29 = vpack.c.bf16 %v256_v16, %v250_v15 }
  0xab   :  { %3271 = vmatprep.subr.bf16.mxu1 %v3270_v10  ;;  %v3274_v22 = vpack.c.bf16 %v267_v19, %v261_v17  ;;  %v3276_v23 = vpack.c.bf16 %v266_v21, %v260_v20  ;;  %v263_v24 = vld [vmem:[#allocation7 + $0x78] sm:$0xff]  ;;  %v269_v25 = vld [vmem:[#allocation7 + $0xa8] sm:$0xff]  ;;  %v272_v31 = vld [vmem:[#allocation7 + $0xc0] sm:$0xff] }
  0xac   :  { %3273 = vmatpush1.bf16.msra.mxu1 %v3272_v14  ;;  %v273_v26 = vld [vmem:[#allocation7 + $0xc8] sm:$0xff]  ;;  %v279_v27 = vld [vmem:[#allocation7 + $0xf8] sm:$0xff]  ;;  %v278_v32 = vld [vmem:[#allocation7 + $0xf0] sm:$0xff]  ;;  %v3306_v33 = vpack.c.bf16 %v269_v25, %v263_v24 }
  0xad   :  { %3269 = vmatpush3.bf16.msra.mxu0 %v3266_v6  ;;  %v152_v28 = vld [vmem:[%s4280_s0 + $0x8] sm:$0xff]  ;;  %3275 = vmatprep.subr.bf16.mxu1 %v3274_v22  ;;  %v3278_v30 = vpack.c.bf16 %v279_v27, %v273_v26  ;;  %v268_v35 = vld [vmem:[#allocation7 + $0xa0] sm:$0xff]  ;;  %v3280_v37 = vpack.c.bf16 %v278_v32, %v272_v31  ;;  %v281_v38 = vld [vmem:[#allocation7 + $0x108] sm:$0xff] }
  0xae   :  { %3303 = vmatprep.subr.bf16.mxu0 %v3302_v18  ;;  %v262_v34 = vld [vmem:[#allocation7 + $0x70] sm:$0xff]  ;;  %v275_v36 = vld [vmem:[#allocation7 + $0xd8] sm:$0xff]  ;;  %v285_v39 = vld [vmem:[#allocation7 + $0x128] sm:$0xff] }
  0xaf   :  { %v291_v40 = vld [vmem:[#allocation7 + $0x158] sm:$0xff]  ;;  %v284_v42 = vld [vmem:[#allocation7 + $0x120] sm:$0xff]  ;;  %v290_v43 = vld [vmem:[#allocation7 + $0x150] sm:$0xff]  ;;  %v3308_v44 = vpack.c.bf16 %v268_v35, %v262_v34  ;;  %v3310_v46 = vpack.c.bf16 %v281_v38, %v275_v36 }
  0xb0   :  { %3277 = vmatpush1.bf16.msra.mxu1 %v3276_v23  ;;  %3088 = vmatmul.mubr.msk.f32.vlgmr.msra.gmra.mrb[0].mxu0 %vm164_vm0, %v152_v28  ;;  %v3282_v41 = vpack.c.bf16 %v291_v40, %v285_v39  ;;  %v297_v45 = vld [vmem:[#allocation7 + $0x188] sm:$0xff]  ;;  %v274_v47 = vld [vmem:[#allocation7 + $0xd0] sm:$0xff]  ;;  %v280_v48 = vld [vmem:[#allocation7 + $0x100] sm:$0xff]  ;;  %v3284_v50 = vpack.c.bf16 %v290_v43, %v284_v42  ;;  %v3945_v43 = vmov 0.0  }
  0xb1   :  { %3279 = vmatprep.subr.bf16.mxu1 %v3278_v30  ;;  %3305 = vmatpush1.bf16.msra.mxu0 %v3304_v29  ;;  %v303_v49 = vld [vmem:[#allocation7 + $0x1b8] sm:$0xff]  ;;  %v293_v52 = vld [vmem:[#allocation7 + $0x168] sm:$0xff]  ;;  %v296_v54 = vld [vmem:[#allocation7 + $0x180] sm:$0xff]  ;;  %v3312_v56 = vpack.c.bf16 %v280_v48, %v274_v47 }
  0xb2   :  { %3307 = vmatprep.subr.bf16.mxu0 %v3306_v33  ;;  %v287_v51 = vld [vmem:[#allocation7 + $0x138] sm:$0xff]  ;;  %v3286_v53 = vpack.c.bf16 %v303_v49, %v297_v45  ;;  %v302_v55 = vld [vmem:[#allocation7 + $0x1b0] sm:$0xff]  ;;  %v309_v57 = vld [vmem:[#allocation7 + $0x1e8] sm:$0xff]  ;;  %408 = vmatprep.mubr.f32.mxu1 %v3945_v43 }
  0xb3   :  { %v315_v58 = vld [vmem:[#allocation7 + $0x218] sm:$0xff]  ;;  %v3314_v59 = vpack.c.bf16 %v293_v52, %v287_v51  ;;  %v286_v60 = vld [vmem:[#allocation7 + $0x130] sm:$0xff]  ;;  %v292_v61 = vld [vmem:[#allocation7 + $0x160] sm:$0xff]  ;;  %v3288_v62 = vpack.c.bf16 %v302_v55, %v296_v54  ;;  %485 = vmatprep.mubr.f32.mxu0 %v3945_v43 }
  0xb4   :  { %3281 = vmatpush1.bf16.msra.mxu1 %v3280_v37  ;;  %v299_v63 = vld [vmem:[#allocation7 + $0x198] sm:$0xff]  ;;  %v305_v0 = vld [vmem:[#allocation7 + $0x1c8] sm:$0xff]  ;;  %v3290_v1 = vpack.c.bf16 %v315_v58, %v309_v57  ;;  %v308_v2 = vld [vmem:[#allocation7 + $0x1e0] sm:$0xff]  ;;  %v3316_v4 = vpack.c.bf16 %v292_v61, %v286_v60 }
  0xb5   :  { %3283 = vmatprep.subr.bf16.mxu1 %v3282_v41  ;;  %3309 = vmatpush1.bf16.msra.mxu0 %v3308_v44  ;;  %v314_v3 = vld [vmem:[#allocation7 + $0x210] sm:$0xff]  ;;  %v321_v5 = vld [vmem:[#allocation7 + $0x248] sm:$0xff]  ;;  %v327_v6 = vld [vmem:[#allocation7 + $0x278] sm:$0xff]  ;;  %v3318_v7 = vpack.c.bf16 %v305_v0, %v299_v63 }
  0xb6   :  { %3311 = vmatprep.subr.bf16.mxu0 %v3310_v46  ;;  %v298_v8 = vld [vmem:[#allocation7 + $0x190] sm:$0xff]  ;;  %v304_v9 = vld [vmem:[#allocation7 + $0x1c0] sm:$0xff]  ;;  %v3292_v10 = vpack.c.bf16 %v314_v3, %v308_v2  ;;  %v311_v11 = vld [vmem:[#allocation7 + $0x1f8] sm:$0xff]  ;;  %v3294_v13 = vpack.c.bf16 %v327_v6, %v321_v5 }
  0xb7   :  { %v317_v12 = vld [vmem:[#allocation7 + $0x228] sm:$0xff]  ;;  %v320_v14 = vld [vmem:[#allocation7 + $0x240] sm:$0xff]  ;;  %v326_v15 = vld [vmem:[#allocation7 + $0x270] sm:$0xff]  ;;  %v3320_v16 = vpack.c.bf16 %v304_v9, %v298_v8 }
  0xb8   :  { %3285 = vmatpush1.bf16.msra.mxu1 %v3284_v50  ;;  %v3322_v17 = vpack.c.bf16 %v317_v12, %v311_v11  ;;  %v310_v18 = vld [vmem:[#allocation7 + $0x1f0] sm:$0xff]  ;;  %v316_v19 = vld [vmem:[#allocation7 + $0x220] sm:$0xff]  ;;  %v3296_v20 = vpack.c.bf16 %v326_v15, %v320_v14  ;;  %v323_v21 = vld [vmem:[#allocation7 + $0x258] sm:$0xff] }
  0xb9   :  { %3287 = vmatprep.subr.bf16.mxu1 %v3286_v53  ;;  %3313 = vmatpush1.bf16.msra.mxu0 %v3312_v56  ;;  %v329_v22 = vld [vmem:[#allocation7 + $0x288] sm:$0xff]  ;;  %v3324_v23 = vpack.c.bf16 %v316_v19, %v310_v18  ;;  %v322_v25 = vld [vmem:[#allocation7 + $0x250] sm:$0xff]  ;;  %v328_v26 = vld [vmem:[#allocation7 + $0x280] sm:$0xff] }
  0xba   :  { %3315 = vmatprep.subr.bf16.mxu0 %v3314_v59  ;;  %v3326_v24 = vpack.c.bf16 %v329_v22, %v323_v21  ;;  %v3328_v27 = vpack.c.bf16 %v328_v26, %v322_v25  ;;  %v333_v28 = vld [vmem:[#allocation7 + $0x2a8] sm:$0xff]  ;;  %v339_v29 = vld [vmem:[#allocation7 + $0x2d8] sm:$0xff]  ;;  %v332_v31 = vld [vmem:[#allocation7 + $0x2a0] sm:$0xff] }
  0xbb   :  { %v3298_v30 = vpack.c.bf16 %v339_v29, %v333_v28  ;;  %v338_v32 = vld [vmem:[#allocation7 + $0x2d0] sm:$0xff]  ;;  %v335_v33 = vld [vmem:[#allocation7 + $0x2b8] sm:$0xff]  ;;  %v341_v35 = vld [vmem:[#allocation7 + $0x2e8] sm:$0xff] }
  0xbc   :  { %3289 = vmatpush1.bf16.msra.mxu1 %v3288_v62  ;;  %v3300_v34 = vpack.c.bf16 %v338_v32, %v332_v31  ;;  %v334_v36 = vld [vmem:[#allocation7 + $0x2b0] sm:$0xff]  ;;  %v3330_v37 = vpack.c.bf16 %v341_v35, %v335_v33  ;;  %v340_v38 = vld [vmem:[#allocation7 + $0x2e0] sm:$0xff]  ;;  %v253_v40 = vld [vmem:[#allocation7 + $0x28] sm:$0xff] }
  0xbd   :  { %3291 = vmatprep.subr.bf16.mxu1 %v3290_v1  ;;  %3317 = vmatpush1.bf16.msra.mxu0 %v3316_v4  ;;  %v3332_v39 = vpack.c.bf16 %v340_v38, %v334_v36  ;;  %v259_v41 = vld [vmem:[#allocation7 + $0x58] sm:$0xff]  ;;  %v252_v46 = vld [vmem:[#allocation7 + $0x20] sm:$0xff]  ;;  %v258_v47 = vld [vmem:[#allocation7 + $0x50] sm:$0xff] }
  0xbe   :  { %3319 = vmatprep.subr.bf16.mxu0 %v3318_v7  ;;  %v3334_v42 = vpack.c.bf16 %v259_v41, %v253_v40  ;;  %v2907_v44 = vld [vmem:[#allocation6] ss:$0 sm:$0xff]  ;;  %v265_v49 = vld [vmem:[#allocation7 + $0x88] sm:$0xff]  ;;  %v3336_v52 = vpack.c.bf16 %v258_v47, %v252_v46  ;;  %v264_v56 = vld [vmem:[#allocation7 + $0x80] sm:$0xff] }
  0xbf   :  { %v271_v50 = vld [vmem:[#allocation7 + $0xb8] sm:$0xff]  ;;  %v270_v57 = vld [vmem:[#allocation7 + $0xb0] sm:$0xff]  ;;  %v277_v58 = vld [vmem:[#allocation7 + $0xe8] sm:$0xff] }
  0xc0   :  { %3293 = vmatpush1.bf16.msra.mxu1 %v3292_v10  ;;  %v3338_v55 = vpack.c.bf16 %v271_v50, %v265_v49  ;;  %v283_v59 = vld [vmem:[#allocation7 + $0x118] sm:$0xff]  ;;  %v3340_v60 = vpack.c.bf16 %v270_v57, %v264_v56  ;;  %v276_v63 = vld [vmem:[#allocation7 + $0xe0] sm:$0xff]  ;;  %v282_v0 = vld [vmem:[#allocation7 + $0x110] sm:$0xff] }
  0xc1   :  { %3295 = vmatprep.subr.bf16.mxu1 %v3294_v13  ;;  %3321 = vmatpush1.bf16.msra.mxu0 %v3320_v16  ;;  %v3342_v62 = vpack.c.bf16 %v283_v59, %v277_v58  ;;  %v289_v1 = vld [vmem:[#allocation7 + $0x148] sm:$0xff]  ;;  %v295_v2 = vld [vmem:[#allocation7 + $0x178] sm:$0xff]  ;;  %v3344_v3 = vpack.c.bf16 %v282_v0, %v276_v63  ;;  %v288_v5 = vld [vmem:[#allocation7 + $0x140] sm:$0xff] }
  0xc2   :  { %3323 = vmatprep.subr.bf16.mxu0 %v3322_v17  ;;  %v3346_v4 = vpack.c.bf16 %v295_v2, %v289_v1  ;;  %v294_v6 = vld [vmem:[#allocation7 + $0x170] sm:$0xff]  ;;  %v301_v7 = vld [vmem:[#allocation7 + $0x1a8] sm:$0xff]  ;;  %v307_v8 = vld [vmem:[#allocation7 + $0x1d8] sm:$0xff] }
  0xc3   :  { %v3348_v9 = vpack.c.bf16 %v294_v6, %v288_v5  ;;  %v3350_v10 = vpack.c.bf16 %v307_v8, %v301_v7  ;;  %v300_v11 = vld [vmem:[#allocation7 + $0x1a0] sm:$0xff]  ;;  %v306_v12 = vld [vmem:[#allocation7 + $0x1d0] sm:$0xff]  ;;  %v313_v13 = vld [vmem:[#allocation7 + $0x208] sm:$0xff] }
  0xc4   :  { %3297 = vmatpush1.bf16.msra.mxu1 %v3296_v20  ;;  %v319_v14 = vld [vmem:[#allocation7 + $0x238] sm:$0xff]  ;;  %v3352_v15 = vpack.c.bf16 %v306_v12, %v300_v11  ;;  %v312_v17 = vld [vmem:[#allocation7 + $0x200] sm:$0xff]  ;;  %v318_v18 = vld [vmem:[#allocation7 + $0x230] sm:$0xff] }
  0xc5   :  { %3325 = vmatpush1.bf16.msra.mxu0 %v3324_v23  ;;  %3299 = vmatprep.subr.bf16.mxu1 %v3298_v30  ;;  %v3354_v16 = vpack.c.bf16 %v319_v14, %v313_v13  ;;  %v325_v19 = vld [vmem:[#allocation7 + $0x268] sm:$0xff]  ;;  %v331_v20 = vld [vmem:[#allocation7 + $0x298] sm:$0xff]  ;;  %v3356_v21 = vpack.c.bf16 %v318_v18, %v312_v17  ;;  %v324_v23 = vld [vmem:[#allocation7 + $0x260] sm:$0xff] }
  0xc6   :  { %3327 = vmatprep.subr.bf16.mxu0 %v3326_v24  ;;  %v3358_v22 = vpack.c.bf16 %v331_v20, %v325_v19  ;;  %v330_v24 = vld [vmem:[#allocation7 + $0x290] sm:$0xff]  ;;  %v337_v25 = vld [vmem:[#allocation7 + $0x2c8] sm:$0xff]  ;;  %v343_v26 = vld [vmem:[#allocation7 + $0x2f8] sm:$0xff] }
  0xc7   :  { %v3362_v28 = vpack.c.bf16 %v343_v26, %v337_v25  ;;  %v336_v29 = vld [vmem:[#allocation7 + $0x2c0] sm:$0xff]  ;;  %v342_v30 = vld [vmem:[#allocation7 + $0x2f0] sm:$0xff]  ;;  %v1118_v35 = vld [vmem:[#allocation7 + $0x338] sm:$0xff] }
  0xc8   :  { %3301 = vmatpush1.bf16.msra.mxu1 %v3300_v34  ;;  %v3364_v31 = vpack.c.bf16 %v342_v30, %v336_v29  ;;  %v4145_v32 = vld [vmem:[#allocation2 + $0x8] sm:$0xff]   ;;  %v1112_v34 = vld [vmem:[#allocation7 + $0x308] sm:$0xff]  ;;  %v1111_v36 = vld [vmem:[#allocation7 + $0x300] sm:$0xff] }
  0xc9   :  { %3329 = vmatpush1.bf16.msra.mxu0 %v3328_v27  ;;  %3335 = vmatprep.subr.bf16.mxu1 %v3334_v42  ;;  %v3360_v27 = vpack.c.bf16 %v330_v24, %v324_v23  ;;  %v4148_v33 = vunpack.c.l.bf16 %v4145_v32  ;;  %v1117_v38 = vld [vmem:[#allocation7 + $0x330] sm:$0xff]  ;;  %v1124_v40 = vld [vmem:[#allocation7 + $0x368] sm:$0xff]  ;;  %v1130_v41 = vld [vmem:[#allocation7 + $0x398] sm:$0xff]  ;;  %v4153_v26 = vunpack.c.h.bf16 %v4145_v32 }
  0xca   :  { %3331 = vmatprep.subr.bf16.mxu0 %v3330_v37  ;;  %v3390_v37 = vpack.c.bf16 %v1118_v35, %v1112_v34  ;;  %v1123_v42 = vld [vmem:[#allocation7 + $0x360] sm:$0xff]  ;;  %v1136_v47 = vld [vmem:[#allocation7 + $0x3c8] sm:$0xff]  ;;  %v1153_v57 = vld [vmem:[#allocation7 + $0x450] sm:$0xff] }
  0xcb   :  { %v1135_v50 = vld [vmem:[#allocation7 + $0x3c0] sm:$0xff]  ;;  %v1160_v59 = vld [vmem:[#allocation7 + $0x488] sm:$0xff]  ;;  %v1165_v63 = vld [vmem:[#allocation7 + $0x4b0] sm:$0xff] }
  0xcc   :  { %v1172_v1 = vld [vmem:[#allocation7 + $0x4e8] sm:$0xff]  ;;  %v1178_v2 = vld [vmem:[#allocation7 + $0x518] sm:$0xff]  ;;  %v1177_v5 = vld [vmem:[#allocation7 + $0x510] sm:$0xff] }
  0xcd   :  { %3333 = vmatpush1.bf16.msra.mxu0 %v3332_v39  ;;  %v3392_v39 = vpack.c.bf16 %v1117_v38, %v1111_v36  ;;  %v1184_v7 = vld [vmem:[#allocation7 + $0x548] sm:$0xff]  ;;  %v1190_v8 = vld [vmem:[#allocation7 + $0x578] sm:$0xff]  ;;  %v1189_v11 = vld [vmem:[#allocation7 + $0x570] sm:$0xff] }
  0xce   :  { %v2954_v25 = vld [vmem:[#allocation2] sm:$0xff]  }
  0xcf   :  { %v4161_v29 = vunpack.c.h.bf16 %v2954_v25  ;;  %v2970_v35 = vld [vmem:[#allocation2 + $0x20] sm:$0xff]  }
 0x183   :  { %v3089_v45 = vpop.f32.mrb[0].mxu0 }
 0x184   :  { %v237_v48 = vpop.f32.mrb[1].mxu0  ;;  %v243_v53 = vadd.f32 %v3089_v45, %v2907_v44  ;;  %v3394_v45 = vpack.c.bf16 %v1130_v41, %v1124_v40 }
 0x185   :  { %v238_v51 = vadd.f32 %v2907_v44, %v237_v48  ;;  %v1129_v44 = vld [vmem:[#allocation7 + $0x390] sm:$0xff]  ;;  %v1142_v48 = vld [vmem:[#allocation7 + $0x3f8] sm:$0xff] }
 0x186   :  { %v247_v61 = vmax.f32 %v243_v53, 0.0  ;;  %v3396_v46 = vpack.c.bf16 %v1129_v44, %v1123_v42  ;;  %v3398_v49 = vpack.c.bf16 %v1142_v48, %v1136_v47  ;;  %v1148_v53 = vld [vmem:[#allocation7 + $0x428] sm:$0xff]  ;;  %v4185_v48 = vunpack.c.h.bf16 %v2970_v35 }
 0x187   :  { %v4135_v54 = vmax.f32 %v238_v51, 0.0  ;;  %v1141_v51 = vld [vmem:[#allocation7 + $0x3f0] sm:$0xff]  ;;  %v1120_v47 = vld [vmem:[#allocation7 + $0x348] sm:$0xff] }
 0x189   :  { %409 = vmatmul.mubr.f32.vlgmr.msra.gmra.mrb[0].mxu1 %v4135_v54  ;;  %486 = vmatmul.mubr.f32.vlgmr.msra.gmra.mrb[2].mxu0 %v4135_v54 }
 0x18a   :  { %3337 = vmatpush1.bf16.msra.mxu1 %v3336_v52  ;;  %414 = vmatprep.mubr.f32.mxu1 %v3945_v43  ;;  %v3400_v52 = vpack.c.bf16 %v1141_v51, %v1135_v50  ;;  %v1113_v51 = vld [vmem:[#allocation7 + $0x310] sm:$0xff] }
 0x18b   :  { %491 = vmatprep.mubr.f32.mxu0 %v3945_v43  ;;  %3339 = vmatprep.subr.bf16.mxu1 %v3338_v55  ;;  %v1147_v55 = vld [vmem:[#allocation7 + $0x420] sm:$0xff] }
 0x18c   :  { %v3404_v58 = vpack.c.bf16 %v1153_v57, %v1147_v55 }
 0x18d   :  { %415 = vmatmul.mubr.f32.gmra.mrb[2].mxu1 %v247_v61  ;;  %492 = vmatmul.mubr.f32.gmra.mrb[4].mxu0 %v247_v61 }
 0x18e   :  { %3341 = vmatpush1.bf16.msra.mxu1 %v3340_v60  ;;  %562 = vmatprep.mubr.f32.mxu1 %v3945_v43  ;;  %v1166_v60 = vld [vmem:[#allocation7 + $0x4b8] sm:$0xff] }
 0x18f   :  { %3343 = vmatprep.subr.bf16.mxu1 %v3342_v62  ;;  %3094 = vmatprep.mubr.msk.f32.mxu0 %vm584_vm1, %v4148_v33  ;;  %v3406_v62 = vpack.c.bf16 %v1166_v60, %v1160_v59  ;;  %v1131_v59 = vld [vmem:[#allocation7 + $0x3a0] sm:$0xff]  ;;  %v1138_v60 = vld [vmem:[#allocation7 + $0x3d8] sm:$0xff] }
 0x192   :  { %3345 = vmatpush1.bf16.msra.mxu1 %v3344_v3  ;;  %v1171_v3 = vld [vmem:[#allocation7 + $0x4e0] sm:$0xff] }
 0x193   :  { %3347 = vmatprep.subr.bf16.mxu1 %v3346_v4  ;;  %v3410_v4 = vpack.c.bf16 %v1178_v2, %v1172_v1  ;;  %v3412_v6 = vpack.c.bf16 %v1177_v5, %v1171_v3  ;;  %v1143_v1 = vld [vmem:[#allocation7 + $0x400] sm:$0xff]  ;;  %v1150_v2 = vld [vmem:[#allocation7 + $0x438] sm:$0xff]  ;;  %v1156_v3 = vld [vmem:[#allocation7 + $0x468] sm:$0xff] }
 0x194   :  { %v3434_v5 = vpack.c.bf16 %v1156_v3, %v1150_v2  ;;  %v1127_v3 = vld [vmem:[#allocation7 + $0x380] sm:$0xff] }
 0x196   :  { %3349 = vmatpush1.bf16.msra.mxu1 %v3348_v9  ;;  %v1183_v9 = vld [vmem:[#allocation7 + $0x540] sm:$0xff] }
 0x197   :  { %3351 = vmatprep.subr.bf16.mxu1 %v3350_v10  ;;  %v3414_v10 = vpack.c.bf16 %v1190_v8, %v1184_v7  ;;  %v3416_v12 = vpack.c.bf16 %v1189_v11, %v1183_v9  ;;  %v1155_v7 = vld [vmem:[#allocation7 + $0x460] sm:$0xff]  ;;  %v1162_v8 = vld [vmem:[#allocation7 + $0x498] sm:$0xff]  ;;  %v1168_v9 = vld [vmem:[#allocation7 + $0x4c8] sm:$0xff] }
 0x198   :  { %v3438_v11 = vpack.c.bf16 %v1168_v9, %v1162_v8 }
 0x19a   :  { %3353 = vmatpush1.bf16.msra.mxu1 %v3352_v15 }
 0x19b   :  { %3355 = vmatprep.subr.bf16.mxu1 %v3354_v16 }
 0x19e   :  { %3357 = vmatpush1.bf16.msra.mxu1 %v3356_v21 }
 0x19f   :  { %3359 = vmatprep.subr.bf16.mxu1 %v3358_v22 }
 0x1a2   :  { %3361 = vmatpush1.bf16.msra.mxu1 %v3360_v27  ;;  %v4155_v27 = vunpack.c.l.bf16 %v2954_v25  ;;  %v1191_v25 = vld [vmem:[#allocation7 + $0x580] sm:$0xff] }
 0x1a3   :  { %3363 = vmatprep.subr.bf16.mxu1 %v3362_v28  ;;  %v2962_v28 = vld [vmem:[#allocation2 + $0x10] sm:$0xff]  }
 0x1a4   :  { %v4163_v30 = vunpack.c.l.bf16 %v2962_v28  ;;  %v4169_v32 = vunpack.c.h.bf16 %v2962_v28 }
 0x1a6   :  { %3365 = vmatpush1.bf16.msra.mxu1 %v3364_v31  ;;  %v2966_v31 = vld [vmem:[#allocation2 + $0x18] sm:$0xff]  }
 0x1a7   :  { %3391 = vmatprep.subr.bf16.mxu1 %v3390_v37  ;;  %v4171_v34 = vunpack.c.l.bf16 %v2966_v31  ;;  %v4177_v37 = vunpack.c.h.bf16 %v2966_v31  ;;  %v1196_v31 = vld [vmem:[#allocation7 + $0x5a8] sm:$0xff] }
 0x1a9   :  { %563 = vmatmul.mubr.f32.vlgmr.msra.gmra.mrb[4].mxu1 %v4135_v54  ;;  %v1154_v54 = vld [vmem:[#allocation7 + $0x458] sm:$0xff] }
 0x1aa   :  { %568 = vmatprep.mubr.f32.mxu1 %v3945_v43  ;;  %3393 = vmatpush1.bf16.msra.mxu1 %v3392_v39  ;;  %v3402_v56 = vpack.c.bf16 %v1154_v54, %v1148_v53  ;;  %v4179_v39 = vunpack.c.l.bf16 %v2970_v35  ;;  %v1126_v53 = vld [vmem:[#allocation7 + $0x378] sm:$0xff]  ;;  %v1132_v54 = vld [vmem:[#allocation7 + $0x3a8] sm:$0xff] }
 0x1ab   :  { %3395 = vmatprep.subr.bf16.mxu1 %v3394_v45  ;;  %v2974_v45 = vld [vmem:[#allocation2 + $0x28] sm:$0xff]   ;;  %v3426_v57 = vpack.c.bf16 %v1132_v54, %v1126_v53  ;;  %v2922_v54 = vld [vmem:[#allocation9] ss:$0 sm:$0xff] }
 0x1ac   :  { %v4193_v55 = vunpack.c.h.bf16 %v2974_v45  ;;  %v1202_v35 = vld [vmem:[#allocation7 + $0x5d8] sm:$0xff] }
 0x1ad   :  { %569 = vmatmul.mubr.f32.gmra.mrb[6].mxu1 %v247_v61  ;;  %v1159_v61 = vld [vmem:[#allocation7 + $0x480] sm:$0xff] }
 0x1ae   :  { %1271 = vmatprep.mubr.f32.mxu1 %v3945_v43  ;;  %3397 = vmatpush1.bf16.msra.mxu1 %v3396_v46  ;;  %v3408_v0 = vpack.c.bf16 %v1165_v63, %v1159_v61  ;;  %v1114_v46 = vld [vmem:[#allocation7 + $0x318] sm:$0xff]  ;;  %v1144_v61 = vld [vmem:[#allocation7 + $0x408] sm:$0xff] }
 0x1af   :  { %3399 = vmatprep.subr.bf16.mxu1 %v3398_v49  ;;  %v4187_v49 = vunpack.c.l.bf16 %v2974_v45  ;;  %v3422_v50 = vpack.c.bf16 %v1120_v47, %v1114_v46  ;;  %v3430_v63 = vpack.c.bf16 %v1144_v61, %v1138_v60  ;;  %v1197_v45 = vld [vmem:[#allocation7 + $0x5b0] sm:$0xff]  ;;  %v1203_v47 = vld [vmem:[#allocation7 + $0x5e0] sm:$0xff]  ;;  %v1128_v60 = vld [vmem:[#allocation7 + $0x388] sm:$0xff] }
 0x1b0   :  { %v1134_v61 = vld [vmem:[#allocation7 + $0x3b8] sm:$0xff] }
 0x1b1   :  { %v3458_v2 = vpack.c.bf16 %v1134_v61, %v1128_v60  ;;  %v1917_v60 = vld [vmem:[#allocation7 + $0x640] sm:$0xff] }
 0x1b2   :  { %3401 = vmatpush1.bf16.msra.mxu1 %v3400_v52  ;;  %v1119_v52 = vld [vmem:[#allocation7 + $0x340] sm:$0xff] }
 0x1b3   :  { %3403 = vmatprep.subr.bf16.mxu1 %v3402_v56  ;;  %v3424_v56 = vpack.c.bf16 %v1119_v52, %v1113_v51  ;;  %v1116_v51 = vld [vmem:[#allocation7 + $0x328] sm:$0xff]  ;;  %v1122_v52 = vld [vmem:[#allocation7 + $0x358] sm:$0xff] }
 0x1b4   :  { %v3454_v53 = vpack.c.bf16 %v1122_v52, %v1116_v51  ;;  %v1199_v52 = vld [vmem:[#allocation7 + $0x5c0] sm:$0xff] }
 0x1b6   :  { %3405 = vmatpush1.bf16.msra.mxu1 %v3404_v58  ;;  %v1125_v58 = vld [vmem:[#allocation7 + $0x370] sm:$0xff] }
 0x1b7   :  { %3407 = vmatprep.subr.bf16.mxu1 %v3406_v62  ;;  %v3428_v62 = vpack.c.bf16 %v1131_v59, %v1125_v58  ;;  %v1121_v58 = vld [vmem:[#allocation7 + $0x350] sm:$0xff] }
 0x1ba   :  { %3409 = vmatpush1.bf16.msra.mxu1 %v3408_v0  ;;  %v1137_v0 = vld [vmem:[#allocation7 + $0x3d0] sm:$0xff] }
 0x1bb   :  { %3411 = vmatprep.subr.bf16.mxu1 %v3410_v4  ;;  %v3432_v4 = vpack.c.bf16 %v1143_v1, %v1137_v0 }
 0x1be   :  { %3413 = vmatpush1.bf16.msra.mxu1 %v3412_v6  ;;  %v1149_v6 = vld [vmem:[#allocation7 + $0x430] sm:$0xff] }
 0x1bf   :  { %3415 = vmatprep.subr.bf16.mxu1 %v3414_v10  ;;  %v3436_v10 = vpack.c.bf16 %v1155_v7, %v1149_v6  ;;  %v1146_v6 = vld [vmem:[#allocation7 + $0x418] sm:$0xff] }
 0x1c2   :  { %3417 = vmatpush1.bf16.msra.mxu1 %v3416_v12  ;;  %v1161_v12 = vld [vmem:[#allocation7 + $0x490] sm:$0xff] }
 0x25c   :  { %v410_v13 = vpop.f32.mrb[0].mxu1  ;;  %v487_v14 = vpop.f32.mrb[2].mxu0 }
 0x25d   :  { %v412_v15 = vpop.f32.mrb[1].mxu1  ;;  %v489_v16 = vpop.f32.mrb[3].mxu0 }
 0x260   :  { %v416_v17 = vpop.f32.mrb[2].mxu1  ;;  %v493_v18 = vpop.f32.mrb[4].mxu0 }
 0x261   :  { %v3370_v19 = vpack.c.bf16 %v416_v17, %v410_v13  ;;  %v3374_v20 = vpack.c.bf16 %v493_v18, %v487_v14  ;;  %v418_v21 = vpop.f32.mrb[3].mxu1  ;;  %v495_v22 = vpop.f32.mrb[5].mxu0  ;;  %v1167_v13 = vld [vmem:[#allocation7 + $0x4c0] sm:$0xff]  ;;  %v1174_v14 = vld [vmem:[#allocation7 + $0x4f8] sm:$0xff]  ;;  %v1173_v18 = vld [vmem:[#allocation7 + $0x4f0] sm:$0xff] }
 0x262   :  { %v3366_v23 = vpack.c.bf16 %v418_v21, %v412_v15  ;;  %v3378_v24 = vpack.c.bf16 %v495_v22, %v489_v16  ;;  %v1180_v15 = vld [vmem:[#allocation7 + $0x528] sm:$0xff]  ;;  %v3440_v16 = vpack.c.bf16 %v1167_v13, %v1161_v12  ;;  %v1158_v13 = vld [vmem:[#allocation7 + $0x478] sm:$0xff] }
 0x263   :  { %v3442_v17 = vpack.c.bf16 %v1180_v15, %v1174_v14  ;;  %v1192_v21 = vld [vmem:[#allocation7 + $0x588] sm:$0xff] }
 0x264   :  { %3367 = vmatprep.subr.bf16.mxu0 %v3366_v23  ;;  %v1152_v12 = vld [vmem:[#allocation7 + $0x448] sm:$0xff] }
 0x265   :  { %3369 = vmatpush3.bf16.msra.mxu0 %v3366_v23  ;;  %v3466_v15 = vpack.c.bf16 %v1158_v13, %v1152_v12  ;;  %v1947_v12 = vld [vmem:[#allocation7 + $0x730] sm:$0xff] }
 0x266   :  { %3371 = vmatprep.subr.bf16.mxu0 %v3370_v19 }
 0x268   :  { %3095 = vmatmul.mubr.msk.f32.vlgmr.msra.gmra.mrb[6].mxu0 %vm584_vm1, %v4153_v26 }
 0x269   :  { %3373 = vmatpush3.bf16.msra.mxu0 %v3370_v19  ;;  %3101 = vmatprep.mubr.msk.f32.mxu0 %vm584_vm1, %v4155_v27  ;;  %v1179_v19 = vld [vmem:[#allocation7 + $0x520] sm:$0xff] }
 0x26a   :  { %3375 = vmatprep.subr.bf16.mxu0 %v3374_v20  ;;  %v3444_v22 = vpack.c.bf16 %v1179_v19, %v1173_v18  ;;  %v1164_v18 = vld [vmem:[#allocation7 + $0x4a8] sm:$0xff]  ;;  %v1170_v19 = vld [vmem:[#allocation7 + $0x4d8] sm:$0xff] }
 0x270   :  { %3102 = vmatmul.mubr.msk.f32.vlgmr.msra.gmra.mrb[6].mxu0 %vm584_vm1, %v4161_v29 }
 0x271   :  { %3377 = vmatpush3.bf16.msra.mxu0 %v3374_v20  ;;  %3108 = vmatprep.mubr.msk.f32.mxu0 %vm584_vm1, %v4163_v30  ;;  %v1186_v20 = vld [vmem:[#allocation7 + $0x558] sm:$0xff] }
 0x272   :  { %3379 = vmatprep.subr.bf16.mxu0 %v3378_v24  ;;  %v3446_v23 = vpack.c.bf16 %v1192_v21, %v1186_v20  ;;  %v3470_v21 = vpack.c.bf16 %v1170_v19, %v1164_v18  ;;  %v1959_v18 = vld [vmem:[#allocation7 + $0x790] sm:$0xff] }
 0x278   :  { %3109 = vmatmul.mubr.msk.f32.vlgmr.msra.gmra.mrb[6].mxu0 %vm584_vm1, %v4169_v32 }
 0x279   :  { %3381 = vmatpush3.bf16.msra.mxu0 %v3378_v24  ;;  %3115 = vmatprep.mubr.msk.f32.mxu0 %vm584_vm1, %v4171_v34  ;;  %v1185_v24 = vld [vmem:[#allocation7 + $0x550] sm:$0xff] }
 0x27a   :  { %v3448_v28 = vpack.c.bf16 %v1191_v25, %v1185_v24  ;;  %v1176_v24 = vld [vmem:[#allocation7 + $0x508] sm:$0xff]  ;;  %v1182_v25 = vld [vmem:[#allocation7 + $0x538] sm:$0xff] }
 0x27c   :  { %v564_v36 = vpop.f32.mrb[4].mxu1 }
 0x27d   :  { %v566_v38 = vpop.f32.mrb[5].mxu1 }
 0x280   :  { %v570_v40 = vpop.f32.mrb[6].mxu1  ;;  %3116 = vmatmul.mubr.msk.f32.vlgmr.msra.gmra.mrb[6].mxu0 %vm584_vm1, %v4177_v37 }
 0x281   :  { %v3382_v41 = vpack.c.bf16 %v570_v40, %v564_v36  ;;  %v572_v42 = vpop.f32.mrb[7].mxu1  ;;  %3122 = vmatprep.mubr.msk.f32.mxu0 %vm584_vm1, %v4179_v39  ;;  %v3418_v36 = vpack.c.bf16 %v1202_v35, %v1196_v31  ;;  %v1201_v40 = vld [vmem:[#allocation7 + $0x5d0] sm:$0xff]  ;;  %v3474_v31 = vpack.c.bf16 %v1182_v25, %v1176_v24  ;;  %v1175_v35 = vld [vmem:[#allocation7 + $0x500] sm:$0xff] }
 0x282   :  { %v3386_v44 = vpack.c.bf16 %v572_v42, %v566_v38  ;;  %v1195_v38 = vld [vmem:[#allocation7 + $0x5a0] sm:$0xff]  ;;  %v1198_v42 = vld [vmem:[#allocation7 + $0x5b8] sm:$0xff]  ;;  %v1971_v24 = vld [vmem:[#allocation7 + $0x7f0] sm:$0xff] }
 0x283   :  { %3383 = vmatprep.subr.bf16.mxu0 %v3382_v41  ;;  %3419 = vmatprep.subr.bf16.mxu1 %v3418_v36  ;;  %v1181_v36 = vld [vmem:[#allocation7 + $0x530] sm:$0xff] }
 0x284   :  { %3385 = vmatpush3.bf16.msra.mxu0 %v3382_v41  ;;  %v3420_v41 = vpack.c.bf16 %v1201_v40, %v1195_v38  ;;  %v1188_v38 = vld [vmem:[#allocation7 + $0x568] sm:$0xff]  ;;  %v1194_v40 = vld [vmem:[#allocation7 + $0x598] sm:$0xff] }
 0x285   :  { %3387 = vmatprep.subr.bf16.mxu0 %v3386_v44 }
 0x286   :  { %3421 = vmatpush1.bf16.msra.mxu1 %v3420_v41  ;;  %v3476_v41 = vpack.c.bf16 %v1181_v36, %v1175_v35  ;;  %v1984_v35 = vld [vmem:[#allocation7 + $0x858] sm:$0xff]  ;;  %v1990_v36 = vld [vmem:[#allocation7 + $0x888] sm:$0xff] }
 0x287   :  { %3455 = vmatprep.subr.bf16.mxu1 %v3454_v53  ;;  %v1205_v53 = vld [vmem:[#allocation7 + $0x5f0] sm:$0xff] }
 0x288   :  { %3123 = vmatmul.mubr.msk.f32.vlgmr.msra.gmra.mrb[6].mxu0 %vm584_vm1, %v4185_v48 }
 0x289   :  { %3389 = vmatpush3.bf16.msra.mxu0 %v3386_v44  ;;  %3129 = vmatprep.mubr.msk.f32.mxu0 %vm584_vm1, %v4187_v49  ;;  %v1204_v44 = vld [vmem:[#allocation7 + $0x5e8] sm:$0xff] }
 0x28a   :  { %3423 = vmatprep.subr.bf16.mxu0 %v3422_v50  ;;  %v3450_v46 = vpack.c.bf16 %v1204_v44, %v1198_v42  ;;  %v3452_v50 = vpack.c.bf16 %v1203_v47, %v1197_v45  ;;  %v3478_v42 = vpack.c.bf16 %v1194_v40, %v1188_v38  ;;  %v1187_v44 = vld [vmem:[#allocation7 + $0x560] sm:$0xff]  ;;  %v1193_v45 = vld [vmem:[#allocation7 + $0x590] sm:$0xff]  ;;  %v1206_v47 = vld [vmem:[#allocation7 + $0x5f8] sm:$0xff]  ;;  %v3566_v40 = vpack.c.bf16 %v1990_v36, %v1984_v35 }
 0x28b   :  { %v1983_v38 = vld [vmem:[#allocation7 + $0x850] sm:$0xff]  ;;  %v1957_v35 = vld [vmem:[#allocation7 + $0x780] sm:$0xff] }
 0x28c   :  { %v1963_v36 = vld [vmem:[#allocation7 + $0x7b0] sm:$0xff] }
 0x290   :  { %3130 = vmatmul.mubr.msk.f32.vlgmr.msra.gmra.mrb[6].mxu0 %vm584_vm1, %v4193_v55 }
 0x291   :  { %3425 = vmatpush1.bf16.msra.mxu0 %v3424_v56  ;;  %1348 = vmatprep.mubr.f32.mxu0 %v3945_v43 }
 0x292   :  { %3427 = vmatprep.subr.bf16.mxu0 %v3426_v57  ;;  %v1115_v57 = vld [vmem:[#allocation7 + $0x320] sm:$0xff] }
 0x295   :  { %3429 = vmatpush1.bf16.msra.mxu0 %v3428_v62 }
 0x296   :  { %3431 = vmatprep.subr.bf16.mxu0 %v3430_v63  ;;  %v3456_v63 = vpack.c.bf16 %v1121_v58, %v1115_v57  ;;  %v1918_v57 = vld [vmem:[#allocation7 + $0x648] sm:$0xff] }
 0x299   :  { %3433 = vmatpush1.bf16.msra.mxu0 %v3432_v4  ;;  %v1133_v4 = vld [vmem:[#allocation7 + $0x3b0] sm:$0xff] }
 0x29a   :  { %3435 = vmatprep.subr.bf16.mxu0 %v3434_v5  ;;  %v1140_v5 = vld [vmem:[#allocation7 + $0x3e8] sm:$0xff]  ;;  %v3460_v7 = vpack.c.bf16 %v1133_v4, %v1127_v3  ;;  %v1929_v3 = vld [vmem:[#allocation7 + $0x6a0] sm:$0xff] }
 0x29b   :  { %v3462_v9 = vpack.c.bf16 %v1146_v6, %v1140_v5  ;;  %v1942_v5 = vld [vmem:[#allocation7 + $0x708] sm:$0xff]  ;;  %v1935_v6 = vld [vmem:[#allocation7 + $0x6d0] sm:$0xff] }
 0x29d   :  { %3437 = vmatpush1.bf16.msra.mxu0 %v3436_v10  ;;  %v1139_v10 = vld [vmem:[#allocation7 + $0x3e0] sm:$0xff] }
 0x29e   :  { %3439 = vmatprep.subr.bf16.mxu0 %v3438_v11  ;;  %v1145_v11 = vld [vmem:[#allocation7 + $0x410] sm:$0xff] }
 0x29f   :  { %v3464_v14 = vpack.c.bf16 %v1145_v11, %v1139_v10  ;;  %v1948_v10 = vld [vmem:[#allocation7 + $0x738] sm:$0xff]  ;;  %v1954_v11 = vld [vmem:[#allocation7 + $0x768] sm:$0xff] }
 0x2a0   :  { %v3554_v13 = vpack.c.bf16 %v1954_v11, %v1948_v10  ;;  %v1921_v10 = vld [vmem:[#allocation7 + $0x660] sm:$0xff]  ;;  %v1927_v11 = vld [vmem:[#allocation7 + $0x690] sm:$0xff] }
 0x2a1   :  { %3441 = vmatpush1.bf16.msra.mxu0 %v3440_v16  ;;  %v1151_v16 = vld [vmem:[#allocation7 + $0x440] sm:$0xff] }
 0x2a2   :  { %3443 = vmatprep.subr.bf16.mxu0 %v3442_v17  ;;  %v1157_v17 = vld [vmem:[#allocation7 + $0x470] sm:$0xff] }
 0x2a3   :  { %v3468_v20 = vpack.c.bf16 %v1157_v17, %v1151_v16  ;;  %v1960_v16 = vld [vmem:[#allocation7 + $0x798] sm:$0xff]  ;;  %v1966_v17 = vld [vmem:[#allocation7 + $0x7c8] sm:$0xff] }
 0x2a4   :  { %v3558_v19 = vpack.c.bf16 %v1966_v17, %v1960_v16  ;;  %v1933_v16 = vld [vmem:[#allocation7 + $0x6c0] sm:$0xff]  ;;  %v1939_v17 = vld [vmem:[#allocation7 + $0x6f0] sm:$0xff] }
 0x2a5   :  { %3445 = vmatpush1.bf16.msra.mxu0 %v3444_v22  ;;  %v1163_v22 = vld [vmem:[#allocation7 + $0x4a0] sm:$0xff] }
 0x2a6   :  { %3447 = vmatprep.subr.bf16.mxu0 %v3446_v23  ;;  %v1169_v23 = vld [vmem:[#allocation7 + $0x4d0] sm:$0xff] }
 0x2a9   :  { %3449 = vmatpush1.bf16.msra.mxu0 %v3448_v28  ;;  %v3472_v28 = vpack.c.bf16 %v1169_v23, %v1163_v22  ;;  %v1972_v22 = vld [vmem:[#allocation7 + $0x7f8] sm:$0xff]  ;;  %v1978_v23 = vld [vmem:[#allocation7 + $0x828] sm:$0xff] }
 0x2aa   :  { %3451 = vmatprep.subr.bf16.mxu0 %v3450_v46  ;;  %v1200_v46 = vld [vmem:[#allocation7 + $0x5c8] sm:$0xff]  ;;  %v3562_v25 = vpack.c.bf16 %v1978_v23, %v1972_v22  ;;  %v1945_v22 = vld [vmem:[#allocation7 + $0x720] sm:$0xff]  ;;  %v1951_v23 = vld [vmem:[#allocation7 + $0x750] sm:$0xff] }
 0x2ab   :  { %v3482_v51 = vpack.c.bf16 %v1206_v47, %v1200_v46 }
 0x2ad   :  { %3453 = vmatpush1.bf16.msra.mxu0 %v3452_v50  ;;  %v3480_v50 = vpack.c.bf16 %v1193_v45, %v1187_v44 }
 0x363   :  { %v3131_v56 = vpop.f32.mrb[6].mxu0 }
 0x364   :  { %v1088_v59 = vpop.f32.mrb[7].mxu0  ;;  %v1107_v0 = vadd.f32 %v3131_v56, %v2922_v54  ;;  %v1912_v56 = vld [vmem:[#allocation7 + $0x618] sm:$0xff] }
 0x365   :  { %v1106_v62 = vadd.f32 %v2922_v54, %v1088_v59  ;;  %v3484_v54 = vpack.c.bf16 %v1205_v53, %v1199_v52  ;;  %v3542_v58 = vpack.c.bf16 %v1918_v57, %v1912_v56  ;;  %v1911_v59 = vld [vmem:[#allocation7 + $0x610] sm:$0xff] }
 0x366   :  { %v1109_v8 = vmax.f32 %v1107_v0, 0.0  ;;  %v3544_v61 = vpack.c.bf16 %v1917_v60, %v1911_v59  ;;  %v1923_v0 = vld [vmem:[#allocation7 + $0x670] sm:$0xff] }
 0x367   :  { %v4198_v1 = vmax.f32 %v1106_v62, 0.0  ;;  %v1924_v62 = vld [vmem:[#allocation7 + $0x678] sm:$0xff]  ;;  %v3548_v4 = vpack.c.bf16 %v1929_v3, %v1923_v0 }
 0x368   :  { %v1916_v3 = vld [vmem:[#allocation7 + $0x638] sm:$0xff] }
 0x369   :  { %1272 = vmatmul.mubr.f32.vlgmr.msra.gmra.mrb[8].mxu1 %v4198_v1  ;;  %1349 = vmatmul.mubr.f32.vlgmr.msra.gmra.mrb[8].mxu0 %v4198_v1 }
 0x36a   :  { %3457 = vmatpush1.bf16.msra.mxu1 %v3456_v63  ;;  %1277 = vmatprep.mubr.f32.mxu1 %v3945_v43  ;;  %v1930_v63 = vld [vmem:[#allocation7 + $0x6a8] sm:$0xff] }
 0x36b   :  { %1354 = vmatprep.mubr.f32.mxu0 %v3945_v43  ;;  %3459 = vmatprep.subr.bf16.mxu1 %v3458_v2  ;;  %v3546_v2 = vpack.c.bf16 %v1930_v63, %v1924_v62 }
 0x36d   :  { %1278 = vmatmul.mubr.f32.gmra.mrb[10].mxu1 %v1109_v8  ;;  %1355 = vmatmul.mubr.f32.gmra.mrb[10].mxu0 %v1109_v8 }
 0x36e   :  { %3461 = vmatpush1.bf16.msra.mxu1 %v3460_v7  ;;  %1425 = vmatprep.mubr.f32.mxu1 %v3945_v43 }
 0x36f   :  { %3463 = vmatprep.subr.bf16.mxu1 %v3462_v9  ;;  %3136 = vmatprep.mubr.msk.f32.mxu0 %vm584_vm1, %v4148_v33 }
 0x372   :  { %3465 = vmatpush1.bf16.msra.mxu1 %v3464_v14  ;;  %v1953_v14 = vld [vmem:[#allocation7 + $0x760] sm:$0xff] }
 0x373   :  { %3467 = vmatprep.subr.bf16.mxu1 %v3466_v15  ;;  %v3556_v15 = vpack.c.bf16 %v1953_v14, %v1947_v12  ;;  %v1934_v12 = vld [vmem:[#allocation7 + $0x6c8] sm:$0xff]  ;;  %v3516_v14 = vpack.c.bf16 %v1927_v11, %v1921_v10  ;;  %v1919_v10 = vld [vmem:[#allocation7 + $0x650] sm:$0xff] }
 0x376   :  { %3469 = vmatpush1.bf16.msra.mxu1 %v3468_v20  ;;  %v1965_v20 = vld [vmem:[#allocation7 + $0x7c0] sm:$0xff] }
 0x377   :  { %3471 = vmatprep.subr.bf16.mxu1 %v3470_v21  ;;  %v3560_v21 = vpack.c.bf16 %v1965_v20, %v1959_v18  ;;  %v1946_v18 = vld [vmem:[#allocation7 + $0x728] sm:$0xff]  ;;  %v3520_v20 = vpack.c.bf16 %v1939_v17, %v1933_v16 }
 0x37a   :  { %3473 = vmatpush1.bf16.msra.mxu1 %v3472_v28  ;;  %v1977_v28 = vld [vmem:[#allocation7 + $0x820] sm:$0xff] }
 0x37b   :  { %3475 = vmatprep.subr.bf16.mxu1 %v3474_v31  ;;  %v3564_v31 = vpack.c.bf16 %v1977_v28, %v1971_v24  ;;  %v1958_v24 = vld [vmem:[#allocation7 + $0x788] sm:$0xff]  ;;  %v3524_v28 = vpack.c.bf16 %v1951_v23, %v1945_v22  ;;  %v1944_v22 = vld [vmem:[#allocation7 + $0x718] sm:$0xff] }
 0x37e   :  { %3477 = vmatpush1.bf16.msra.mxu1 %v3476_v41  ;;  %v1989_v41 = vld [vmem:[#allocation7 + $0x880] sm:$0xff] }
 0x37f   :  { %3479 = vmatprep.subr.bf16.mxu1 %v3478_v42  ;;  %v3568_v42 = vpack.c.bf16 %v1989_v41, %v1983_v38  ;;  %v1970_v38 = vld [vmem:[#allocation7 + $0x7e8] sm:$0xff]  ;;  %v3528_v41 = vpack.c.bf16 %v1963_v36, %v1957_v35  ;;  %v1956_v36 = vld [vmem:[#allocation7 + $0x778] sm:$0xff] }
 0x380   :  { %v1950_v35 = vld [vmem:[#allocation7 + $0x748] sm:$0xff] }
 0x382   :  { %3481 = vmatpush1.bf16.msra.mxu1 %v3480_v50 }
 0x383   :  { %3483 = vmatprep.subr.bf16.mxu1 %v3482_v51 }
 0x386   :  { %3485 = vmatpush1.bf16.msra.mxu1 %v3484_v54 }
 0x387   :  { %3543 = vmatprep.subr.bf16.mxu1 %v3542_v58 }
 0x389   :  { %1426 = vmatmul.mubr.f32.vlgmr.msra.gmra.mrb[12].mxu1 %v4198_v1  ;;  %v1936_v1 = vld [vmem:[#allocation7 + $0x6d8] sm:$0xff] }
 0x38a   :  { %1431 = vmatprep.mubr.f32.mxu1 %v3945_v43  ;;  %3545 = vmatpush1.bf16.msra.mxu1 %v3544_v61  ;;  %v3550_v7 = vpack.c.bf16 %v1942_v5, %v1936_v1  ;;  %v1909_v1 = vld [vmem:[#allocation7 + $0x600] sm:$0xff]  ;;  %v1915_v5 = vld [vmem:[#allocation7 + $0x630] sm:$0xff] }
 0x38b   :  { %3547 = vmatprep.subr.bf16.mxu1 %v3546_v2  ;;  %v1910_v2 = vld [vmem:[#allocation7 + $0x608] sm:$0xff] }
 0x38d   :  { %1432 = vmatmul.mubr.f32.gmra.mrb[14].mxu1 %v1109_v8  ;;  %v1941_v8 = vld [vmem:[#allocation7 + $0x700] sm:$0xff] }
 0x38e   :  { %2146 = vmatprep.mubr.f32.mxu1 %v3945_v43  ;;  %3549 = vmatpush1.bf16.msra.mxu1 %v3548_v4  ;;  %v3552_v9 = vpack.c.bf16 %v1941_v8, %v1935_v6  ;;  %v3510_v4 = vpack.c.bf16 %v1916_v3, %v1910_v2  ;;  %v1922_v6 = vld [vmem:[#allocation7 + $0x668] sm:$0xff]  ;;  %v3512_v8 = vpack.c.bf16 %v1915_v5, %v1909_v1  ;;  %v2001_v3 = vld [vmem:[#allocation7 + $0x8e0] sm:$0xff]  ;;  %v1920_v5 = vld [vmem:[#allocation7 + $0x658] sm:$0xff] }
 0x38f   :  { %3551 = vmatprep.subr.bf16.mxu1 %v3550_v7  ;;  %v1928_v7 = vld [vmem:[#allocation7 + $0x698] sm:$0xff]  ;;  %v1914_v1 = vld [vmem:[#allocation7 + $0x628] sm:$0xff] }
 0x392   :  { %3553 = vmatpush1.bf16.msra.mxu1 %v3552_v9  ;;  %v3514_v9 = vpack.c.bf16 %v1928_v7, %v1922_v6  ;;  %v3574_v6 = vpack.c.bf16 %v1920_v5, %v1914_v1  ;;  %v2935_v7 = vld [vmem:[#allocation9 + $0x1] ss:$0 sm:$0xff]  ;;  %v2003_v5 = vld [vmem:[#allocation7 + $0x8f0] sm:$0xff] }
 0x393   :  { %3555 = vmatprep.subr.bf16.mxu1 %v3554_v13  ;;  %v1940_v13 = vld [vmem:[#allocation7 + $0x6f8] sm:$0xff]  ;;  %v1997_v1 = vld [vmem:[#allocation7 + $0x8c0] sm:$0xff] }
 0x396   :  { %3557 = vmatpush1.bf16.msra.mxu1 %v3556_v15  ;;  %v3518_v15 = vpack.c.bf16 %v1940_v13, %v1934_v12  ;;  %v1926_v12 = vld [vmem:[#allocation7 + $0x688] sm:$0xff]  ;;  %v1932_v13 = vld [vmem:[#allocation7 + $0x6b8] sm:$0xff] }
 0x397   :  { %3559 = vmatprep.subr.bf16.mxu1 %v3558_v19  ;;  %v1952_v19 = vld [vmem:[#allocation7 + $0x758] sm:$0xff] }
 0x39a   :  { %3561 = vmatpush1.bf16.msra.mxu1 %v3560_v21  ;;  %v3522_v21 = vpack.c.bf16 %v1952_v19, %v1946_v18  ;;  %v3578_v18 = vpack.c.bf16 %v1932_v13, %v1926_v12  ;;  %v1925_v19 = vld [vmem:[#allocation7 + $0x680] sm:$0xff] }
 0x39b   :  { %3563 = vmatprep.subr.bf16.mxu1 %v3562_v25  ;;  %v1964_v25 = vld [vmem:[#allocation7 + $0x7b8] sm:$0xff] }
 0x39e   :  { %3565 = vmatpush1.bf16.msra.mxu1 %v3564_v31  ;;  %v3526_v31 = vpack.c.bf16 %v1964_v25, %v1958_v24 }
 0x39f   :  { %3567 = vmatprep.subr.bf16.mxu1 %v3566_v40  ;;  %v1976_v40 = vld [vmem:[#allocation7 + $0x818] sm:$0xff] }
 0x3a2   :  { %3569 = vmatpush1.bf16.msra.mxu1 %v3568_v42  ;;  %v3530_v42 = vpack.c.bf16 %v1976_v40, %v1970_v38  ;;  %v3586_v40 = vpack.c.bf16 %v1956_v36, %v1950_v35  ;;  %v2714_v35 = vld [vmem:[#allocation10 + $0x40] sm:$0xff]  ;;  %v2715_v36 = vld [vmem:[#allocation10 + $0x48] sm:$0xff] }
 0x43c   :  { %v1273_v44 = vpop.f32.mrb[8].mxu1  ;;  %v1350_v45 = vpop.f32.mrb[8].mxu0 }
 0x43d   :  { %v1275_v46 = vpop.f32.mrb[9].mxu1  ;;  %v1352_v47 = vpop.f32.mrb[9].mxu0 }
 0x440   :  { %v1279_v50 = vpop.f32.mrb[10].mxu1  ;;  %v1356_v51 = vpop.f32.mrb[10].mxu0 }
 0x441   :  { %v3490_v52 = vpack.c.bf16 %v1279_v50, %v1273_v44  ;;  %v3494_v53 = vpack.c.bf16 %v1356_v51, %v1350_v45  ;;  %v1281_v54 = vpop.f32.mrb[11].mxu1  ;;  %v1358_v56 = vpop.f32.mrb[11].mxu0  ;;  %v1969_v44 = vld [vmem:[#allocation7 + $0x7e0] sm:$0xff]  ;;  %v1975_v45 = vld [vmem:[#allocation7 + $0x810] sm:$0xff] }
 0x442   :  { %v3486_v57 = vpack.c.bf16 %v1281_v54, %v1275_v46  ;;  %v3498_v58 = vpack.c.bf16 %v1358_v56, %v1352_v47  ;;  %v1982_v46 = vld [vmem:[#allocation7 + $0x848] sm:$0xff]  ;;  %v1988_v47 = vld [vmem:[#allocation7 + $0x878] sm:$0xff]  ;;  %v3532_v50 = vpack.c.bf16 %v1975_v45, %v1969_v44 }
 0x443   :  { %v3534_v51 = vpack.c.bf16 %v1988_v47, %v1982_v46  ;;  %v1994_v56 = vld [vmem:[#allocation7 + $0x8a8] sm:$0xff]  ;;  %v1968_v45 = vld [vmem:[#allocation7 + $0x7d8] sm:$0xff] }
 0x444   :  { %3487 = vmatprep.subr.bf16.mxu0 %v3486_v57  ;;  %v1962_v44 = vld [vmem:[#allocation7 + $0x7a8] sm:$0xff] }
 0x445   :  { %3489 = vmatpush3.bf16.msra.mxu0 %v3486_v57  ;;  %v2000_v57 = vld [vmem:[#allocation7 + $0x8d8] sm:$0xff]  ;;  %v3590_v47 = vpack.c.bf16 %v1968_v45, %v1962_v44  ;;  %v2718_v44 = vld [vmem:[#allocation10 + $0x60] sm:$0xff]  ;;  %v2719_v45 = vld [vmem:[#allocation10 + $0x68] sm:$0xff] }
 0x446   :  { %3491 = vmatprep.subr.bf16.mxu0 %v3490_v52 }
 0x448   :  { %3137 = vmatmul.mubr.msk.f32.vlgmr.msra.gmra.mrb[12].mxu0 %vm584_vm1, %v4153_v26 }
 0x449   :  { %3493 = vmatpush3.bf16.msra.mxu0 %v3490_v52  ;;  %3143 = vmatprep.mubr.msk.f32.mxu0 %vm584_vm1, %v4155_v27  ;;  %v1981_v52 = vld [vmem:[#allocation7 + $0x840] sm:$0xff] }
 0x44a   :  { %3495 = vmatprep.subr.bf16.mxu0 %v3494_v53 }
 0x450   :  { %3144 = vmatmul.mubr.msk.f32.vlgmr.msra.gmra.mrb[12].mxu0 %vm584_vm1, %v4161_v29 }
 0x451   :  { %3497 = vmatpush3.bf16.msra.mxu0 %v3494_v53  ;;  %3150 = vmatprep.mubr.msk.f32.mxu0 %vm584_vm1, %v4163_v30  ;;  %v1987_v53 = vld [vmem:[#allocation7 + $0x870] sm:$0xff] }
 0x452   :  { %3499 = vmatprep.subr.bf16.mxu0 %v3498_v58  ;;  %v3536_v54 = vpack.c.bf16 %v1987_v53, %v1981_v52  ;;  %v1974_v52 = vld [vmem:[#allocation7 + $0x808] sm:$0xff]  ;;  %v1980_v53 = vld [vmem:[#allocation7 + $0x838] sm:$0xff] }
 0x458   :  { %3151 = vmatmul.mubr.msk.f32.vlgmr.msra.gmra.mrb[12].mxu0 %vm584_vm1, %v4169_v32 }
 0x459   :  { %3501 = vmatpush3.bf16.msra.mxu0 %v3498_v58  ;;  %3157 = vmatprep.mubr.msk.f32.mxu0 %vm584_vm1, %v4171_v34  ;;  %v3538_v58 = vpack.c.bf16 %v2000_v57, %v1994_v56  ;;  %v3594_v56 = vpack.c.bf16 %v1980_v53, %v1974_v52  ;;  %v1973_v57 = vld [vmem:[#allocation7 + $0x800] sm:$0xff]  ;;  %v2720_v52 = vld [vmem:[#allocation10 + $0x70] sm:$0xff] }
 0x45a   :  { %v2721_v53 = vld [vmem:[#allocation10 + $0x78] sm:$0xff] }
 0x45c   :  { %v1427_v59 = vpop.f32.mrb[12].mxu1 }
 0x45d   :  { %v1429_v60 = vpop.f32.mrb[13].mxu1 }
 0x460   :  { %v1433_v61 = vpop.f32.mrb[14].mxu1  ;;  %3158 = vmatmul.mubr.msk.f32.vlgmr.msra.gmra.mrb[12].mxu0 %vm584_vm1, %v4177_v37 }
 0x461   :  { %v3502_v62 = vpack.c.bf16 %v1433_v61, %v1427_v59  ;;  %v1435_v63 = vpop.f32.mrb[15].mxu1  ;;  %3164 = vmatprep.mubr.msk.f32.mxu0 %vm584_vm1, %v4179_v39  ;;  %v1993_v59 = vld [vmem:[#allocation7 + $0x8a0] sm:$0xff] }
 0x462   :  { %v3506_v0 = vpack.c.bf16 %v1435_v63, %v1429_v60  ;;  %v1999_v60 = vld [vmem:[#allocation7 + $0x8d0] sm:$0xff]  ;;  %v2002_v63 = vld [vmem:[#allocation7 + $0x8e8] sm:$0xff] }
 0x463   :  { %3503 = vmatprep.subr.bf16.mxu0 %v3502_v62  ;;  %v3540_v61 = vpack.c.bf16 %v1999_v60, %v1993_v59  ;;  %v1986_v59 = vld [vmem:[#allocation7 + $0x868] sm:$0xff]  ;;  %v1992_v60 = vld [vmem:[#allocation7 + $0x898] sm:$0xff] }
 0x464   :  { %3505 = vmatpush3.bf16.msra.mxu0 %v3502_v62  ;;  %v1996_v62 = vld [vmem:[#allocation7 + $0x8b8] sm:$0xff] }
 0x465   :  { %3507 = vmatprep.subr.bf16.mxu0 %v3506_v0  ;;  %v3570_v2 = vpack.c.bf16 %v2002_v63, %v1996_v62  ;;  %v1985_v62 = vld [vmem:[#allocation7 + $0x860] sm:$0xff]  ;;  %v1991_v63 = vld [vmem:[#allocation7 + $0x890] sm:$0xff] }
 0x467   :  { %3571 = vmatprep.subr.bf16.mxu1 %v3570_v2  ;;  %v2004_v2 = vld [vmem:[#allocation7 + $0x8f8] sm:$0xff] }
 0x468   :  { %3165 = vmatmul.mubr.msk.f32.vlgmr.msra.gmra.mrb[12].mxu0 %vm584_vm1, %v4185_v48 }
 0x469   :  { %3509 = vmatpush3.bf16.msra.mxu0 %v3506_v0  ;;  %3171 = vmatprep.mubr.msk.f32.mxu0 %vm584_vm1, %v4187_v49  ;;  %v1995_v0 = vld [vmem:[#allocation7 + $0x8b0] sm:$0xff] }
 0x46a   :  { %3511 = vmatprep.subr.bf16.mxu0 %v3510_v4  ;;  %v3572_v4 = vpack.c.bf16 %v2001_v3, %v1995_v0  ;;  %v1998_v0 = vld [vmem:[#allocation7 + $0x8c8] sm:$0xff]  ;;  %v3600_v3 = vpack.c.bf16 %v1991_v63, %v1985_v62 }
 0x46c   :  { %3573 = vmatpush1.bf16.msra.mxu1 %v3572_v4  ;;  %v3602_v4 = vpack.c.bf16 %v2004_v2, %v1998_v0 }
 0x470   :  { %3172 = vmatmul.mubr.msk.f32.vlgmr.msra.gmra.mrb[12].mxu0 %vm584_vm1, %v4193_v55 }
 0x471   :  { %3513 = vmatpush1.bf16.msra.mxu0 %v3512_v8  ;;  %2069 = vmatprep.mubr.f32.mxu0 %v3945_v43 }
 0x472   :  { %3515 = vmatprep.subr.bf16.mxu0 %v3514_v9  ;;  %v1913_v9 = vld [vmem:[#allocation7 + $0x620] sm:$0xff] }
 0x475   :  { %3517 = vmatpush1.bf16.msra.mxu0 %v3516_v14 }
 0x476   :  { %3519 = vmatprep.subr.bf16.mxu0 %v3518_v15  ;;  %v3576_v15 = vpack.c.bf16 %v1919_v10, %v1913_v9 }
 0x479   :  { %3521 = vmatpush1.bf16.msra.mxu0 %v3520_v20  ;;  %v1931_v20 = vld [vmem:[#allocation7 + $0x6b0] sm:$0xff] }
 0x47a   :  { %3523 = vmatprep.subr.bf16.mxu0 %v3522_v21  ;;  %v1938_v21 = vld [vmem:[#allocation7 + $0x6e8] sm:$0xff]  ;;  %v3580_v23 = vpack.c.bf16 %v1931_v20, %v1925_v19 }
 0x47b   :  { %v3582_v25 = vpack.c.bf16 %v1944_v22, %v1938_v21  ;;  %v2706_v20 = vld [vmem:[#allocation10] sm:$0xff]  ;;  %v2709_v21 = vld [vmem:[#allocation10 + $0x18] sm:$0xff] }
 0x47d   :  { %3525 = vmatpush1.bf16.msra.mxu0 %v3524_v28  ;;  %v1937_v28 = vld [vmem:[#allocation7 + $0x6e0] sm:$0xff] }
 0x47e   :  { %3527 = vmatprep.subr.bf16.mxu0 %v3526_v31  ;;  %v1943_v31 = vld [vmem:[#allocation7 + $0x710] sm:$0xff] }
 0x47f   :  { %v3584_v38 = vpack.c.bf16 %v1943_v31, %v1937_v28  ;;  %v2712_v28 = vld [vmem:[#allocation10 + $0x30] sm:$0xff]  ;;  %v2713_v31 = vld [vmem:[#allocation10 + $0x38] sm:$0xff] }
 0x481   :  { %3529 = vmatpush1.bf16.msra.mxu0 %v3528_v41  ;;  %v1949_v41 = vld [vmem:[#allocation7 + $0x740] sm:$0xff] }
 0x482   :  { %3531 = vmatprep.subr.bf16.mxu0 %v3530_v42  ;;  %v1955_v42 = vld [vmem:[#allocation7 + $0x770] sm:$0xff] }
 0x483   :  { %v3588_v46 = vpack.c.bf16 %v1955_v42, %v1949_v41  ;;  %v2807_v42 = vld [vmem:[#allocation13 + $0x8] sm:$0xff] }
 0x485   :  { %3533 = vmatpush1.bf16.msra.mxu0 %v3532_v50  ;;  %v1961_v50 = vld [vmem:[#allocation7 + $0x7a0] sm:$0xff] }
 0x486   :  { %3535 = vmatprep.subr.bf16.mxu0 %v3534_v51  ;;  %v1967_v51 = vld [vmem:[#allocation7 + $0x7d0] sm:$0xff] }
 0x489   :  { %3537 = vmatpush1.bf16.msra.mxu0 %v3536_v54  ;;  %v3592_v54 = vpack.c.bf16 %v1967_v51, %v1961_v50  ;;  %v2808_v50 = vld [vmem:[#allocation13 + $0x10] sm:$0xff]  ;;  %v2809_v51 = vld [vmem:[#allocation13 + $0x18] sm:$0xff] }
 0x48a   :  { %3539 = vmatprep.subr.bf16.mxu0 %v3538_v58  ;;  %v1979_v58 = vld [vmem:[#allocation7 + $0x830] sm:$0xff] }
 0x48d   :  { %3541 = vmatpush1.bf16.msra.mxu0 %v3540_v61  ;;  %v3598_v61 = vpack.c.bf16 %v1992_v60, %v1986_v59 }
 0x48e   :  { %3575 = vmatprep.subr.bf16.mxu0 %v3574_v6  ;;  %v3604_v6 = vpack.c.bf16 %v2003_v5, %v1997_v1 }
 0x543   :  { %v3173_v8 = vpop.f32.mrb[12].mxu0 }
 0x544   :  { %v1885_v11 = vpop.f32.mrb[13].mxu0  ;;  %v1905_v16 = vadd.f32 %v3173_v8, %v2935_v7 }
 0x545   :  { %v1904_v14 = vadd.f32 %v2935_v7, %v1885_v11 }
 0x546   :  { %v1907_v24 = vmax.f32 %v1905_v16, 0.0 }
 0x547   :  { %v4233_v17 = vmax.f32 %v1904_v14, 0.0 }
 0x549   :  { %2070 = vmatmul.mubr.f32.vlgmr.msra.gmra.mrb[14].mxu0 %v4233_v17  ;;  %2147 = vmatmul.mubr.f32.vlgmr.msra.gmra.mrb[16].mxu1 %v4233_v17 }
 0x54a   :  { %3577 = vmatpush1.bf16.msra.mxu0 %v3576_v15  ;;  %2075 = vmatprep.mubr.f32.mxu0 %v3945_v43 }
 0x54b   :  { %2152 = vmatprep.mubr.f32.mxu1 %v3945_v43  ;;  %3579 = vmatprep.subr.bf16.mxu0 %v3578_v18 }
 0x54d   :  { %2076 = vmatmul.mubr.f32.gmra.mrb[16].mxu0 %v1907_v24  ;;  %2153 = vmatmul.mubr.f32.gmra.mrb[18].mxu1 %v1907_v24 }
 0x54e   :  { %3581 = vmatpush1.bf16.msra.mxu0 %v3580_v23  ;;  %2223 = vmatprep.mubr.f32.mxu0 %v3945_v43  ;;  %v2710_v23 = vld [vmem:[#allocation10 + $0x20] sm:$0xff] }
 0x54f   :  { %3583 = vmatprep.subr.bf16.mxu0 %v3582_v25  ;;  %3192 = vmatprep.mubr.msk.f32.mxu1 %vm584_vm1, %v4163_v30  ;;  %v3596_v30 = vpack.c.bf16 %v1979_v58, %v1973_v57  ;;  %v3719_v57 = vld [vmem:[%s4280_s0 + $0x8] sm:$0xff] }
 0x552   :  { %3585 = vmatpush1.bf16.msra.mxu0 %v3584_v38  ;;  %v2716_v38 = vld [vmem:[#allocation10 + $0x50] sm:$0xff] }
 0x553   :  { %3587 = vmatprep.subr.bf16.mxu0 %v3586_v40  ;;  %v2717_v40 = vld [vmem:[#allocation10 + $0x58] sm:$0xff] }
 0x554   :  { %v3650_v41 = vpack.c.bf16 %v2717_v40, %v2716_v38 }
 0x556   :  { %3589 = vmatpush1.bf16.msra.mxu0 %v3588_v46 }
 0x557   :  { %3591 = vmatprep.subr.bf16.mxu0 %v3590_v47  ;;  %v3654_v47 = vpack.c.bf16 %v2719_v45, %v2718_v44 }
 0x55a   :  { %3593 = vmatpush1.bf16.msra.mxu0 %v3592_v54  ;;  %v3666_v54 = vpack.c.bf16 %v2809_v51, %v2808_v50 }
 0x55b   :  { %3595 = vmatprep.subr.bf16.mxu0 %v3594_v56  ;;  %v3658_v56 = vpack.c.bf16 %v2721_v53, %v2720_v52 }
 0x55e   :  { %3597 = vmatpush1.bf16.msra.mxu0 %v3596_v30  ;;  %v2948_v30 = vld [vmem:[#allocation9 + $0x2] ss:$0 sm:$0xff] }
 0x55f   :  { %3599 = vmatprep.subr.bf16.mxu0 %v3598_v61 }
 0x562   :  { %3601 = vmatpush1.bf16.msra.mxu0 %v3600_v3 }
 0x563   :  { %3603 = vmatprep.subr.bf16.mxu0 %v3602_v4 }
 0x566   :  { %3605 = vmatpush1.bf16.msra.mxu0 %v3604_v6  ;;  %v2950_v6 = vld [vmem:[#allocation15] ss:$0 sm:$0xff] }
 0x569   :  { %2224 = vmatmul.mubr.f32.vlgmr.msra.gmra.mrb[18].mxu0 %v4233_v17 }
 0x56a   :  { %2229 = vmatprep.mubr.f32.mxu0 %v3945_v43  ;;  %v3718_v43 = vld [vmem:[%s4280_s0] sm:$0xff] }
 0x56d   :  { %2230 = vmatmul.mubr.f32.gmra.mrb[20].mxu0 %v1907_v24  ;;  %v2711_v24 = vld [vmem:[#allocation10 + $0x28] sm:$0xff] }
 0x56e   :  { %3178 = vmatprep.mubr.msk.f32.mxu0 %vm584_vm1, %v4148_v33  ;;  %v3638_v25 = vpack.c.bf16 %v2711_v24, %v2710_v23 }
 0x61c   :  { %v2071_v7 = vpop.f32.mrb[14].mxu0  ;;  %v2148_v8 = vpop.f32.mrb[16].mxu1 }
 0x61d   :  { %v2073_v9 = vpop.f32.mrb[15].mxu0  ;;  %v2150_v10 = vpop.f32.mrb[17].mxu1 }
 0x620   :  { %v2077_v11 = vpop.f32.mrb[16].mxu0  ;;  %v2154_v12 = vpop.f32.mrb[18].mxu1 }
 0x621   :  { %v3610_v13 = vpack.c.bf16 %v2077_v11, %v2071_v7  ;;  %v3614_v14 = vpack.c.bf16 %v2154_v12, %v2148_v8  ;;  %v2079_v15 = vpop.f32.mrb[17].mxu0  ;;  %v2156_v16 = vpop.f32.mrb[19].mxu1  ;;  %v2949_v8 = vld [vmem:[#allocation12] ss:$0 sm:$0xff] }
 0x622   :  { %v3606_v18 = vpack.c.bf16 %v2079_v15, %v2073_v9  ;;  %v3618_v19 = vpack.c.bf16 %v2156_v16, %v2150_v10 }
 0x623   :  { %3615 = vmatprep.subr.bf16.mxu1 %v3614_v14 }
 0x624   :  { %3607 = vmatprep.subr.bf16.mxu0 %v3606_v18  ;;  %3617 = vmatpush3.bf16.msra.mxu1 %v3614_v14 }
 0x625   :  { %3609 = vmatpush3.bf16.msra.mxu0 %v3606_v18  ;;  %3619 = vmatprep.subr.bf16.mxu1 %v3618_v19 }
 0x626   :  { %3611 = vmatprep.subr.bf16.mxu0 %v3610_v13 }
 0x627   :  { %3193 = vmatmul.mubr.msk.f32.vlgmr.msra.gmra.mrb[20].mxu1 %vm584_vm1, %v4169_v32 }
 0x628   :  { %3621 = vmatpush3.bf16.msra.mxu1 %v3618_v19  ;;  %3179 = vmatmul.mubr.msk.f32.vlgmr.msra.gmra.mrb[22].mxu0 %vm584_vm1, %v4153_v26 }
 0x629   :  { %3613 = vmatpush3.bf16.msra.mxu0 %v3610_v13  ;;  %3199 = vmatprep.mubr.msk.f32.mxu1 %vm584_vm1, %v4171_v34 }
 0x62a   :  { %3185 = vmatprep.mubr.msk.f32.mxu0 %vm584_vm1, %v4155_v27 }
 0x62f   :  { %3200 = vmatmul.mubr.msk.f32.vlgmr.msra.gmra.mrb[20].mxu1 %vm584_vm1, %v4177_v37  ;;  %v2707_v37 = vld [vmem:[#allocation10 + $0x8] sm:$0xff] }
 0x630   :  { %3206 = vmatprep.mubr.msk.f32.mxu1 %vm584_vm1, %v4179_v39  ;;  %3186 = vmatmul.mubr.msk.f32.vlgmr.msra.gmra.mrb[22].mxu0 %vm584_vm1, %v4161_v29  ;;  %v3630_v39 = vpack.c.bf16 %v2707_v37, %v2706_v20  ;;  %v2708_v29 = vld [vmem:[#allocation10 + $0x10] sm:$0xff] }
 0x631   :  { %3259 = vmatprep.mubr.msk.f32.mxu0 %vm164_vm0, %v3718_v43  ;;  %v3634_v22 = vpack.c.bf16 %v2709_v21, %v2708_v29 }
 0x63c   :  { %v2225_v33 = vpop.f32.mrb[18].mxu0 }
 0x63d   :  { %v2227_v26 = vpop.f32.mrb[19].mxu0 }
 0x640   :  { %v2231_v32 = vpop.f32.mrb[20].mxu0 }
 0x641   :  { %v3622_v34 = vpack.c.bf16 %v2231_v32, %v2225_v33  ;;  %v2233_v27 = vpop.f32.mrb[21].mxu0 }
 0x642   :  { %v3626_v17 = vpack.c.bf16 %v2233_v27, %v2227_v26 }
 0x643   :  { %3623 = vmatprep.subr.bf16.mxu1 %v3622_v34 }
 0x644   :  { %3625 = vmatpush3.bf16.msra.mxu1 %v3622_v34 }
 0x645   :  { %3627 = vmatprep.subr.bf16.mxu1 %v3626_v17 }
 0x647   :  { %3207 = vmatmul.mubr.msk.f32.vlgmr.msra.gmra.mrb[20].mxu1 %vm584_vm1, %v4185_v48  ;;  %v3642_v48 = vpack.c.bf16 %v2713_v31, %v2712_v28 }
 0x648   :  { %3629 = vmatpush3.bf16.msra.mxu1 %v3626_v17  ;;  %3213 = vmatprep.mubr.msk.f32.mxu1 %vm584_vm1, %v4187_v49  ;;  %v3646_v49 = vpack.c.bf16 %v2715_v36, %v2714_v35 }
 0x649   :  { %3631 = vmatprep.subr.bf16.mxu1 %v3630_v39 }
 0x64f   :  { %3214 = vmatmul.mubr.msk.f32.vlgmr.msra.gmra.mrb[20].mxu1 %vm584_vm1, %v4193_v55  ;;  %v2806_v55 = vld [vmem:[#allocation13] sm:$0xff] }
 0x650   :  { %3633 = vmatpush3.bf16.msra.mxu1 %v3630_v39  ;;  %v3662_v46 = vpack.c.bf16 %v2807_v42, %v2806_v55 }
 0x651   :  { %3635 = vmatprep.subr.bf16.mxu1 %v3634_v22 }
 0x652   :  { %3663 = vmatprep.subr.bf16.mxu0 %v3662_v46 }
 0x653   :  { %3665 = vmatpush3.bf16.msra.mxu0 %v3662_v46 }
 0x654   :  { %3637 = vmatpush3.bf16.msra.mxu1 %v3634_v22  ;;  %3667 = vmatprep.subr.bf16.mxu0 %v3666_v54 }
 0x655   :  { %3639 = vmatprep.subr.bf16.mxu1 %v3638_v25 }
 0x657   :  { %3669 = vmatpush3.bf16.msra.mxu0 %v3666_v54 }
 0x658   :  { %3641 = vmatpush3.bf16.msra.mxu1 %v3638_v25 }
 0x659   :  { %3643 = vmatprep.subr.bf16.mxu1 %v3642_v48 }
 0x65a   :  { %3260 = vmatmul.mubr.msk.f32.vlgmr.msra.gmra.mrb[24].mxu0 %vm164_vm0, %v3719_v57 }
 0x65c   :  { %3645 = vmatpush3.bf16.msra.mxu1 %v3642_v48 }
 0x65d   :  { %3647 = vmatprep.subr.bf16.mxu1 %v3646_v49 }
 0x660   :  { %3649 = vmatpush3.bf16.msra.mxu1 %v3646_v49 }
 0x661   :  { %3651 = vmatprep.subr.bf16.mxu1 %v3650_v41 }
 0x664   :  { %3653 = vmatpush3.bf16.msra.mxu1 %v3650_v41 }
 0x665   :  { %3655 = vmatprep.subr.bf16.mxu1 %v3654_v47 }
 0x668   :  { %3657 = vmatpush3.bf16.msra.mxu1 %v3654_v47 }
 0x669   :  { %3659 = vmatprep.subr.bf16.mxu1 %v3658_v56 }
 0x66c   :  { %3661 = vmatpush3.bf16.msra.mxu1 %v3658_v56 }
 0x703   :  { %v3187_v58 = vpop.f32.mrb[22].mxu0 }
 0x704   :  { %v2377_v59 = vpop.f32.mrb[23].mxu0 }
 0x722   :  { %v3215_v60 = vpop.f32.mrb[20].mxu1 }
 0x723   :  { %v3670_v61 = vadd.f32 %v3215_v60, %v3187_v58  ;;  %v2683_v62 = vpop.f32.mrb[21].mxu1 }
 0x724   :  { %v3671_v63 = vadd.f32 %v2683_v62, %v2377_v59 }
 0x725   :  { %v2703_v0 = vadd.f32 %v3670_v61, %v2948_v30 }
 0x726   :  { %v2702_v2 = vadd.f32 %v3671_v63, %v2948_v30 }
 0x727   :  { %v2705_v4 = vmax.f32 %v2703_v0, 0.0 }
 0x728   :  { %v2704_v3 = vmax.f32 %v2702_v2, 0.0 }
 0x72a   :  { %3248 = vmatprep.mubr.f32.mxu1 %v2704_v3 }
 0x72b   :  { %3249 = vmatmul.mubr.f32.vlgmr.msra.gmra.mrb[22].mxu1 %v2705_v4 }
 0x72d   :  { %v3261_v1 = vpop.f32.mrb[24].mxu0 }
 0x72e   :  { %v2883_v5 = vpop.f32.mrb[25].mxu0  ;;  %v2889_v7 = vadd.f32 %v3261_v1, %v2950_v6 }
 0x72f   :  { %v2884_v9 = vadd.f32 %v2950_v6, %v2883_v5 }
 0x730   :  { %v2893_v12 = vmax.f32 %v2889_v7, 0.0 }
 0x731   :  { %v2892_v15 = vmax.f32 %v2884_v9, 0.0 }
 0x7fe   :  { %v3250_v10 = vpop.f32.mrb[22].mxu1 }
 0x7ff   :  { %v2801_v11 = vadd.f32 %v3250_v10, %v2949_v8  ;;  %v2795_v13 = vpop.f32.mrb[23].mxu1 }
 0x800   :  { %v2796_v14 = vadd.f32 %v2949_v8, %v2795_v13 }
 0x801   :  { %v2805_v16 = vmax.f32 %v2801_v11, 0.0 }
 0x802   :  { %v2804_v18 = vmax.f32 %v2796_v14, 0.0 }
 0x803   :  { %v2895_v19 = vadd.f32 %v2893_v12, %v2805_v16 }
 0x804   :  { %v2894_v43 = vadd.f32 %v2892_v15, %v2804_v18 }
 0x805   :  { %2897 = vst [vmem:[%s4290_s10 + $0x8] sm:$0xff] %v2895_v19 }
 0x806   :  { %2896 = vst [vmem:[%s4290_s10] sm:$0xff] %v2894_v43 }
 0x807   :  { %2902 = vsyncpa [#allocation3], 1 }
 0x808   :  { %2903 = vsyncpa [#allocation5], 1 }
 0x809   :  { %2904 = vsyncpa [#allocation8], 1 }
 0x80a   :  { %2905 = vsyncpa [#allocation11], 1 }
 0x80b   :  { %2906 = vsyncpa [#allocation14], 1 }

</bundles_post_ra>
